<compile_context>
chip_gen: v7x
topology: tpu7x:2x2x1
jax: 0.10.0
libtpu: 0.0.40
codegen_flags: <defaults>
</compile_context>

<pallas_src>
import functools

import jax
import jax.numpy as jnp
from jax import lax
from jax.experimental import pallas as pl
from jax.experimental.pallas import tpu as pltpu


def _layernorm(v, g, b, eps=1e-5):
    # One-pass mean/variance (E[x^2] - mu^2): one pair of cross-lane reductions
    # per row instead of two full passes over (N, C).
    mu = jnp.mean(v, axis=-1, keepdims=True)
    var = jnp.mean(v * v, axis=-1, keepdims=True) - mu * mu
    return (v - mu) * lax.rsqrt(var + eps) * g + b


# A(N, d) x B(M, d) -> (N, M): contract trailing dim of both operands
# (MXU matmul with transposed rhs, no explicit k.T / XLU transpose).
_TRANS_B_DIMS = (((1,), (1,)), ((), ()))


def block_kernel(x_ref, g1_ref, b1_ref, wqkv_ref, bqkv_ref, wproj_ref, bproj_ref,
                 g2_ref, b2_ref, wfc1_ref, bfc1_ref, wfc2_ref, bfc2_ref, o_ref,
                 attn_acc_ref, *, num_heads):
    f32, bf16 = jnp.float32, jnp.bfloat16
    x = x_ref[0].astype(f32)                      # (N, C) residual stream, f32
    N, C = x.shape
    hd = C // num_heads

    # ---- attention branch ----------------------------------------------------
    h = _layernorm(x, g1_ref[...], b1_ref[...])                     # (N, C) f32
    # One fused (N, C) x (C, 3C) matmul: bf16 operands, f32 accumulation.
    # Softmax scale is already folded into the q columns of w_qkv / b_qkv.
    qkv = jnp.dot(h.astype(bf16), wqkv_ref[...],
                  preferred_element_type=f32) + bqkv_ref[...]       # (N, 3C)
    q = qkv[:, 0 * C:1 * C].astype(bf16)
    k = qkv[:, 1 * C:2 * C].astype(bf16)
    v = qkv[:, 2 * C:3 * C].astype(bf16)

    # Static loop over heads; each iteration's only live output is the store
    # into the VMEM scratch slice, so (N, N) scores never stack up across heads.
    for hh in range(num_heads):
        sl = slice(hh * hd, (hh + 1) * hd)
        s = lax.dot_general(q[:, sl], k[:, sl], _TRANS_B_DIMS,
                            preferred_element_type=f32)             # (N, N) f32
        s = s - jnp.max(s, axis=-1, keepdims=True)
        p = jnp.exp(s)
        l = jnp.sum(p, axis=-1, keepdims=True)
        # Un-normalized probs @ V, then per-row 1/l on the small (N, hd) output.
        o_h = jnp.dot(p.astype(bf16), v[:, sl], preferred_element_type=f32)
        attn_acc_ref[:, sl] = o_h * pl.reciprocal(l, approx=False)

    attn_out = jnp.dot(attn_acc_ref[...].astype(bf16), wproj_ref[...],
                       preferred_element_type=f32) + bproj_ref[...]
    x = x + attn_out                                                # residual 1

    # ---- MLP branch ----------------------------------------------------------
    h2 = _layernorm(x, g2_ref[...], b2_ref[...])
    h2 = jnp.dot(h2.astype(bf16), wfc1_ref[...],
                 preferred_element_type=f32) + bfc1_ref[...]
    h2 = jax.nn.gelu(h2, approximate=True)        # tanh approx (see header TODO)
    h2 = jnp.dot(h2.astype(bf16), wfc2_ref[...],
                 preferred_element_type=f32) + bfc2_ref[...]
    x = x + h2                                                      # residual 2

    o_ref[0] = x.astype(o_ref.dtype)


def _vmem_limit_bytes():
    # Generation-aware VMEM budget: ~0.75x of physical capacity
    # (v5e/v6e: ~96 MiB, v7x: ~48 MiB).  Conservative fallback if the query
    # is unavailable in this JAX build.
    try:
        cap = int(pltpu.get_tpu_info().vmem_capacity_bytes)
        return int(0.75 * cap)
    except Exception:
        return 48 * 1024 * 1024


def _build_call(B, N, C, Hd, out_dtype, num_heads, single_buffer_weights):
    kernel = functools.partial(block_kernel, num_heads=num_heads)

    def rep(shape):
        # Full-array block, grid-invariant across the batch axis (DMA'd once).
        if single_buffer_weights:
            # Single-buffer invariant weights: halves their VMEM footprint
            # with zero pipelining cost (they never change across the grid).
            return pl.BlockSpec(shape, lambda b: (0,) * len(shape),
                                pipeline_mode=pl.Buffered(1))
        return pl.BlockSpec(shape, lambda b: (0,) * len(shape))

    in_specs = [
        pl.BlockSpec((1, N, C), lambda b: (b, 0, 0)),   # x
        rep((1, C)), rep((1, C)),                       # ln1 gamma, beta
        rep((C, 3 * C)), rep((1, 3 * C)),               # qkv
        rep((C, C)), rep((1, C)),                       # proj
        rep((1, C)), rep((1, C)),                       # ln2 gamma, beta
        rep((C, Hd)), rep((1, Hd)),                     # fc1
        rep((Hd, C)), rep((1, C)),                      # fc2
    ]

    return pl.pallas_call(
        kernel,
        out_shape=jax.ShapeDtypeStruct((B, N, C), out_dtype),
        grid=(B,),
        in_specs=in_specs,
        out_specs=pl.BlockSpec((1, N, C), lambda b: (b, 0, 0)),
        scratch_shapes=[pltpu.VMEM((N, C), jnp.float32)],   # attn accumulator
        compiler_params=pltpu.CompilerParams(
            dimension_semantics=("parallel",),
            vmem_limit_bytes=_vmem_limit_bytes(),
        ),
    )


def prepare_block_params(params, num_heads):
    """One-time host-side prep: fold softmax scale into q columns, cast matmul
    weights to bf16 (MXU-native, half the VMEM).  Biases / LN affine stay f32
    (added after f32 accumulation)."""
    f32, bf16 = jnp.float32, jnp.bfloat16
    C = params["w_qkv"].shape[0]
    scale = (C // num_heads) ** (-0.5)
    col_scale = jnp.concatenate(
        [jnp.full((C,), scale, f32), jnp.ones((2 * C,), f32)])[None, :]
    return {
        "g1": params["g1"], "b1": params["b1"],
        "w_qkv": (params["w_qkv"] * col_scale).astype(bf16),
        "b_qkv": params["b_qkv"] * col_scale,
        "w_proj": params["w_proj"].astype(bf16), "b_proj": params["b_proj"],
        "g2": params["g2"], "b2": params["b2"],
        "w_fc1": params["w_fc1"].astype(bf16), "b_fc1": params["b_fc1"],
        "w_fc2": params["w_fc2"].astype(bf16), "b_fc2": params["b_fc2"],
    }


def block_forward(x, prepared, num_heads):
    B, N, C = x.shape
    assert C % num_heads == 0, "dim must be divisible by num_heads"
    Hd = prepared["w_fc1"].shape[1]

    args = (x, prepared["g1"], prepared["b1"], prepared["w_qkv"], prepared["b_qkv"],
            prepared["w_proj"], prepared["b_proj"], prepared["g2"], prepared["b2"],
            prepared["w_fc1"], prepared["b_fc1"], prepared["w_fc2"], prepared["b_fc2"])

    try:
        return _build_call(B, N, C, Hd, x.dtype, num_heads,
                           single_buffer_weights=True)(*args)
    except Exception:
        # TODO(synk): fallback for JAX builds that reject pl.Buffered(1) on
        # grid-invariant inputs; uses default double-buffering instead.
        return _build_call(B, N, C, Hd, x.dtype, num_heads,
                           single_buffer_weights=False)(*args)


def block_reference(x, params, num_heads):
    """Pure-JAX f32 reference of the same forward pass (for self-check)."""
    B, N, C = x.shape
    hd = C // num_heads
    scale = hd ** (-0.5)

    h = _layernorm(x, params["g1"], params["b1"])
    qkv = h @ params["w_qkv"] + params["b_qkv"]                 # (B, N, 3C)
    qkv = qkv.reshape(B, N, 3, num_heads, hd).transpose(2, 0, 3, 1, 4)
    q, k, v = qkv[0], qkv[1], qkv[2]                            # (B, H, N, hd)
    attn = jnp.einsum("bhnd,bhmd->bhnm", q, k) * scale
    attn = jax.nn.softmax(attn, axis=-1)
    ao = jnp.einsum("bhnm,bhmd->bhnd", attn, v)
    ao = ao.transpose(0, 2, 1, 3).reshape(B, N, C)
    ao = ao @ params["w_proj"] + params["b_proj"]
    x = x + ao

    h2 = _layernorm(x, params["g2"], params["b2"])
    h2 = jax.nn.gelu(h2 @ params["w_fc1"] + params["b_fc1"], approximate=True)
    h2 = h2 @ params["w_fc2"] + params["b_fc2"]
    return x + h2


def make_params(key, dim, num_heads, mlp_ratio=4.0):
    hidden = int(dim * mlp_ratio)
    ks = jax.random.split(key, 8)
    f32 = jnp.float32
    # nn.Linear weights are (out, in) in torch; stored here pre-transposed (in, out).
    return {
        "g1": jnp.ones((1, dim), f32),
        "b1": jnp.zeros((1, dim), f32),
        "w_qkv": 0.02 * jax.random.normal(ks[0], (dim, 3 * dim), f32),
        "b_qkv": 0.01 * jax.random.normal(ks[1], (1, 3 * dim), f32),
        "w_proj": 0.02 * jax.random.normal(ks[2], (dim, dim), f32),
        "b_proj": 0.01 * jax.random.normal(ks[3], (1, dim), f32),
        "g2": jnp.ones((1, dim), f32),
        "b2": jnp.zeros((1, dim), f32),
        "w_fc1": 0.02 * jax.random.normal(ks[4], (dim, hidden), f32),
        "b_fc1": 0.01 * jax.random.normal(ks[5], (1, hidden), f32),
        "w_fc2": 0.02 * jax.random.normal(ks[6], (hidden, dim), f32),
        "b_fc2": 0.01 * jax.random.normal(ks[7], (1, dim), f32),
    }


if __name__ == "__main__":
    # Small but lane/sublane-friendly toy shapes: C=128 (one full lane tile),
    # N=16 (2 sublane tiles), so stores are lane-dense even in the demo.
    B, N, C = 2, 16, 128
    num_heads = 4

    key = jax.random.PRNGKey(0)
    kx, kp = jax.random.split(key)
    x = jax.random.normal(kx, (B, N, C), jnp.float32)
    params = make_params(kp, C, num_heads)
    prepared = prepare_block_params(params, num_heads)   # one-time weight prep

    out = jax.block_until_ready(block_forward(x, prepared, num_heads))
    ref = jax.block_until_ready(block_reference(x, params, num_heads))

    assert out.shape == (B, N, C)
    # bf16 matmul inputs (f32 accumulation) => loosened tolerance vs the f32 reference.
    max_err = jnp.max(jnp.abs(out - ref))
    assert max_err < 3e-2, f"Pallas output mismatch vs JAX reference (max err {max_err})"

    print("KERNEL_OK")
</pallas_src>

<mosaic_0001>
module attributes {stable_mosaic.version = 11 : i64} {
  func.func @block_kernel(%arg0: i32, %arg1: memref<1x16x128xf32, #tpu.memory_space<vmem>>, %arg2: memref<1x128xf32, #tpu.memory_space<vmem>>, %arg3: memref<1x128xf32, #tpu.memory_space<vmem>>, %arg4: memref<128x384xbf16, #tpu.memory_space<vmem>>, %arg5: memref<1x384xf32, #tpu.memory_space<vmem>>, %arg6: memref<128x128xbf16, #tpu.memory_space<vmem>>, %arg7: memref<1x128xf32, #tpu.memory_space<vmem>>, %arg8: memref<1x128xf32, #tpu.memory_space<vmem>>, %arg9: memref<1x128xf32, #tpu.memory_space<vmem>>, %arg10: memref<128x512xbf16, #tpu.memory_space<vmem>>, %arg11: memref<1x512xf32, #tpu.memory_space<vmem>>, %arg12: memref<512x128xbf16, #tpu.memory_space<vmem>>, %arg13: memref<1x128xf32, #tpu.memory_space<vmem>>, %arg14: memref<1x16x128xf32, #tpu.memory_space<vmem>>, %arg15: memref<16x128xf32, #tpu.memory_space<vmem>>) attributes {dimension_semantics = [#tpu.dimension_semantics<parallel>], iteration_bounds = array<i64: 2>, scalar_prefetch = 0 : i64, scratch_operands = 1 : i64, tpu.core_type = #tpu.core_type<tc>, window_params = [{transform_indices = @transform_0, window_bounds = array<i64: 1, 16, 128>}, {pipeline_mode = #tpu.pipeline_mode<synchronous>, transform_indices = @transform_1, window_bounds = array<i64: 1, 128>}, {pipeline_mode = #tpu.pipeline_mode<synchronous>, transform_indices = @transform_2, window_bounds = array<i64: 1, 128>}, {pipeline_mode = #tpu.pipeline_mode<synchronous>, transform_indices = @transform_3, window_bounds = array<i64: 128, 384>}, {pipeline_mode = #tpu.pipeline_mode<synchronous>, transform_indices = @transform_4, window_bounds = array<i64: 1, 384>}, {pipeline_mode = #tpu.pipeline_mode<synchronous>, transform_indices = @transform_5, window_bounds = array<i64: 128, 128>}, {pipeline_mode = #tpu.pipeline_mode<synchronous>, transform_indices = @transform_6, window_bounds = array<i64: 1, 128>}, {pipeline_mode = #tpu.pipeline_mode<synchronous>, transform_indices = @transform_7, window_bounds = array<i64: 1, 128>}, {pipeline_mode = #tpu.pipeline_mode<synchronous>, transform_indices = @transform_8, window_bounds = array<i64: 1, 128>}, {pipeline_mode = #tpu.pipeline_mode<synchronous>, transform_indices = @transform_9, window_bounds = array<i64: 128, 512>}, {pipeline_mode = #tpu.pipeline_mode<synchronous>, transform_indices = @transform_10, window_bounds = array<i64: 1, 512>}, {pipeline_mode = #tpu.pipeline_mode<synchronous>, transform_indices = @transform_11, window_bounds = array<i64: 512, 128>}, {pipeline_mode = #tpu.pipeline_mode<synchronous>, transform_indices = @transform_12, window_bounds = array<i64: 1, 128>}, {transform_indices = @transform_13, window_bounds = array<i64: 1, 16, 128>}]} {
    %c0 = arith.constant 0 : index
    %c0_0 = arith.constant 0 : index
    %c0_1 = arith.constant 0 : index
    %0 = vector.load %arg1[%c0, %c0_0, %c0_1] : memref<1x16x128xf32, #tpu.memory_space<vmem>>, vector<1x16x128xf32>
    %1 = vector.shape_cast %0 : vector<1x16x128xf32> to vector<16x128xf32>
    %c0_2 = arith.constant 0 : index
    %c0_3 = arith.constant 0 : index
    %2 = vector.load %arg2[%c0_2, %c0_3] : memref<1x128xf32, #tpu.memory_space<vmem>>, vector<1x128xf32>
    %c0_4 = arith.constant 0 : index
    %c0_5 = arith.constant 0 : index
    %3 = vector.load %arg3[%c0_4, %c0_5] : memref<1x128xf32, #tpu.memory_space<vmem>>, vector<1x128xf32>
    %cst = arith.constant dense<0.000000e+00> : vector<16xf32>
    %4 = vector.multi_reduction <add>, %1, %cst [1] : vector<16x128xf32> to vector<16xf32>
    %5 = vector.shape_cast %4 : vector<16xf32> to vector<16x1xf32>
    %cst_6 = arith.constant 1.280000e+02 : f32
    %6 = vector.broadcast %cst_6 : f32 to vector<16x1xf32>
    %7 = arith.divf %5, %6 : vector<16x1xf32>
    %8 = arith.mulf %1, %1 : vector<16x128xf32>
    %cst_7 = arith.constant dense<0.000000e+00> : vector<16xf32>
    %9 = vector.multi_reduction <add>, %8, %cst_7 [1] : vector<16x128xf32> to vector<16xf32>
    %10 = vector.shape_cast %9 : vector<16xf32> to vector<16x1xf32>
    %cst_8 = arith.constant 1.280000e+02 : f32
    %11 = vector.broadcast %cst_8 : f32 to vector<16x1xf32>
    %12 = arith.divf %10, %11 : vector<16x1xf32>
    %13 = arith.mulf %7, %7 : vector<16x1xf32>
    %14 = arith.subf %12, %13 : vector<16x1xf32>
    %15 = vector.broadcast %7 : vector<16x1xf32> to vector<16x128xf32>
    %16 = arith.subf %1, %15 : vector<16x128xf32>
    %cst_9 = arith.constant 9.99999974E-6 : f32
    %17 = vector.broadcast %cst_9 : f32 to vector<16x1xf32>
    %18 = arith.addf %14, %17 : vector<16x1xf32>
    %19 = math.rsqrt %18 : vector<16x1xf32>
    %20 = vector.broadcast %19 : vector<16x1xf32> to vector<16x128xf32>
    %21 = arith.mulf %16, %20 : vector<16x128xf32>
    %22 = vector.broadcast %2 : vector<1x128xf32> to vector<16x128xf32>
    %23 = arith.mulf %21, %22 : vector<16x128xf32>
    %24 = vector.broadcast %3 : vector<1x128xf32> to vector<16x128xf32>
    %25 = arith.addf %23, %24 : vector<16x128xf32>
    %26 = arith.truncf %25 : vector<16x128xf32> to vector<16x128xbf16>
    %c0_10 = arith.constant 0 : index
    %c0_11 = arith.constant 0 : index
    %27 = vector.load %arg4[%c0_10, %c0_11] : memref<128x384xbf16, #tpu.memory_space<vmem>>, vector<128x384xbf16>
    %cst_12 = arith.constant dense<0.000000e+00> : vector<16x384xf32>
    %28 = tpu.matmul %26, %27, %cst_12 {dimension_numbers = #tpu.dot_dimension_numbers<[1], [0], [0], [1], [0, 0, 1, 1], [], []>} : vector<16x128xbf16>, vector<128x384xbf16>, vector<16x384xf32> -> vector<16x384xf32>
    %c0_13 = arith.constant 0 : index
    %c0_14 = arith.constant 0 : index
    %29 = vector.load %arg5[%c0_13, %c0_14] : memref<1x384xf32, #tpu.memory_space<vmem>>, vector<1x384xf32>
    %30 = vector.broadcast %29 : vector<1x384xf32> to vector<16x384xf32>
    %31 = arith.addf %28, %30 : vector<16x384xf32>
    %32 = vector.extract_strided_slice %31 {offsets = [0, 0], sizes = [16, 128], strides = [1, 1]} : vector<16x384xf32> to vector<16x128xf32>
    %33 = arith.truncf %32 : vector<16x128xf32> to vector<16x128xbf16>
    %34 = vector.extract_strided_slice %31 {offsets = [0, 128], sizes = [16, 128], strides = [1, 1]} : vector<16x384xf32> to vector<16x128xf32>
    %35 = arith.truncf %34 : vector<16x128xf32> to vector<16x128xbf16>
    %36 = vector.extract_strided_slice %31 {offsets = [0, 256], sizes = [16, 128], strides = [1, 1]} : vector<16x384xf32> to vector<16x128xf32>
    %37 = arith.truncf %36 : vector<16x128xf32> to vector<16x128xbf16>
    %38 = vector.extract_strided_slice %33 {offsets = [0, 0], sizes = [16, 32], strides = [1, 1]} : vector<16x128xbf16> to vector<16x32xbf16>
    %39 = vector.extract_strided_slice %35 {offsets = [0, 0], sizes = [16, 32], strides = [1, 1]} : vector<16x128xbf16> to vector<16x32xbf16>
    %cst_15 = arith.constant dense<0.000000e+00> : vector<16x16xf32>
    %40 = tpu.matmul %38, %39, %cst_15 {dimension_numbers = #tpu.dot_dimension_numbers<[1], [1], [0], [0], [0, 0, 1, 0], [], []>} : vector<16x32xbf16>, vector<16x32xbf16>, vector<16x16xf32> -> vector<16x16xf32>
    %cst_16 = arith.constant dense<0xFF800000> : vector<16xf32>
    %41 = vector.multi_reduction <maximumf>, %40, %cst_16 [1] : vector<16x16xf32> to vector<16xf32>
    %42 = vector.shape_cast %41 : vector<16xf32> to vector<16x1xf32>
    %43 = vector.broadcast %42 : vector<16x1xf32> to vector<16x16xf32>
    %44 = arith.subf %40, %43 : vector<16x16xf32>
    %45 = math.exp %44 : vector<16x16xf32>
    %cst_17 = arith.constant dense<0.000000e+00> : vector<16xf32>
    %46 = vector.multi_reduction <add>, %45, %cst_17 [1] : vector<16x16xf32> to vector<16xf32>
    %47 = vector.shape_cast %46 : vector<16xf32> to vector<16x1xf32>
    %48 = arith.truncf %45 : vector<16x16xf32> to vector<16x16xbf16>
    %49 = vector.extract_strided_slice %37 {offsets = [0, 0], sizes = [16, 32], strides = [1, 1]} : vector<16x128xbf16> to vector<16x32xbf16>
    %cst_18 = arith.constant dense<0.000000e+00> : vector<16x32xf32>
    %50 = tpu.matmul %48, %49, %cst_18 {dimension_numbers = #tpu.dot_dimension_numbers<[1], [0], [0], [1], [0, 0, 1, 1], [], []>} : vector<16x16xbf16>, vector<16x32xbf16>, vector<16x32xf32> -> vector<16x32xf32>
    %51 = tpu.reciprocal %47 : vector<16x1xf32> -> vector<16x1xf32>
    %52 = vector.broadcast %51 : vector<16x1xf32> to vector<16x32xf32>
    %53 = arith.mulf %50, %52 : vector<16x32xf32>
    %c0_19 = arith.constant 0 : index
    %c0_20 = arith.constant 0 : index
    %54 = vector.load %arg15[%c0_19, %c0_20] : memref<16x128xf32, #tpu.memory_space<vmem>>, vector<16x32xf32>
    tpu.vector_store %arg15[%c0_19, %c0_20], %53 {strides = array<i32>} : memref<16x128xf32, #tpu.memory_space<vmem>>, vector<16x32xf32>,
    %55 = vector.extract_strided_slice %33 {offsets = [0, 32], sizes = [16, 32], strides = [1, 1]} : vector<16x128xbf16> to vector<16x32xbf16>
    %56 = vector.extract_strided_slice %35 {offsets = [0, 32], sizes = [16, 32], strides = [1, 1]} : vector<16x128xbf16> to vector<16x32xbf16>
    %cst_21 = arith.constant dense<0.000000e+00> : vector<16x16xf32>
    %57 = tpu.matmul %55, %56, %cst_21 {dimension_numbers = #tpu.dot_dimension_numbers<[1], [1], [0], [0], [0, 0, 1, 0], [], []>} : vector<16x32xbf16>, vector<16x32xbf16>, vector<16x16xf32> -> vector<16x16xf32>
    %cst_22 = arith.constant dense<0xFF800000> : vector<16xf32>
    %58 = vector.multi_reduction <maximumf>, %57, %cst_22 [1] : vector<16x16xf32> to vector<16xf32>
    %59 = vector.shape_cast %58 : vector<16xf32> to vector<16x1xf32>
    %60 = vector.broadcast %59 : vector<16x1xf32> to vector<16x16xf32>
    %61 = arith.subf %57, %60 : vector<16x16xf32>
    %62 = math.exp %61 : vector<16x16xf32>
    %cst_23 = arith.constant dense<0.000000e+00> : vector<16xf32>
    %63 = vector.multi_reduction <add>, %62, %cst_23 [1] : vector<16x16xf32> to vector<16xf32>
    %64 = vector.shape_cast %63 : vector<16xf32> to vector<16x1xf32>
    %65 = arith.truncf %62 : vector<16x16xf32> to vector<16x16xbf16>
    %66 = vector.extract_strided_slice %37 {offsets = [0, 32], sizes = [16, 32], strides = [1, 1]} : vector<16x128xbf16> to vector<16x32xbf16>
    %cst_24 = arith.constant dense<0.000000e+00> : vector<16x32xf32>
    %67 = tpu.matmul %65, %66, %cst_24 {dimension_numbers = #tpu.dot_dimension_numbers<[1], [0], [0], [1], [0, 0, 1, 1], [], []>} : vector<16x16xbf16>, vector<16x32xbf16>, vector<16x32xf32> -> vector<16x32xf32>
    %68 = tpu.reciprocal %64 : vector<16x1xf32> -> vector<16x1xf32>
    %69 = vector.broadcast %68 : vector<16x1xf32> to vector<16x32xf32>
    %70 = arith.mulf %67, %69 : vector<16x32xf32>
    %c0_25 = arith.constant 0 : index
    %c32 = arith.constant 32 : index
    %71 = vector.load %arg15[%c0_25, %c32] : memref<16x128xf32, #tpu.memory_space<vmem>>, vector<16x32xf32>
    tpu.vector_store %arg15[%c0_25, %c32], %70 {strides = array<i32>} : memref<16x128xf32, #tpu.memory_space<vmem>>, vector<16x32xf32>,
    %72 = vector.extract_strided_slice %33 {offsets = [0, 64], sizes = [16, 32], strides = [1, 1]} : vector<16x128xbf16> to vector<16x32xbf16>
    %73 = vector.extract_strided_slice %35 {offsets = [0, 64], sizes = [16, 32], strides = [1, 1]} : vector<16x128xbf16> to vector<16x32xbf16>
    %cst_26 = arith.constant dense<0.000000e+00> : vector<16x16xf32>
    %74 = tpu.matmul %72, %73, %cst_26 {dimension_numbers = #tpu.dot_dimension_numbers<[1], [1], [0], [0], [0, 0, 1, 0], [], []>} : vector<16x32xbf16>, vector<16x32xbf16>, vector<16x16xf32> -> vector<16x16xf32>
    %cst_27 = arith.constant dense<0xFF800000> : vector<16xf32>
    %75 = vector.multi_reduction <maximumf>, %74, %cst_27 [1] : vector<16x16xf32> to vector<16xf32>
    %76 = vector.shape_cast %75 : vector<16xf32> to vector<16x1xf32>
    %77 = vector.broadcast %76 : vector<16x1xf32> to vector<16x16xf32>
    %78 = arith.subf %74, %77 : vector<16x16xf32>
    %79 = math.exp %78 : vector<16x16xf32>
    %cst_28 = arith.constant dense<0.000000e+00> : vector<16xf32>
    %80 = vector.multi_reduction <add>, %79, %cst_28 [1] : vector<16x16xf32> to vector<16xf32>
    %81 = vector.shape_cast %80 : vector<16xf32> to vector<16x1xf32>
    %82 = arith.truncf %79 : vector<16x16xf32> to vector<16x16xbf16>
    %83 = vector.extract_strided_slice %37 {offsets = [0, 64], sizes = [16, 32], strides = [1, 1]} : vector<16x128xbf16> to vector<16x32xbf16>
    %cst_29 = arith.constant dense<0.000000e+00> : vector<16x32xf32>
    %84 = tpu.matmul %82, %83, %cst_29 {dimension_numbers = #tpu.dot_dimension_numbers<[1], [0], [0], [1], [0, 0, 1, 1], [], []>} : vector<16x16xbf16>, vector<16x32xbf16>, vector<16x32xf32> -> vector<16x32xf32>
    %85 = tpu.reciprocal %81 : vector<16x1xf32> -> vector<16x1xf32>
    %86 = vector.broadcast %85 : vector<16x1xf32> to vector<16x32xf32>
    %87 = arith.mulf %84, %86 : vector<16x32xf32>
    %c0_30 = arith.constant 0 : index
    %c64 = arith.constant 64 : index
    %88 = vector.load %arg15[%c0_30, %c64] : memref<16x128xf32, #tpu.memory_space<vmem>>, vector<16x32xf32>
    tpu.vector_store %arg15[%c0_30, %c64], %87 {strides = array<i32>} : memref<16x128xf32, #tpu.memory_space<vmem>>, vector<16x32xf32>,
    %89 = vector.extract_strided_slice %33 {offsets = [0, 96], sizes = [16, 32], strides = [1, 1]} : vector<16x128xbf16> to vector<16x32xbf16>
    %90 = vector.extract_strided_slice %35 {offsets = [0, 96], sizes = [16, 32], strides = [1, 1]} : vector<16x128xbf16> to vector<16x32xbf16>
    %cst_31 = arith.constant dense<0.000000e+00> : vector<16x16xf32>
    %91 = tpu.matmul %89, %90, %cst_31 {dimension_numbers = #tpu.dot_dimension_numbers<[1], [1], [0], [0], [0, 0, 1, 0], [], []>} : vector<16x32xbf16>, vector<16x32xbf16>, vector<16x16xf32> -> vector<16x16xf32>
    %cst_32 = arith.constant dense<0xFF800000> : vector<16xf32>
    %92 = vector.multi_reduction <maximumf>, %91, %cst_32 [1] : vector<16x16xf32> to vector<16xf32>
    %93 = vector.shape_cast %92 : vector<16xf32> to vector<16x1xf32>
    %94 = vector.broadcast %93 : vector<16x1xf32> to vector<16x16xf32>
    %95 = arith.subf %91, %94 : vector<16x16xf32>
    %96 = math.exp %95 : vector<16x16xf32>
    %cst_33 = arith.constant dense<0.000000e+00> : vector<16xf32>
    %97 = vector.multi_reduction <add>, %96, %cst_33 [1] : vector<16x16xf32> to vector<16xf32>
    %98 = vector.shape_cast %97 : vector<16xf32> to vector<16x1xf32>
    %99 = arith.truncf %96 : vector<16x16xf32> to vector<16x16xbf16>
    %100 = vector.extract_strided_slice %37 {offsets = [0, 96], sizes = [16, 32], strides = [1, 1]} : vector<16x128xbf16> to vector<16x32xbf16>
    %cst_34 = arith.constant dense<0.000000e+00> : vector<16x32xf32>
    %101 = tpu.matmul %99, %100, %cst_34 {dimension_numbers = #tpu.dot_dimension_numbers<[1], [0], [0], [1], [0, 0, 1, 1], [], []>} : vector<16x16xbf16>, vector<16x32xbf16>, vector<16x32xf32> -> vector<16x32xf32>
    %102 = tpu.reciprocal %98 : vector<16x1xf32> -> vector<16x1xf32>
    %103 = vector.broadcast %102 : vector<16x1xf32> to vector<16x32xf32>
    %104 = arith.mulf %101, %103 : vector<16x32xf32>
    %c0_35 = arith.constant 0 : index
    %c96 = arith.constant 96 : index
    %105 = vector.load %arg15[%c0_35, %c96] : memref<16x128xf32, #tpu.memory_space<vmem>>, vector<16x32xf32>
    tpu.vector_store %arg15[%c0_35, %c96], %104 {strides = array<i32>} : memref<16x128xf32, #tpu.memory_space<vmem>>, vector<16x32xf32>,
    %c0_36 = arith.constant 0 : index
    %c0_37 = arith.constant 0 : index
    %106 = vector.load %arg15[%c0_36, %c0_37] : memref<16x128xf32, #tpu.memory_space<vmem>>, vector<16x128xf32>
    %107 = arith.truncf %106 : vector<16x128xf32> to vector<16x128xbf16>
    %c0_38 = arith.constant 0 : index
    %c0_39 = arith.constant 0 : index
    %108 = vector.load %arg6[%c0_38, %c0_39] : memref<128x128xbf16, #tpu.memory_space<vmem>>, vector<128x128xbf16>
    %cst_40 = arith.constant dense<0.000000e+00> : vector<16x128xf32>
    %109 = tpu.matmul %107, %108, %cst_40 {dimension_numbers = #tpu.dot_dimension_numbers<[1], [0], [0], [1], [0, 0, 1, 1], [], []>} : vector<16x128xbf16>, vector<128x128xbf16>, vector<16x128xf32> -> vector<16x128xf32>
    %c0_41 = arith.constant 0 : index
    %c0_42 = arith.constant 0 : index
    %110 = vector.load %arg7[%c0_41, %c0_42] : memref<1x128xf32, #tpu.memory_space<vmem>>, vector<1x128xf32>
    %111 = vector.broadcast %110 : vector<1x128xf32> to vector<16x128xf32>
    %112 = arith.addf %109, %111 : vector<16x128xf32>
    %113 = arith.addf %1, %112 : vector<16x128xf32>
    %c0_43 = arith.constant 0 : index
    %c0_44 = arith.constant 0 : index
    %114 = vector.load %arg8[%c0_43, %c0_44] : memref<1x128xf32, #tpu.memory_space<vmem>>, vector<1x128xf32>
    %c0_45 = arith.constant 0 : index
    %c0_46 = arith.constant 0 : index
    %115 = vector.load %arg9[%c0_45, %c0_46] : memref<1x128xf32, #tpu.memory_space<vmem>>, vector<1x128xf32>
    %cst_47 = arith.constant dense<0.000000e+00> : vector<16xf32>
    %116 = vector.multi_reduction <add>, %113, %cst_47 [1] : vector<16x128xf32> to vector<16xf32>
    %117 = vector.shape_cast %116 : vector<16xf32> to vector<16x1xf32>
    %cst_48 = arith.constant 1.280000e+02 : f32
    %118 = vector.broadcast %cst_48 : f32 to vector<16x1xf32>
    %119 = arith.divf %117, %118 : vector<16x1xf32>
    %120 = arith.mulf %113, %113 : vector<16x128xf32>
    %cst_49 = arith.constant dense<0.000000e+00> : vector<16xf32>
    %121 = vector.multi_reduction <add>, %120, %cst_49 [1] : vector<16x128xf32> to vector<16xf32>
    %122 = vector.shape_cast %121 : vector<16xf32> to vector<16x1xf32>
    %cst_50 = arith.constant 1.280000e+02 : f32
    %123 = vector.broadcast %cst_50 : f32 to vector<16x1xf32>
    %124 = arith.divf %122, %123 : vector<16x1xf32>
    %125 = arith.mulf %119, %119 : vector<16x1xf32>
    %126 = arith.subf %124, %125 : vector<16x1xf32>
    %127 = vector.broadcast %119 : vector<16x1xf32> to vector<16x128xf32>
    %128 = arith.subf %113, %127 : vector<16x128xf32>
    %cst_51 = arith.constant 9.99999974E-6 : f32
    %129 = vector.broadcast %cst_51 : f32 to vector<16x1xf32>
    %130 = arith.addf %126, %129 : vector<16x1xf32>
    %131 = math.rsqrt %130 : vector<16x1xf32>
    %132 = vector.broadcast %131 : vector<16x1xf32> to vector<16x128xf32>
    %133 = arith.mulf %128, %132 : vector<16x128xf32>
    %134 = vector.broadcast %114 : vector<1x128xf32> to vector<16x128xf32>
    %135 = arith.mulf %133, %134 : vector<16x128xf32>
    %136 = vector.broadcast %115 : vector<1x128xf32> to vector<16x128xf32>
    %137 = arith.addf %135, %136 : vector<16x128xf32>
    %138 = arith.truncf %137 : vector<16x128xf32> to vector<16x128xbf16>
    %c0_52 = arith.constant 0 : index
    %c0_53 = arith.constant 0 : index
    %139 = vector.load %arg10[%c0_52, %c0_53] : memref<128x512xbf16, #tpu.memory_space<vmem>>, vector<128x512xbf16>
    %cst_54 = arith.constant dense<0.000000e+00> : vector<16x512xf32>
    %140 = tpu.matmul %138, %139, %cst_54 {dimension_numbers = #tpu.dot_dimension_numbers<[1], [0], [0], [1], [0, 0, 1, 1], [], []>} : vector<16x128xbf16>, vector<128x512xbf16>, vector<16x512xf32> -> vector<16x512xf32>
    %c0_55 = arith.constant 0 : index
    %c0_56 = arith.constant 0 : index
    %141 = vector.load %arg11[%c0_55, %c0_56] : memref<1x512xf32, #tpu.memory_space<vmem>>, vector<1x512xf32>
    %142 = vector.broadcast %141 : vector<1x512xf32> to vector<16x512xf32>
    %143 = arith.addf %140, %142 : vector<16x512xf32>
    %144 = arith.mulf %143, %143 : vector<16x512xf32>
    %145 = arith.mulf %143, %144 : vector<16x512xf32>
    %cst_57 = arith.constant 4.471500e-02 : f32
    %146 = vector.broadcast %cst_57 : f32 to vector<16x512xf32>
    %147 = arith.mulf %146, %145 : vector<16x512xf32>
    %148 = arith.addf %143, %147 : vector<16x512xf32>
    %cst_58 = arith.constant 0.797884583 : f32
    %149 = vector.broadcast %cst_58 : f32 to vector<16x512xf32>
    %150 = arith.mulf %149, %148 : vector<16x512xf32>
    %151 = math.tanh %150 : vector<16x512xf32>
    %cst_59 = arith.constant 1.000000e+00 : f32
    %152 = vector.broadcast %cst_59 : f32 to vector<16x512xf32>
    %153 = arith.addf %152, %151 : vector<16x512xf32>
    %cst_60 = arith.constant 5.000000e-01 : f32
    %154 = vector.broadcast %cst_60 : f32 to vector<16x512xf32>
    %155 = arith.mulf %154, %153 : vector<16x512xf32>
    %156 = arith.mulf %143, %155 : vector<16x512xf32>
    %157 = arith.truncf %156 : vector<16x512xf32> to vector<16x512xbf16>
    %c0_61 = arith.constant 0 : index
    %c0_62 = arith.constant 0 : index
    %158 = vector.load %arg12[%c0_61, %c0_62] : memref<512x128xbf16, #tpu.memory_space<vmem>>, vector<512x128xbf16>
    %cst_63 = arith.constant dense<0.000000e+00> : vector<16x128xf32>
    %159 = tpu.matmul %157, %158, %cst_63 {dimension_numbers = #tpu.dot_dimension_numbers<[1], [0], [0], [1], [0, 0, 1, 1], [], []>} : vector<16x512xbf16>, vector<512x128xbf16>, vector<16x128xf32> -> vector<16x128xf32>
    %c0_64 = arith.constant 0 : index
    %c0_65 = arith.constant 0 : index
    %160 = vector.load %arg13[%c0_64, %c0_65] : memref<1x128xf32, #tpu.memory_space<vmem>>, vector<1x128xf32>
    %161 = vector.broadcast %160 : vector<1x128xf32> to vector<16x128xf32>
    %162 = arith.addf %159, %161 : vector<16x128xf32>
    %163 = arith.addf %113, %162 : vector<16x128xf32>
    %c0_66 = arith.constant 0 : index
    %c0_67 = arith.constant 0 : index
    %c0_68 = arith.constant 0 : index
    %164 = vector.load %arg14[%c0_66, %c0_67, %c0_68] : memref<1x16x128xf32, #tpu.memory_space<vmem>>, vector<1x16x128xf32>
    %165 = vector.shape_cast %164 : vector<1x16x128xf32> to vector<16x128xf32>
    %166 = vector.shape_cast %163 : vector<16x128xf32> to vector<1x16x128xf32>
    tpu.vector_store %arg14[%c0_66, %c0_67, %c0_68], %166 {strides = array<i32>} : memref<1x16x128xf32, #tpu.memory_space<vmem>>, vector<1x16x128xf32>,
    return
  }
  func.func @transform_0(%arg0: i32) -> (i32, i32, i32) {
    %c0_i32 = arith.constant 0 : i32
    %c0_i32_0 = arith.constant 0 : i32
    %c0_i32_1 = arith.constant 0 : i32
    return %arg0, %c0_i32, %c0_i32_0 : i32, i32, i32
  }
  func.func @transform_1(%arg0: i32) -> (i32, i32) {
    %c0_i32 = arith.constant 0 : i32
    %c0_i32_0 = arith.constant 0 : i32
    %c0_i32_1 = arith.constant 0 : i32
    return %c0_i32, %c0_i32_0 : i32, i32
  }
  func.func @transform_2(%arg0: i32) -> (i32, i32) {
    %c0_i32 = arith.constant 0 : i32
    %c0_i32_0 = arith.constant 0 : i32
    %c0_i32_1 = arith.constant 0 : i32
    return %c0_i32, %c0_i32_0 : i32, i32
  }
  func.func @transform_3(%arg0: i32) -> (i32, i32) {
    %c0_i32 = arith.constant 0 : i32
    %c0_i32_0 = arith.constant 0 : i32
    %c0_i32_1 = arith.constant 0 : i32
    return %c0_i32, %c0_i32_0 : i32, i32
  }
  func.func @transform_4(%arg0: i32) -> (i32, i32) {
    %c0_i32 = arith.constant 0 : i32
    %c0_i32_0 = arith.constant 0 : i32
    %c0_i32_1 = arith.constant 0 : i32
    return %c0_i32, %c0_i32_0 : i32, i32
  }
  func.func @transform_5(%arg0: i32) -> (i32, i32) {
    %c0_i32 = arith.constant 0 : i32
    %c0_i32_0 = arith.constant 0 : i32
    %c0_i32_1 = arith.constant 0 : i32
    return %c0_i32, %c0_i32_0 : i32, i32
  }
  func.func @transform_6(%arg0: i32) -> (i32, i32) {
    %c0_i32 = arith.constant 0 : i32
    %c0_i32_0 = arith.constant 0 : i32
    %c0_i32_1 = arith.constant 0 : i32
    return %c0_i32, %c0_i32_0 : i32, i32
  }
  func.func @transform_7(%arg0: i32) -> (i32, i32) {
    %c0_i32 = arith.constant 0 : i32
    %c0_i32_0 = arith.constant 0 : i32
    %c0_i32_1 = arith.constant 0 : i32
    return %c0_i32, %c0_i32_0 : i32, i32
  }
  func.func @transform_8(%arg0: i32) -> (i32, i32) {
    %c0_i32 = arith.constant 0 : i32
    %c0_i32_0 = arith.constant 0 : i32
    %c0_i32_1 = arith.constant 0 : i32
    return %c0_i32, %c0_i32_0 : i32, i32
  }
  func.func @transform_9(%arg0: i32) -> (i32, i32) {
    %c0_i32 = arith.constant 0 : i32
    %c0_i32_0 = arith.constant 0 : i32
    %c0_i32_1 = arith.constant 0 : i32
    return %c0_i32, %c0_i32_0 : i32, i32
  }
  func.func @transform_10(%arg0: i32) -> (i32, i32) {
    %c0_i32 = arith.constant 0 : i32
    %c0_i32_0 = arith.constant 0 : i32
    %c0_i32_1 = arith.constant 0 : i32
    return %c0_i32, %c0_i32_0 : i32, i32
  }
  func.func @transform_11(%arg0: i32) -> (i32, i32) {
    %c0_i32 = arith.constant 0 : i32
    %c0_i32_0 = arith.constant 0 : i32
    %c0_i32_1 = arith.constant 0 : i32
    return %c0_i32, %c0_i32_0 : i32, i32
  }
  func.func @transform_12(%arg0: i32) -> (i32, i32) {
    %c0_i32 = arith.constant 0 : i32
    %c0_i32_0 = arith.constant 0 : i32
    %c0_i32_1 = arith.constant 0 : i32
    return %c0_i32, %c0_i32_0 : i32, i32
  }
  func.func @transform_13(%arg0: i32) -> (i32, i32, i32) {
    %c0_i32 = arith.constant 0 : i32
    %c0_i32_0 = arith.constant 0 : i32
    %c0_i32_1 = arith.constant 0 : i32
    return %arg0, %c0_i32, %c0_i32_0 : i32, i32, i32
  }
}

module attributes {stable_mosaic.version = 11 : i64} {
  func.func @block_kernel(%arg0: i32, %arg1: memref<1x16x128xf32, #tpu.memory_space<vmem>>, %arg2: memref<1x128xf32, #tpu.memory_space<vmem>>, %arg3: memref<1x128xf32, #tpu.memory_space<vmem>>, %arg4: memref<128x384xbf16, #tpu.memory_space<vmem>>, %arg5: memref<1x384xf32, #tpu.memory_space<vmem>>, %arg6: memref<128x128xbf16, #tpu.memory_space<vmem>>, %arg7: memref<1x128xf32, #tpu.memory_space<vmem>>, %arg8: memref<1x128xf32, #tpu.memory_space<vmem>>, %arg9: memref<1x128xf32, #tpu.memory_space<vmem>>, %arg10: memref<128x512xbf16, #tpu.memory_space<vmem>>, %arg11: memref<1x512xf32, #tpu.memory_space<vmem>>, %arg12: memref<512x128xbf16, #tpu.memory_space<vmem>>, %arg13: memref<1x128xf32, #tpu.memory_space<vmem>>, %arg14: memref<1x16x128xf32, #tpu.memory_space<vmem>>, %arg15: memref<16x128xf32, #tpu.memory_space<vmem>>) attributes {dimension_semantics = [#tpu.dimension_semantics<parallel>], iteration_bounds = array<i64: 2>, scalar_prefetch = 0 : i64, scratch_operands = 1 : i64, tpu.core_type = #tpu.core_type<tc>, window_params = [{transform_indices = @transform_0, window_bounds = array<i64: 1, 16, 128>}, {pipeline_mode = #tpu.pipeline_mode<synchronous>, transform_indices = @transform_1, window_bounds = array<i64: 1, 128>}, {pipeline_mode = #tpu.pipeline_mode<synchronous>, transform_indices = @transform_2, window_bounds = array<i64: 1, 128>}, {pipeline_mode = #tpu.pipeline_mode<synchronous>, transform_indices = @transform_3, window_bounds = array<i64: 128, 384>}, {pipeline_mode = #tpu.pipeline_mode<synchronous>, transform_indices = @transform_4, window_bounds = array<i64: 1, 384>}, {pipeline_mode = #tpu.pipeline_mode<synchronous>, transform_indices = @transform_5, window_bounds = array<i64: 128, 128>}, {pipeline_mode = #tpu.pipeline_mode<synchronous>, transform_indices = @transform_6, window_bounds = array<i64: 1, 128>}, {pipeline_mode = #tpu.pipeline_mode<synchronous>, transform_indices = @transform_7, window_bounds = array<i64: 1, 128>}, {pipeline_mode = #tpu.pipeline_mode<synchronous>, transform_indices = @transform_8, window_bounds = array<i64: 1, 128>}, {pipeline_mode = #tpu.pipeline_mode<synchronous>, transform_indices = @transform_9, window_bounds = array<i64: 128, 512>}, {pipeline_mode = #tpu.pipeline_mode<synchronous>, transform_indices = @transform_10, window_bounds = array<i64: 1, 512>}, {pipeline_mode = #tpu.pipeline_mode<synchronous>, transform_indices = @transform_11, window_bounds = array<i64: 512, 128>}, {pipeline_mode = #tpu.pipeline_mode<synchronous>, transform_indices = @transform_12, window_bounds = array<i64: 1, 128>}, {transform_indices = @transform_13, window_bounds = array<i64: 1, 16, 128>}]} {
    %c0 = arith.constant 0 : index
    %c0_0 = arith.constant 0 : index
    %c0_1 = arith.constant 0 : index
    %0 = vector.load %arg1[%c0, %c0_0, %c0_1] : memref<1x16x128xf32, #tpu.memory_space<vmem>>, vector<1x16x128xf32>
    %1 = vector.shape_cast %0 : vector<1x16x128xf32> to vector<16x128xf32>
    %c0_2 = arith.constant 0 : index
    %c0_3 = arith.constant 0 : index
    %2 = vector.load %arg2[%c0_2, %c0_3] : memref<1x128xf32, #tpu.memory_space<vmem>>, vector<1x128xf32>
    %c0_4 = arith.constant 0 : index
    %c0_5 = arith.constant 0 : index
    %3 = vector.load %arg3[%c0_4, %c0_5] : memref<1x128xf32, #tpu.memory_space<vmem>>, vector<1x128xf32>
    %cst = arith.constant dense<0.000000e+00> : vector<16xf32>
    %4 = vector.multi_reduction <add>, %1, %cst [1] : vector<16x128xf32> to vector<16xf32>
    %5 = vector.shape_cast %4 : vector<16xf32> to vector<16x1xf32>
    %cst_6 = arith.constant 1.280000e+02 : f32
    %6 = vector.broadcast %cst_6 : f32 to vector<16x1xf32>
    %7 = arith.divf %5, %6 : vector<16x1xf32>
    %8 = arith.mulf %1, %1 : vector<16x128xf32>
    %cst_7 = arith.constant dense<0.000000e+00> : vector<16xf32>
    %9 = vector.multi_reduction <add>, %8, %cst_7 [1] : vector<16x128xf32> to vector<16xf32>
    %10 = vector.shape_cast %9 : vector<16xf32> to vector<16x1xf32>
    %cst_8 = arith.constant 1.280000e+02 : f32
    %11 = vector.broadcast %cst_8 : f32 to vector<16x1xf32>
    %12 = arith.divf %10, %11 : vector<16x1xf32>
    %13 = arith.mulf %7, %7 : vector<16x1xf32>
    %14 = arith.subf %12, %13 : vector<16x1xf32>
    %15 = vector.broadcast %7 : vector<16x1xf32> to vector<16x128xf32>
    %16 = arith.subf %1, %15 : vector<16x128xf32>
    %cst_9 = arith.constant 9.99999974E-6 : f32
    %17 = vector.broadcast %cst_9 : f32 to vector<16x1xf32>
    %18 = arith.addf %14, %17 : vector<16x1xf32>
    %19 = math.rsqrt %18 : vector<16x1xf32>
    %20 = vector.broadcast %19 : vector<16x1xf32> to vector<16x128xf32>
    %21 = arith.mulf %16, %20 : vector<16x128xf32>
    %22 = vector.broadcast %2 : vector<1x128xf32> to vector<16x128xf32>
    %23 = arith.mulf %21, %22 : vector<16x128xf32>
    %24 = vector.broadcast %3 : vector<1x128xf32> to vector<16x128xf32>
    %25 = arith.addf %23, %24 : vector<16x128xf32>
    %26 = arith.truncf %25 : vector<16x128xf32> to vector<16x128xbf16>
    %c0_10 = arith.constant 0 : index
    %c0_11 = arith.constant 0 : index
    %27 = vector.load %arg4[%c0_10, %c0_11] : memref<128x384xbf16, #tpu.memory_space<vmem>>, vector<128x384xbf16>
    %cst_12 = arith.constant dense<0.000000e+00> : vector<16x384xf32>
    %28 = tpu.matmul %26, %27, %cst_12 {dimension_numbers = #tpu.dot_dimension_numbers<[1], [0], [0], [1], [0, 0, 1, 1], [], []>} : vector<16x128xbf16>, vector<128x384xbf16>, vector<16x384xf32> -> vector<16x384xf32>
    %c0_13 = arith.constant 0 : index
    %c0_14 = arith.constant 0 : index
    %29 = vector.load %arg5[%c0_13, %c0_14] : memref<1x384xf32, #tpu.memory_space<vmem>>, vector<1x384xf32>
    %30 = vector.broadcast %29 : vector<1x384xf32> to vector<16x384xf32>
    %31 = arith.addf %28, %30 : vector<16x384xf32>
    %32 = vector.extract_strided_slice %31 {offsets = [0, 0], sizes = [16, 128], strides = [1, 1]} : vector<16x384xf32> to vector<16x128xf32>
    %33 = arith.truncf %32 : vector<16x128xf32> to vector<16x128xbf16>
    %34 = vector.extract_strided_slice %31 {offsets = [0, 128], sizes = [16, 128], strides = [1, 1]} : vector<16x384xf32> to vector<16x128xf32>
    %35 = arith.truncf %34 : vector<16x128xf32> to vector<16x128xbf16>
    %36 = vector.extract_strided_slice %31 {offsets = [0, 256], sizes = [16, 128], strides = [1, 1]} : vector<16x384xf32> to vector<16x128xf32>
    %37 = arith.truncf %36 : vector<16x128xf32> to vector<16x128xbf16>
    %38 = vector.extract_strided_slice %33 {offsets = [0, 0], sizes = [16, 32], strides = [1, 1]} : vector<16x128xbf16> to vector<16x32xbf16>
    %39 = vector.extract_strided_slice %35 {offsets = [0, 0], sizes = [16, 32], strides = [1, 1]} : vector<16x128xbf16> to vector<16x32xbf16>
    %cst_15 = arith.constant dense<0.000000e+00> : vector<16x16xf32>
    %40 = tpu.matmul %38, %39, %cst_15 {dimension_numbers = #tpu.dot_dimension_numbers<[1], [1], [0], [0], [0, 0, 1, 0], [], []>} : vector<16x32xbf16>, vector<16x32xbf16>, vector<16x16xf32> -> vector<16x16xf32>
    %cst_16 = arith.constant dense<0xFF800000> : vector<16xf32>
    %41 = vector.multi_reduction <maximumf>, %40, %cst_16 [1] : vector<16x16xf32> to vector<16xf32>
    %42 = vector.shape_cast %41 : vector<16xf32> to vector<16x1xf32>
    %43 = vector.broadcast %42 : vector<16x1xf32> to vector<16x16xf32>
    %44 = arith.subf %40, %43 : vector<16x16xf32>
    %45 = math.exp %44 : vector<16x16xf32>
    %cst_17 = arith.constant dense<0.000000e+00> : vector<16xf32>
    %46 = vector.multi_reduction <add>, %45, %cst_17 [1] : vector<16x16xf32> to vector<16xf32>
    %47 = vector.shape_cast %46 : vector<16xf32> to vector<16x1xf32>
    %48 = arith.truncf %45 : vector<16x16xf32> to vector<16x16xbf16>
    %49 = vector.extract_strided_slice %37 {offsets = [0, 0], sizes = [16, 32], strides = [1, 1]} : vector<16x128xbf16> to vector<16x32xbf16>
    %cst_18 = arith.constant dense<0.000000e+00> : vector<16x32xf32>
    %50 = tpu.matmul %48, %49, %cst_18 {dimension_numbers = #tpu.dot_dimension_numbers<[1], [0], [0], [1], [0, 0, 1, 1], [], []>} : vector<16x16xbf16>, vector<16x32xbf16>, vector<16x32xf32> -> vector<16x32xf32>
    %51 = tpu.reciprocal %47 : vector<16x1xf32> -> vector<16x1xf32>
    %52 = vector.broadcast %51 : vector<16x1xf32> to vector<16x32xf32>
    %53 = arith.mulf %50, %52 : vector<16x32xf32>
    %c0_19 = arith.constant 0 : index
    %c0_20 = arith.constant 0 : index
    %54 = vector.load %arg15[%c0_19, %c0_20] : memref<16x128xf32, #tpu.memory_space<vmem>>, vector<16x32xf32>
    tpu.vector_store %arg15[%c0_19, %c0_20], %53 {strides = array<i32>} : memref<16x128xf32, #tpu.memory_space<vmem>>, vector<16x32xf32>,
    %55 = vector.extract_strided_slice %33 {offsets = [0, 32], sizes = [16, 32], strides = [1, 1]} : vector<16x128xbf16> to vector<16x32xbf16>
    %56 = vector.extract_strided_slice %35 {offsets = [0, 32], sizes = [16, 32], strides = [1, 1]} : vector<16x128xbf16> to vector<16x32xbf16>
    %cst_21 = arith.constant dense<0.000000e+00> : vector<16x16xf32>
    %57 = tpu.matmul %55, %56, %cst_21 {dimension_numbers = #tpu.dot_dimension_numbers<[1], [1], [0], [0], [0, 0, 1, 0], [], []>} : vector<16x32xbf16>, vector<16x32xbf16>, vector<16x16xf32> -> vector<16x16xf32>
    %cst_22 = arith.constant dense<0xFF800000> : vector<16xf32>
    %58 = vector.multi_reduction <maximumf>, %57, %cst_22 [1] : vector<16x16xf32> to vector<16xf32>
    %59 = vector.shape_cast %58 : vector<16xf32> to vector<16x1xf32>
    %60 = vector.broadcast %59 : vector<16x1xf32> to vector<16x16xf32>
    %61 = arith.subf %57, %60 : vector<16x16xf32>
    %62 = math.exp %61 : vector<16x16xf32>
    %cst_23 = arith.constant dense<0.000000e+00> : vector<16xf32>
    %63 = vector.multi_reduction <add>, %62, %cst_23 [1] : vector<16x16xf32> to vector<16xf32>
    %64 = vector.shape_cast %63 : vector<16xf32> to vector<16x1xf32>
    %65 = arith.truncf %62 : vector<16x16xf32> to vector<16x16xbf16>
    %66 = vector.extract_strided_slice %37 {offsets = [0, 32], sizes = [16, 32], strides = [1, 1]} : vector<16x128xbf16> to vector<16x32xbf16>
    %cst_24 = arith.constant dense<0.000000e+00> : vector<16x32xf32>
    %67 = tpu.matmul %65, %66, %cst_24 {dimension_numbers = #tpu.dot_dimension_numbers<[1], [0], [0], [1], [0, 0, 1, 1], [], []>} : vector<16x16xbf16>, vector<16x32xbf16>, vector<16x32xf32> -> vector<16x32xf32>
    %68 = tpu.reciprocal %64 : vector<16x1xf32> -> vector<16x1xf32>
    %69 = vector.broadcast %68 : vector<16x1xf32> to vector<16x32xf32>
    %70 = arith.mulf %67, %69 : vector<16x32xf32>
    %c0_25 = arith.constant 0 : index
    %c32 = arith.constant 32 : index
    %71 = vector.load %arg15[%c0_25, %c32] : memref<16x128xf32, #tpu.memory_space<vmem>>, vector<16x32xf32>
    tpu.vector_store %arg15[%c0_25, %c32], %70 {strides = array<i32>} : memref<16x128xf32, #tpu.memory_space<vmem>>, vector<16x32xf32>,
    %72 = vector.extract_strided_slice %33 {offsets = [0, 64], sizes = [16, 32], strides = [1, 1]} : vector<16x128xbf16> to vector<16x32xbf16>
    %73 = vector.extract_strided_slice %35 {offsets = [0, 64], sizes = [16, 32], strides = [1, 1]} : vector<16x128xbf16> to vector<16x32xbf16>
    %cst_26 = arith.constant dense<0.000000e+00> : vector<16x16xf32>
    %74 = tpu.matmul %72, %73, %cst_26 {dimension_numbers = #tpu.dot_dimension_numbers<[1], [1], [0], [0], [0, 0, 1, 0], [], []>} : vector<16x32xbf16>, vector<16x32xbf16>, vector<16x16xf32> -> vector<16x16xf32>
    %cst_27 = arith.constant dense<0xFF800000> : vector<16xf32>
    %75 = vector.multi_reduction <maximumf>, %74, %cst_27 [1] : vector<16x16xf32> to vector<16xf32>
    %76 = vector.shape_cast %75 : vector<16xf32> to vector<16x1xf32>
    %77 = vector.broadcast %76 : vector<16x1xf32> to vector<16x16xf32>
    %78 = arith.subf %74, %77 : vector<16x16xf32>
    %79 = math.exp %78 : vector<16x16xf32>
    %cst_28 = arith.constant dense<0.000000e+00> : vector<16xf32>
    %80 = vector.multi_reduction <add>, %79, %cst_28 [1] : vector<16x16xf32> to vector<16xf32>
    %81 = vector.shape_cast %80 : vector<16xf32> to vector<16x1xf32>
    %82 = arith.truncf %79 : vector<16x16xf32> to vector<16x16xbf16>
    %83 = vector.extract_strided_slice %37 {offsets = [0, 64], sizes = [16, 32], strides = [1, 1]} : vector<16x128xbf16> to vector<16x32xbf16>
    %cst_29 = arith.constant dense<0.000000e+00> : vector<16x32xf32>
    %84 = tpu.matmul %82, %83, %cst_29 {dimension_numbers = #tpu.dot_dimension_numbers<[1], [0], [0], [1], [0, 0, 1, 1], [], []>} : vector<16x16xbf16>, vector<16x32xbf16>, vector<16x32xf32> -> vector<16x32xf32>
    %85 = tpu.reciprocal %81 : vector<16x1xf32> -> vector<16x1xf32>
    %86 = vector.broadcast %85 : vector<16x1xf32> to vector<16x32xf32>
    %87 = arith.mulf %84, %86 : vector<16x32xf32>
    %c0_30 = arith.constant 0 : index
    %c64 = arith.constant 64 : index
    %88 = vector.load %arg15[%c0_30, %c64] : memref<16x128xf32, #tpu.memory_space<vmem>>, vector<16x32xf32>
    tpu.vector_store %arg15[%c0_30, %c64], %87 {strides = array<i32>} : memref<16x128xf32, #tpu.memory_space<vmem>>, vector<16x32xf32>,
    %89 = vector.extract_strided_slice %33 {offsets = [0, 96], sizes = [16, 32], strides = [1, 1]} : vector<16x128xbf16> to vector<16x32xbf16>
    %90 = vector.extract_strided_slice %35 {offsets = [0, 96], sizes = [16, 32], strides = [1, 1]} : vector<16x128xbf16> to vector<16x32xbf16>
    %cst_31 = arith.constant dense<0.000000e+00> : vector<16x16xf32>
    %91 = tpu.matmul %89, %90, %cst_31 {dimension_numbers = #tpu.dot_dimension_numbers<[1], [1], [0], [0], [0, 0, 1, 0], [], []>} : vector<16x32xbf16>, vector<16x32xbf16>, vector<16x16xf32> -> vector<16x16xf32>
    %cst_32 = arith.constant dense<0xFF800000> : vector<16xf32>
    %92 = vector.multi_reduction <maximumf>, %91, %cst_32 [1] : vector<16x16xf32> to vector<16xf32>
    %93 = vector.shape_cast %92 : vector<16xf32> to vector<16x1xf32>
    %94 = vector.broadcast %93 : vector<16x1xf32> to vector<16x16xf32>
    %95 = arith.subf %91, %94 : vector<16x16xf32>
    %96 = math.exp %95 : vector<16x16xf32>
    %cst_33 = arith.constant dense<0.000000e+00> : vector<16xf32>
    %97 = vector.multi_reduction <add>, %96, %cst_33 [1] : vector<16x16xf32> to vector<16xf32>
    %98 = vector.shape_cast %97 : vector<16xf32> to vector<16x1xf32>
    %99 = arith.truncf %96 : vector<16x16xf32> to vector<16x16xbf16>
    %100 = vector.extract_strided_slice %37 {offsets = [0, 96], sizes = [16, 32], strides = [1, 1]} : vector<16x128xbf16> to vector<16x32xbf16>
    %cst_34 = arith.constant dense<0.000000e+00> : vector<16x32xf32>
    %101 = tpu.matmul %99, %100, %cst_34 {dimension_numbers = #tpu.dot_dimension_numbers<[1], [0], [0], [1], [0, 0, 1, 1], [], []>} : vector<16x16xbf16>, vector<16x32xbf16>, vector<16x32xf32> -> vector<16x32xf32>
    %102 = tpu.reciprocal %98 : vector<16x1xf32> -> vector<16x1xf32>
    %103 = vector.broadcast %102 : vector<16x1xf32> to vector<16x32xf32>
    %104 = arith.mulf %101, %103 : vector<16x32xf32>
    %c0_35 = arith.constant 0 : index
    %c96 = arith.constant 96 : index
    %105 = vector.load %arg15[%c0_35, %c96] : memref<16x128xf32, #tpu.memory_space<vmem>>, vector<16x32xf32>
    tpu.vector_store %arg15[%c0_35, %c96], %104 {strides = array<i32>} : memref<16x128xf32, #tpu.memory_space<vmem>>, vector<16x32xf32>,
    %c0_36 = arith.constant 0 : index
    %c0_37 = arith.constant 0 : index
    %106 = vector.load %arg15[%c0_36, %c0_37] : memref<16x128xf32, #tpu.memory_space<vmem>>, vector<16x128xf32>
    %107 = arith.truncf %106 : vector<16x128xf32> to vector<16x128xbf16>
    %c0_38 = arith.constant 0 : index
    %c0_39 = arith.constant 0 : index
    %108 = vector.load %arg6[%c0_38, %c0_39] : memref<128x128xbf16, #tpu.memory_space<vmem>>, vector<128x128xbf16>
    %cst_40 = arith.constant dense<0.000000e+00> : vector<16x128xf32>
    %109 = tpu.matmul %107, %108, %cst_40 {dimension_numbers = #tpu.dot_dimension_numbers<[1], [0], [0], [1], [0, 0, 1, 1], [], []>} : vector<16x128xbf16>, vector<128x128xbf16>, vector<16x128xf32> -> vector<16x128xf32>
    %c0_41 = arith.constant 0 : index
    %c0_42 = arith.constant 0 : index
    %110 = vector.load %arg7[%c0_41, %c0_42] : memref<1x128xf32, #tpu.memory_space<vmem>>, vector<1x128xf32>
    %111 = vector.broadcast %110 : vector<1x128xf32> to vector<16x128xf32>
    %112 = arith.addf %109, %111 : vector<16x128xf32>
    %113 = arith.addf %1, %112 : vector<16x128xf32>
    %c0_43 = arith.constant 0 : index
    %c0_44 = arith.constant 0 : index
    %114 = vector.load %arg8[%c0_43, %c0_44] : memref<1x128xf32, #tpu.memory_space<vmem>>, vector<1x128xf32>
    %c0_45 = arith.constant 0 : index
    %c0_46 = arith.constant 0 : index
    %115 = vector.load %arg9[%c0_45, %c0_46] : memref<1x128xf32, #tpu.memory_space<vmem>>, vector<1x128xf32>
    %cst_47 = arith.constant dense<0.000000e+00> : vector<16xf32>
    %116 = vector.multi_reduction <add>, %113, %cst_47 [1] : vector<16x128xf32> to vector<16xf32>
    %117 = vector.shape_cast %116 : vector<16xf32> to vector<16x1xf32>
    %cst_48 = arith.constant 1.280000e+02 : f32
    %118 = vector.broadcast %cst_48 : f32 to vector<16x1xf32>
    %119 = arith.divf %117, %118 : vector<16x1xf32>
    %120 = arith.mulf %113, %113 : vector<16x128xf32>
    %cst_49 = arith.constant dense<0.000000e+00> : vector<16xf32>
    %121 = vector.multi_reduction <add>, %120, %cst_49 [1] : vector<16x128xf32> to vector<16xf32>
    %122 = vector.shape_cast %121 : vector<16xf32> to vector<16x1xf32>
    %cst_50 = arith.constant 1.280000e+02 : f32
    %123 = vector.broadcast %cst_50 : f32 to vector<16x1xf32>
    %124 = arith.divf %122, %123 : vector<16x1xf32>
    %125 = arith.mulf %119, %119 : vector<16x1xf32>
    %126 = arith.subf %124, %125 : vector<16x1xf32>
    %127 = vector.broadcast %119 : vector<16x1xf32> to vector<16x128xf32>
    %128 = arith.subf %113, %127 : vector<16x128xf32>
    %cst_51 = arith.constant 9.99999974E-6 : f32
    %129 = vector.broadcast %cst_51 : f32 to vector<16x1xf32>
    %130 = arith.addf %126, %129 : vector<16x1xf32>
    %131 = math.rsqrt %130 : vector<16x1xf32>
    %132 = vector.broadcast %131 : vector<16x1xf32> to vector<16x128xf32>
    %133 = arith.mulf %128, %132 : vector<16x128xf32>
    %134 = vector.broadcast %114 : vector<1x128xf32> to vector<16x128xf32>
    %135 = arith.mulf %133, %134 : vector<16x128xf32>
    %136 = vector.broadcast %115 : vector<1x128xf32> to vector<16x128xf32>
    %137 = arith.addf %135, %136 : vector<16x128xf32>
    %138 = arith.truncf %137 : vector<16x128xf32> to vector<16x128xbf16>
    %c0_52 = arith.constant 0 : index
    %c0_53 = arith.constant 0 : index
    %139 = vector.load %arg10[%c0_52, %c0_53] : memref<128x512xbf16, #tpu.memory_space<vmem>>, vector<128x512xbf16>
    %cst_54 = arith.constant dense<0.000000e+00> : vector<16x512xf32>
    %140 = tpu.matmul %138, %139, %cst_54 {dimension_numbers = #tpu.dot_dimension_numbers<[1], [0], [0], [1], [0, 0, 1, 1], [], []>} : vector<16x128xbf16>, vector<128x512xbf16>, vector<16x512xf32> -> vector<16x512xf32>
    %c0_55 = arith.constant 0 : index
    %c0_56 = arith.constant 0 : index
    %141 = vector.load %arg11[%c0_55, %c0_56] : memref<1x512xf32, #tpu.memory_space<vmem>>, vector<1x512xf32>
    %142 = vector.broadcast %141 : vector<1x512xf32> to vector<16x512xf32>
    %143 = arith.addf %140, %142 : vector<16x512xf32>
    %144 = arith.mulf %143, %143 : vector<16x512xf32>
    %145 = arith.mulf %143, %144 : vector<16x512xf32>
    %cst_57 = arith.constant 4.471500e-02 : f32
    %146 = vector.broadcast %cst_57 : f32 to vector<16x512xf32>
    %147 = arith.mulf %146, %145 : vector<16x512xf32>
    %148 = arith.addf %143, %147 : vector<16x512xf32>
    %cst_58 = arith.constant 0.797884583 : f32
    %149 = vector.broadcast %cst_58 : f32 to vector<16x512xf32>
    %150 = arith.mulf %149, %148 : vector<16x512xf32>
    %151 = math.tanh %150 : vector<16x512xf32>
    %cst_59 = arith.constant 1.000000e+00 : f32
    %152 = vector.broadcast %cst_59 : f32 to vector<16x512xf32>
    %153 = arith.addf %152, %151 : vector<16x512xf32>
    %cst_60 = arith.constant 5.000000e-01 : f32
    %154 = vector.broadcast %cst_60 : f32 to vector<16x512xf32>
    %155 = arith.mulf %154, %153 : vector<16x512xf32>
    %156 = arith.mulf %143, %155 : vector<16x512xf32>
    %157 = arith.truncf %156 : vector<16x512xf32> to vector<16x512xbf16>
    %c0_61 = arith.constant 0 : index
    %c0_62 = arith.constant 0 : index
    %158 = vector.load %arg12[%c0_61, %c0_62] : memref<512x128xbf16, #tpu.memory_space<vmem>>, vector<512x128xbf16>
    %cst_63 = arith.constant dense<0.000000e+00> : vector<16x128xf32>
    %159 = tpu.matmul %157, %158, %cst_63 {dimension_numbers = #tpu.dot_dimension_numbers<[1], [0], [0], [1], [0, 0, 1, 1], [], []>} : vector<16x512xbf16>, vector<512x128xbf16>, vector<16x128xf32> -> vector<16x128xf32>
    %c0_64 = arith.constant 0 : index
    %c0_65 = arith.constant 0 : index
    %160 = vector.load %arg13[%c0_64, %c0_65] : memref<1x128xf32, #tpu.memory_space<vmem>>, vector<1x128xf32>
    %161 = vector.broadcast %160 : vector<1x128xf32> to vector<16x128xf32>
    %162 = arith.addf %159, %161 : vector<16x128xf32>
    %163 = arith.addf %113, %162 : vector<16x128xf32>
    %c0_66 = arith.constant 0 : index
    %c0_67 = arith.constant 0 : index
    %c0_68 = arith.constant 0 : index
    %164 = vector.load %arg14[%c0_66, %c0_67, %c0_68] : memref<1x16x128xf32, #tpu.memory_space<vmem>>, vector<1x16x128xf32>
    %165 = vector.shape_cast %164 : vector<1x16x128xf32> to vector<16x128xf32>
    %166 = vector.shape_cast %163 : vector<16x128xf32> to vector<1x16x128xf32>
    tpu.vector_store %arg14[%c0_66, %c0_67, %c0_68], %166 {strides = array<i32>} : memref<1x16x128xf32, #tpu.memory_space<vmem>>, vector<1x16x128xf32>,
    return
  }
  func.func @transform_0(%arg0: i32) -> (i32, i32, i32) {
    %c0_i32 = arith.constant 0 : i32
    %c0_i32_0 = arith.constant 0 : i32
    %c0_i32_1 = arith.constant 0 : i32
    return %arg0, %c0_i32, %c0_i32_0 : i32, i32, i32
  }
  func.func @transform_1(%arg0: i32) -> (i32, i32) {
    %c0_i32 = arith.constant 0 : i32
    %c0_i32_0 = arith.constant 0 : i32
    %c0_i32_1 = arith.constant 0 : i32
    return %c0_i32, %c0_i32_0 : i32, i32
  }
  func.func @transform_2(%arg0: i32) -> (i32, i32) {
    %c0_i32 = arith.constant 0 : i32
    %c0_i32_0 = arith.constant 0 : i32
    %c0_i32_1 = arith.constant 0 : i32
    return %c0_i32, %c0_i32_0 : i32, i32
  }
  func.func @transform_3(%arg0: i32) -> (i32, i32) {
    %c0_i32 = arith.constant 0 : i32
    %c0_i32_0 = arith.constant 0 : i32
    %c0_i32_1 = arith.constant 0 : i32
    return %c0_i32, %c0_i32_0 : i32, i32
  }
  func.func @transform_4(%arg0: i32) -> (i32, i32) {
    %c0_i32 = arith.constant 0 : i32
    %c0_i32_0 = arith.constant 0 : i32
    %c0_i32_1 = arith.constant 0 : i32
    return %c0_i32, %c0_i32_0 : i32, i32
  }
  func.func @transform_5(%arg0: i32) -> (i32, i32) {
    %c0_i32 = arith.constant 0 : i32
    %c0_i32_0 = arith.constant 0 : i32
    %c0_i32_1 = arith.constant 0 : i32
    return %c0_i32, %c0_i32_0 : i32, i32
  }
  func.func @transform_6(%arg0: i32) -> (i32, i32) {
    %c0_i32 = arith.constant 0 : i32
    %c0_i32_0 = arith.constant 0 : i32
    %c0_i32_1 = arith.constant 0 : i32
    return %c0_i32, %c0_i32_0 : i32, i32
  }
  func.func @transform_7(%arg0: i32) -> (i32, i32) {
    %c0_i32 = arith.constant 0 : i32
    %c0_i32_0 = arith.constant 0 : i32
    %c0_i32_1 = arith.constant 0 : i32
    return %c0_i32, %c0_i32_0 : i32, i32
  }
  func.func @transform_8(%arg0: i32) -> (i32, i32) {
    %c0_i32 = arith.constant 0 : i32
    %c0_i32_0 = arith.constant 0 : i32
    %c0_i32_1 = arith.constant 0 : i32
    return %c0_i32, %c0_i32_0 : i32, i32
  }
  func.func @transform_9(%arg0: i32) -> (i32, i32) {
    %c0_i32 = arith.constant 0 : i32
    %c0_i32_0 = arith.constant 0 : i32
    %c0_i32_1 = arith.constant 0 : i32
    return %c0_i32, %c0_i32_0 : i32, i32
  }
  func.func @transform_10(%arg0: i32) -> (i32, i32) {
    %c0_i32 = arith.constant 0 : i32
    %c0_i32_0 = arith.constant 0 : i32
    %c0_i32_1 = arith.constant 0 : i32
    return %c0_i32, %c0_i32_0 : i32, i32
  }
  func.func @transform_11(%arg0: i32) -> (i32, i32) {
    %c0_i32 = arith.constant 0 : i32
    %c0_i32_0 = arith.constant 0 : i32
    %c0_i32_1 = arith.constant 0 : i32
    return %c0_i32, %c0_i32_0 : i32, i32
  }
  func.func @transform_12(%arg0: i32) -> (i32, i32) {
    %c0_i32 = arith.constant 0 : i32
    %c0_i32_0 = arith.constant 0 : i32
    %c0_i32_1 = arith.constant 0 : i32
    return %c0_i32, %c0_i32_0 : i32, i32
  }
  func.func @transform_13(%arg0: i32) -> (i32, i32, i32) {
    %c0_i32 = arith.constant 0 : i32
    %c0_i32_0 = arith.constant 0 : i32
    %c0_i32_1 = arith.constant 0 : i32
    return %arg0, %c0_i32, %c0_i32_0 : i32, i32, i32
  }
}

</mosaic_0001>

<bundles_post_ra>
// kernel: tpu_custom_call.1
= control target key start
LH: loop header
LB: loop body
LE: loop exit
PB: predicated region body
PF: predicated region fallthrough
CT: control target
= control target key end

     0   :  { %s3946_s0 = inlined_call_operand.hbm [shape: f32[2,16,128], index: 0, kind: input, shape index: {}]   ;;  %s3947_s1 = inlined_call_operand.hbm [shape: f32[1,128], index: 1, kind: input, shape index: {}]   ;;  %s3948_s2 = inlined_call_operand.hbm [shape: f32[1,128], index: 2, kind: input, shape index: {}]   ;;  %s3949_s3 = inlined_call_operand.hbm [shape: bf16[128,384], index: 3, kind: input, shape index: {}]   ;;  %s3950_s4 = inlined_call_operand.vmem [shape: f32[1,384], index: 4, kind: input, shape index: {}]   ;;  %s3951_s5 = inlined_call_operand.hbm [shape: bf16[128,128], index: 5, kind: input, shape index: {}]   ;;  %s3952_s6 = inlined_call_operand.vmem [shape: f32[1,128], index: 6, kind: input, shape index: {}]   ;;  %s3953_s7 = inlined_call_operand.vmem [shape: f32[1,128], index: 7, kind: input, shape index: {}]   ;;  %s3954_s8 = inlined_call_operand.vmem [shape: f32[1,128], index: 8, kind: input, shape index: {}]   ;;  %s3955_s9 = inlined_call_operand.hbm [shape: bf16[128,512], index: 9, kind: input, shape index: {}]   ;;  %s3956_s10 = inlined_call_operand.vmem [shape: f32[1,512], index: 10, kind: input, shape index: {}]   ;;  %s3957_s11 = inlined_call_operand.hbm [shape: bf16[512,128], index: 11, kind: input, shape index: {}]   ;;  %s3958_s12 = inlined_call_operand.vmem [shape: f32[1,128], index: 12, kind: input, shape index: {}]   ;;  %s3959_s13 = inlined_call_operand.hbm [shape: f32[2,16,128], index: 13, kind: output, shape index: {}]  }
   0x1   :  { %3964 = sst [smem:[#allocation21_spill]] %s3947_s1 }
   0x2   :  { %3965 = sst [smem:[#allocation22_spill]] %s3949_s3 }
   0x3   :  { %3966 = sst [smem:[#allocation23_spill]] %s3953_s7 }
   0x4   :  { %3967 = sst [smem:[#allocation24_spill]] %s3954_s8 }
   0x5   :  { %3968 = sst [smem:[#allocation25_spill]] %s3956_s10 }
   0x6   :  { %3969 = sst [smem:[#allocation26_spill]] %s3958_s12 }
   0x7   :  { %3970 = sst [smem:[#allocation27_spill]] %s3959_s13 }
   0x8   :  { %18 = vsyncpa [#allocation4], 0 }
   0x9   :  { %20 = vsyncpa [#allocation4 + $0x1], 0 }
   0xa   :  { %21 = vsyncpa [#allocation7], 0 }
   0xb   :  { %22 = vsyncpa [#allocation10], 0 }
   0xc   :  { %23 = vsyncpa [#allocation13], 0 }
   0xd   :  { %24 = vsyncpa [#allocation5], 0 }
   0xe   :  { %26 = vsyncpa [#allocation5 + $0x1], 0  ;;  %s3380_s25 = smov 0   ;;  %s3382_s26 = smov 0  }
   0xf   :  { %s3384_s27 = smov 0   ;;  %s3386_s28 = smov 0  }
  0x10 LB: > { %s3286_s29 = smov [#allocation6]   ;;  %s3401_s14 = sadd.s32 4294967295, %s3284_s28   ;;  %s3284_s28 = sphi %s3386_s28, %s4000_s28   ;;  %s3280_s27 = sphi %s3384_s27, %s3999_s27   ;;  %s3276_s26 = sphi %s3382_s26, %s3998_s26   ;;  %s3272_s25 = sphi %s3380_s25, %s3997_s25  }
  0x11   : > { %s354_s30 = sshll.u32 %s3286_s29, 4  ;;  %p2404_p0 = scmp.ge.s32.totalorder %s3284_s28, 1  ;;  %s3406_s30 = int_to_ptr.vmem [resolvable:$true] %s354_s30 }
  0x12   : > { %p3961_p1 = scmp.eq.s32.totalorder %s3401_s14, 0  ;;  %p341_p2 = scmp.lt.s32.totalorder %s3284_s28, 3 }
  0x13   : > { %s3287_s16 = smov [#allocation9]   ;;  %s3288_s19 = smov [#allocation12]  }
  0x14   : > { %p3408_p3 = pnand %p2404_p0, %p341_p2  ;;  %s375_s17 = sshll.u32 %s3287_s16, 4  ;;  %s3415_s17 = int_to_ptr.vmem [resolvable:$true] %s375_s17 }
  0x15   : > { %s413_s20 = sshll.u32 %s3288_s19, 4  ;;  %s3973_s1 = sld [smem:[#allocation21_spill]]  ;;  %s3423_s20 = int_to_ptr.vmem [resolvable:$true] %s413_s20 }
  0x16   : > { %s3971_s15 = scalar_select %p3408_p3, 1, 0 }
  0x17   : > { %p2735_p5 = pneg %p3408_p3 }
  0x19   : > { %p3419_p6 = pnand %p2735_p5, %p3961_p1 }
  0x1b   : > { %s3008_s23 = scalar_lea.hbm %s3973_s1, 16  ;;  %p3433_p8 = pneg %p3419_p6 }
  0x1c   : > { %p3009_p7 = scmp.ne.s32.totalorder %s3973_s1, %s3008_s23  ;;  %p3015_p11 = scmp.lt.u32.totalorder %s3008_s23, %s3973_s1 }
  0x1e   : > { %p3011_p9 = pnand %p3433_p8, %p3009_p7 }
  0x20   : > { %p3012_p10 = pneg %p3011_p9 }
  0x22   : > { %p3017_p12 = pnand %p3015_p11, %p3012_p10 }
  0x24   : > { %3020 = shalt.err (!%p3017_p12)
}
  0x25   : > { %s3021_s21 = scalar_lea.vmem %s3406_s30, 16  ;;  %s3028_s22 = scalar_lea.vmem %s3406_s30, 32 }
  0x26   : > { %p3022_p13 = scmp.ne.s32.totalorder %s3406_s30, %s3021_s21  ;;  %p3029_p5 = scmp.lt.s32.totalorder %s3406_s30, %s3406_s30 }
  0x27   : > { %p3030_p7 = scmp.lt.s32.totalorder %s3028_s22, %s3021_s21 }
  0x28   : > { %p3024_p0 = pnand %p3022_p13, %p3433_p8 }
  0x29   : > { %p3031_p9 = por %p3030_p7, %p3029_p5 }
  0x2a   : > { %p3025_p2 = pneg %p3024_p0 }
  0x2c   : > { %p3032_p4 = pnand %p3031_p9, %p3025_p2 }
  0x2e   : > { %3035 = shalt.err (!%p3032_p4)
}
  0x2f   : > { %2738 = dma.hbm_to_vmem [thread:$0]  (!%p3419_p6), %s3973_s1, 16, %s3406_s30, [#allocation7]  }
  0x30   : > { %s3975_s3 = sld [smem:[#allocation22_spill]] }
  0x36   : > { %s3036_s19 = scalar_lea.hbm %s3975_s3, 3072 }
  0x37   : > { %p3037_p10 = scmp.ne.s32.totalorder %s3975_s3, %s3036_s19  ;;  %p3043_p4 = scmp.lt.u32.totalorder %s3036_s19, %s3975_s3 }
  0x39   : > { %p3039_p11 = pnand %p3037_p10, %p3433_p8 }
  0x3b   : > { %p3040_p12 = pneg %p3039_p11 }
  0x3d   : > { %p3045_p13 = pnand %p3043_p4, %p3040_p12 }
  0x3f   : > { %3048 = shalt.err (!%p3045_p13)
}
  0x40   : > { %s3049_s30 = scalar_lea.vmem %s3415_s17, 3072  ;;  %p3057_p7 = scmp.lt.s32.totalorder %s3415_s17, %s3415_s17 }
  0x41   : > { %p3050_p0 = scmp.ne.s32.totalorder %s3415_s17, %s3049_s30  ;;  %p3058_p9 = scmp.lt.s32.totalorder %s3049_s30, %s3049_s30 }
  0x43   : > { %p3052_p2 = pnand %p3050_p0, %p3433_p8  ;;  %p3059_p10 = por %p3058_p9, %p3057_p7 }
  0x45   : > { %p3053_p5 = pneg %p3052_p2 }
  0x47   : > { %p3060_p11 = pnand %p3059_p10, %p3053_p5 }
  0x49   : > { %3063 = shalt.err (!%p3060_p11)
}
  0x4a   : > { %s3289_s10 = smov 192   ;;  %s3290_s12 = smov 12  }
  0x4b   : > { %2744 = dma.hbm_to_vmem [thread:$0]  (!%p3419_p6), %s3975_s3, 3072, %s3415_s17, [#allocation10], %s3289_s10, %s3289_s10, %s3290_s12  }
  0x4c   : > { %s3064_s19 = scalar_lea.hbm %s3955_s9, 4096 }
  0x4d   : > { %p3065_p12 = scmp.ne.s32.totalorder %s3955_s9, %s3064_s19  ;;  %p3071_p0 = scmp.lt.u32.totalorder %s3064_s19, %s3955_s9 }
  0x4f   : > { %p3067_p4 = pnand %p3065_p12, %p3433_p8 }
  0x51   : > { %p3068_p13 = pneg %p3067_p4 }
  0x53   : > { %p3073_p2 = pnand %p3071_p0, %p3068_p13 }
  0x55   : > { %3076 = shalt.err (!%p3073_p2)
}
  0x56   : > { %s3077_s17 = scalar_lea.vmem %s3423_s20, 4096  ;;  %p3085_p10 = scmp.lt.s32.totalorder %s3423_s20, %s3423_s20 }
  0x57   : > { %p3078_p5 = scmp.ne.s32.totalorder %s3423_s20, %s3077_s17  ;;  %p3086_p11 = scmp.lt.s32.totalorder %s3077_s17, %s3077_s17 }
  0x59   : > { %p3080_p7 = pnand %p3078_p5, %p3433_p8  ;;  %p3087_p12 = por %p3086_p11, %p3085_p10 }
  0x5b   : > { %p3081_p9 = pneg %p3080_p7 }
  0x5d   : > { %p3088_p4 = pnand %p3087_p12, %p3081_p9 }
  0x5f   : > { %3091 = shalt.err (!%p3088_p4)
}
  0x60   : > { %s3291_s10 = smov 256   ;;  %s3292_s1 = smov 16  }
  0x61   : > { %2750 = dma.hbm_to_vmem [thread:$0]  (!%p3419_p6), %s3955_s9, 4096, %s3423_s20, [#allocation13], %s3291_s10, %s3291_s10, %s3292_s1  }
  0x62   : > { %s3293_s23 = smov [#allocation8]   ;;  %s3294_s29 = smov [#allocation11]  }
  0x63   : > { %s365_s24 = sshll.u32 %s3293_s23, 4  ;;  %s391_s19 = sshll.u32 %s3294_s29, 4  ;;  %s366_s24 = int_to_ptr.vmem [resolvable:$true] %s365_s24  ;;  %s392_s19 = int_to_ptr.vmem [resolvable:$true] %s391_s19 }
  0x64   : > { %s3092_s30 = scalar_lea.hbm %s3948_s2, 16 }
  0x65   : > { %p3093_p13 = scmp.ne.s32.totalorder %s3948_s2, %s3092_s30  ;;  %p3099_p5 = scmp.lt.u32.totalorder %s3092_s30, %s3948_s2 }
  0x67   : > { %p3095_p0 = pnand %p3093_p13, %p3433_p8 }
  0x69   : > { %p3096_p2 = pneg %p3095_p0 }
  0x6b   : > { %p3101_p7 = pnand %p3099_p5, %p3096_p2 }
  0x6d   : > { %3104 = shalt.err (!%p3101_p7)
}
  0x6e   : > { %s3105_s20 = scalar_lea.vmem %s366_s24, 16  ;;  %s3112_s10 = scalar_lea.vmem %s366_s24, 32 }
  0x6f   : > { %p3106_p9 = scmp.ne.s32.totalorder %s366_s24, %s3105_s20  ;;  %p3113_p12 = scmp.lt.s32.totalorder %s366_s24, %s366_s24 }
  0x70   : > { %p3114_p4 = scmp.lt.s32.totalorder %s3112_s10, %s3105_s20 }
  0x71   : > { %p3108_p10 = pnand %p3106_p9, %p3433_p8 }
  0x72   : > { %p3115_p1 = por %p3114_p4, %p3113_p12 }
  0x73   : > { %p3109_p11 = pneg %p3108_p10 }
  0x75   : > { %p3116_p3 = pnand %p3115_p1, %p3109_p11 }
  0x77   : > { %3119 = shalt.err (!%p3116_p3)
}
  0x78   : > { %2741 = dma.hbm_to_vmem [thread:$0]  (!%p3419_p6), %s3948_s2, 16, %s366_s24, [#allocation7]  }
  0x79   : > { %s3120_s12 = scalar_lea.hbm %s3951_s5, 1024 }
  0x7a   : > { %p3121_p13 = scmp.ne.s32.totalorder %s3951_s5, %s3120_s12  ;;  %p3127_p3 = scmp.lt.u32.totalorder %s3120_s12, %s3951_s5 }
  0x7c   : > { %p3123_p0 = pnand %p3121_p13, %p3433_p8 }
  0x7e   : > { %p3124_p1 = pneg %p3123_p0 }
  0x80   : > { %p3129_p2 = pnand %p3127_p3, %p3124_p1 }
  0x82   : > { %3132 = shalt.err (!%p3129_p2)
}
  0x83   : > { %s3133_s22 = scalar_lea.vmem %s392_s19, 1024  ;;  %p3141_p10 = scmp.lt.s32.totalorder %s392_s19, %s392_s19 }
  0x84   : > { %p3134_p5 = scmp.ne.s32.totalorder %s392_s19, %s3133_s22  ;;  %p3142_p11 = scmp.lt.s32.totalorder %s3133_s22, %s3133_s22 }
  0x86   : > { %p3136_p7 = pnand %p3134_p5, %p3433_p8  ;;  %p3143_p12 = por %p3142_p11, %p3141_p10 }
  0x88   : > { %p3137_p9 = pneg %p3136_p7 }
  0x8a   : > { %p3144_p4 = pnand %p3143_p12, %p3137_p9 }
  0x8c   : > { %3147 = shalt.err (!%p3144_p4)
}
  0x8d   : > { %s3295_s24 = smov 64   ;;  %s3296_s30 = smov 4  }
  0x8e   : > { %2747 = dma.hbm_to_vmem [thread:$0]  (!%p3419_p6), %s3951_s5, 1024, %s392_s19, [#allocation10], %s3295_s24, %s3295_s24, %s3296_s30  }
  0x8f   : > { %s3297_s10 = smov [#allocation14]   ;;  %s3148_s8 = scalar_lea.hbm %s3957_s11, 4096 }
  0x90   : > { %s429_s3 = sshll.u32 %s3297_s10, 4  ;;  %p3149_p13 = scmp.ne.s32.totalorder %s3957_s11, %s3148_s8  ;;  %s430_s3 = int_to_ptr.vmem [resolvable:$true] %s429_s3 }
  0x91   : > { %p3155_p3 = scmp.lt.u32.totalorder %s3148_s8, %s3957_s11 }
  0x92   : > { %p3151_p0 = pnand %p3149_p13, %p3433_p8 }
  0x94   : > { %p3152_p1 = pneg %p3151_p0 }
  0x96   : > { %p3157_p2 = pnand %p3155_p3, %p3152_p1 }
  0x98   : > { %3160 = shalt.err (!%p3157_p2)
}
  0x99   : > { %s3161_s19 = scalar_lea.vmem %s430_s3, 4096  ;;  %p3169_p10 = scmp.lt.s32.totalorder %s430_s3, %s430_s3 }
  0x9a   : > { %p3162_p5 = scmp.ne.s32.totalorder %s430_s3, %s3161_s19  ;;  %p3170_p11 = scmp.lt.s32.totalorder %s3161_s19, %s3161_s19 }
  0x9c   : > { %p3164_p7 = pnand %p3162_p5, %p3433_p8  ;;  %p3171_p12 = por %p3170_p11, %p3169_p10 }
  0x9e   : > { %p3165_p9 = pneg %p3164_p7 }
  0xa0   : > { %p3172_p4 = pnand %p3171_p12, %p3165_p9 }
  0xa2   : > { %3175 = shalt.err (!%p3172_p4)
}
  0xa3   : > { %2753 = dma.hbm_to_vmem [thread:$0]  (!%p3419_p6), %s3957_s11, 4096, %s430_s3, [#allocation13], %s3295_s24, %s3295_s24, %s3296_s30  }
  0xa4   : > { %s2403_s16 = sadd.s32 4294967294, %s3284_s28   ;;  %s3557_s18 = sadd.s32 1, %s3284_s28  }
  0xa5   : > { %s36_s17 = ssub.s32 %s3284_s28, %s3557_s18  ;;  %s39_s20 = sadd.s32 1, %s3280_s27 }
  0xa6   : > { %p37_p8 = scmp.eq.s32.totalorder %s36_s17, 0  ;;  %p46_p13 = scmp.ne.s32.totalorder %s3280_s27, %s3276_s26 }
  0xa7   : > { %p47_p0 = scmp.eq.s32.totalorder %s3284_s28, 0  ;;  %p52_p1 = scmp.ne.s32.totalorder %s3276_s26, %s3272_s25 }
  0xa8   : > { %s3568_s10 = scalar_select %p37_p8, %s3280_s27, %s39_s20  }
  0xa9   : > { %p3570_p3 = por %p47_p0, %p46_p13  ;;  %p3977_p2 = scmp.eq.s32.totalorder %s3401_s14, 0 }
  0xaa   : > { %p328_p5 = scmp.eq.s32.totalorder %s3401_s14, 1  ;;  %p334_p7 = scmp.eq.s32.totalorder %s2403_s16, 1 }
  0xab   : > { %p3576_p6 = por %p3977_p2, %p52_p1  ;;  %p2768_p9 = scmp.lt.s32.totalorder %s3284_s28, 2 }
  0xac   : > { %s446_s30 = sand.u32 1, %s3280_s27   ;;  %p3583_p10 = por %p328_p5, %p46_p13 }
  0xad   : > { %p3587_p11 = por %p334_p7, %p52_p1  ;;  %s2412_s8 = sshll.u32 %s446_s30, 4 }
  0xae   : > { %s3979_s3 = scalar_select %p3583_p10, 1, 0 }
  0xaf   : > { %s3980_s7 = scalar_select %p3587_p11, 1, 0 }
  0xb0   : > { %s2539_s12 = sshll.u32 %s3284_s28, 8  ;;  %s450_s19 = scalar_lea.vmem [#allocation3], %s2412_s8 }
  0xb1   : > { %s3595_s29 = scalar_lea.hbm %s3946_s0, %s2539_s12  ;;  %s457_s21 = sshll.u32 %s450_s19, 4  ;;  %s3597_s21 = int_to_ptr.vmem [resolvable:$true] %s457_s21 }
  0xb2   : > { %p3601_p12 = pnand %p2768_p9, %p3570_p3  ;;  %s3605_s16 = scalar_lea.sflag [#allocation4], %s446_s30 }
  0xb3   : > { %s3176_s17 = scalar_lea.hbm %s3595_s29, 256  ;;  %s3181_s1 = scalar_lea.hbm %s3946_s0, 512 }
  0xb4   : > { %p3177_p4 = scmp.ne.s32.totalorder %s3595_s29, %s3176_s17  ;;  %p3178_p8 = pneg %p3601_p12 }
  0xb5   : > { %p3182_p1 = scmp.lt.u32.totalorder %s3595_s29, %s3946_s0  ;;  %p3183_p3 = scmp.lt.u32.totalorder %s3181_s1, %s3176_s17 }
  0xb6   : > { %p3179_p13 = pnand %p3178_p8, %p3177_p4  ;;  %p3185_p5 = scmp.lt.u32.totalorder %s3176_s17, %s3595_s29 }
  0xb7   : > { %p3184_p2 = por %p3183_p3, %p3182_p1 }
  0xb8   : > { %p3180_p0 = pneg %p3179_p13 }
  0xb9   : > { %p3186_p7 = por %p3185_p5, %p3184_p2 }
  0xbb   : > { %p3187_p9 = pnand %p3186_p7, %p3180_p0 }
  0xbd   : > { %3190 = shalt.err (!%p3187_p9)
}
  0xbe   : > { %s3191_s30 = scalar_lea.vmem %s3597_s21, 256  ;;  %s3298_s23 = smov [#allocation3]  }
  0xbf   : > { %p3192_p4 = scmp.ne.s32.totalorder %s3597_s21, %s3191_s30  ;;  %s3196_s19 = sshll.u32 %s3298_s23, 4  ;;  %s3197_s19 = int_to_ptr.vmem [resolvable:$false] %s3196_s19 }
  0xc0   : > { %s3198_s20 = scalar_lea.vmem %s3197_s19, 512  ;;  %p3199_p10 = scmp.lt.s32.totalorder %s3597_s21, %s3197_s19 }
  0xc1   : > { %p3194_p13 = pnand %p3192_p4, %p3178_p8  ;;  %p3200_p1 = scmp.lt.s32.totalorder %s3198_s20, %s3191_s30 }
  0xc3   : > { %p3195_p11 = pneg %p3194_p13  ;;  %p3201_p3 = por %p3200_p1, %p3199_p10 }
  0xc5   : > { %p3202_p2 = pnand %p3201_p3, %p3195_p11 }
  0xc7   : > { %3205 = shalt.err (!%p3202_p2)
}
  0xc8   : > { %s3299_s17 = smov 128   ;;  %s3300_s8 = smov 8  }
  0xc9   : > { %2757 = dma.hbm_to_vmem [thread:$0]  (!%p3601_p12), %s3595_s29, 256, %s3597_s21, %s3605_s16, %s3299_s17, %s3299_s17, %s3300_s8  }
  0xca   : > { %p3982_p8 = scmp.ne.s32.totalorder %s3971_s15, 0 }
  0xcb   : > { %s3636_s1 = sand.u32 (!%p3982_p8), 1, %s3276_s26  }
  0xcc   : > { %469 = sbr.rel (%p3982_p8) target bundleno = 2620 (0xa3c), region = 72  ;;  %s2416_s12 = sshll.u32 (!%p3982_p8), %s3636_s1, 4 }
  0xcd   : > { %s472_s13 = scalar_lea.sflag (!%p3982_p8), [#allocation4], %s3636_s1  ;;  %s3642_s30 = scalar_lea.vmem (!%p3982_p8), [#allocation3], %s2416_s12 }
  0xd3   : > { %3251 = dma.done.wait (%p3576_p6), %s472_s13, 256  }
  0xd4   : > { %3253 = vsyncadd (%p3576_p6), %s472_s13, 4294967040  ;;  %p3983_p10 = scmp.eq.s32.totalorder %s3401_s14, 0 }
  0xd6   : > { %3255 = dma.done.wait (%p3983_p10), [#allocation7], 32   ;;  %p3984_p11 = pmov %p3983_p10 }
  0xd7   : > { %p3985_p12 = pmov %p3983_p10 }
  0xd8   : > { %3257 = vsyncadd (%p3984_p11), [#allocation7], 4294967264 }
  0xd9   : > { %3259 = dma.done.wait (%p3985_p12), [#allocation10], 4096   ;;  %p3986_p0 = pmov %p3983_p10 }
  0xdb   : > { %3261 = vsyncadd (%p3986_p0), [#allocation10], 4294963200  ;;  %p3987_p5 = pmov %p3986_p0 }
  0xdc   : > { %p3988_p7 = pmov %p3986_p0 }
  0xdd   : > { %3263 = dma.done.wait (%p3987_p5), [#allocation13], 8192  }
  0xde   : > { %3265 = vsyncadd (%p3988_p7), [#allocation13], 4294959104  ;;  %v3301_v0 = vmov 0.0   ;;  %v3662_v1 = vld [vmem:[%s3642_s30] sm:$0xff]  ;;  %v3665_v2 = vld [vmem:[%s3642_s30 + $0x8] sm:$0xff]  ;;  %v3302_v26 = vmov 0   ;;  %v625_v57 = vlaneseq }
  0xdf   : > { %2619 = vmatprep.subr.bf16.mxu1 %v3301_v0  ;;  %547 = vadd.xlane.f32.xlu0 %v3662_v1  ;;  %v554_v3 = vmul.f32 %v3662_v1, %v3662_v1  ;;  %v2830_v4 = vld [vmem:[#allocation9 + $0x4] ss:$12 sps:$4 sm:$0xff]   ;;  %v555_v5 = vmul.f32 %v3665_v2, %v3665_v2  ;;  %v2832_v6 = vld [vmem:[#allocation9] ss:$12 sps:$4 sm:$0xff]   ;;  %v2833_v7 = vld [vmem:[#allocation9 + $0x8] ss:$12 sps:$4 sm:$0xff]  }
  0xe0   : > { %768 = vmatprep.subr.bf16.mxu0 %v2830_v4  ;;  %2620 = vmatpush3.bf16.msra.mxu1 %v2833_v7  ;;  %v2834_v8 = vld [vmem:[#allocation9 + $0x1c] ss:$12 sps:$4 sm:$0xff]   ;;  %v2836_v9 = vld [vmem:[#allocation9 + $0x18] ss:$12 sps:$4 sm:$0xff]   ;;  %v2837_v10 = vld [vmem:[#allocation9 + $0x20] ss:$12 sps:$4 sm:$0xff]  }
  0xe1   : > { %556 = vadd.xlane.f32.xlu1 %v554_v3  ;;  %769 = vmatpush1.bf16.msra.mxu0 %v2832_v6  ;;  %v2838_v11 = vld [vmem:[#allocation9 + $0x34] ss:$12 sps:$4 sm:$0xff]   ;;  %v2840_v12 = vld [vmem:[#allocation9 + $0x30] ss:$12 sps:$4 sm:$0xff]   ;;  %v2841_v13 = vld [vmem:[#allocation9 + $0x38] ss:$12 sps:$4 sm:$0xff]  }
  0xe2   : > { %2621 = vmatprep.subr.bf16.mxu1 %v3301_v0  ;;  %770 = vmatprep.subr.bf16.mxu0 %v2834_v8  ;;  %v2842_v14 = vld [vmem:[#allocation9 + $0x4c] ss:$12 sps:$4 sm:$0xff]   ;;  %v2844_v15 = vld [vmem:[#allocation9 + $0x48] ss:$12 sps:$4 sm:$0xff]   ;;  %v2845_v16 = vld [vmem:[#allocation9 + $0x50] ss:$12 sps:$4 sm:$0xff]  }
  0xe3   : > { %549 = vadd.xlane.f32.xlu0 %v3665_v2  ;;  %v2846_v17 = vld [vmem:[#allocation9 + $0x64] ss:$12 sps:$4 sm:$0xff]   ;;  %v2848_v18 = vld [vmem:[#allocation9 + $0x60] ss:$12 sps:$4 sm:$0xff]   ;;  %v2849_v19 = vld [vmem:[#allocation9 + $0x68] ss:$12 sps:$4 sm:$0xff]   ;;  %800 = vmatprep.mubr.bf16.mxu0 %v3302_v26 }
  0xe4   : > { %2622 = vmatpush3.bf16.msra.mxu1 %v2837_v10  ;;  %v2850_v20 = vld [vmem:[#allocation9 + $0x7c] ss:$12 sps:$4 sm:$0xff]   ;;  %v2852_v21 = vld [vmem:[#allocation9 + $0x78] ss:$12 sps:$4 sm:$0xff]   ;;  %v2853_v22 = vld [vmem:[#allocation9 + $0x80] ss:$12 sps:$4 sm:$0xff]  }
  0xe5   : > { %558 = vadd.xlane.f32.xlu1 %v555_v5  ;;  %771 = vmatpush1.bf16.msra.mxu0 %v2836_v9  ;;  %v2854_v23 = vld [vmem:[#allocation9 + $0x94] ss:$12 sps:$4 sm:$0xff]   ;;  %v2856_v24 = vld [vmem:[#allocation9 + $0x90] ss:$12 sps:$4 sm:$0xff]   ;;  %v2857_v25 = vld [vmem:[#allocation9 + $0x98] ss:$12 sps:$4 sm:$0xff]  }
  0xe6   : > { %2623 = vmatprep.subr.bf16.mxu1 %v3301_v0  ;;  %772 = vmatprep.subr.bf16.mxu0 %v2838_v11  ;;  %vm3303_vm0 = vmmov 0   ;;  %v2858_v27 = vld [vmem:[#allocation9 + $0xac] ss:$12 sps:$4 sm:$0xff]   ;;  %v2860_v28 = vld [vmem:[#allocation9 + $0xa8] ss:$12 sps:$4 sm:$0xff]   ;;  %v3691_v58 = vshrl.u32 %v625_v57, 7 }
  0xe7   : > { %2635 = vmatprep.mubr.msk.bf16.mxu1 %vm3303_vm0, %v3301_v0  ;;  %v2861_v29 = vld [vmem:[#allocation9 + $0xb0] ss:$12 sps:$4 sm:$0xff]   ;;  %v623_v61 = vld [vmem:[%s3950_s4] sm:$0x7]  ;;  %vm855_vm1 = vcmask 261120   ;;  %vm903_vm2 = vcmask 130048  }
  0xe8   : > { %2624 = vmatpush3.bf16.msra.mxu1 %v2841_v13  ;;  %v2424_v47 = vld [vmem:[#allocation6] ss:$0 sm:$0xff]  ;;  %v2425_v52 = vld [vmem:[#allocation8] ss:$0 sm:$0xff]  ;;  %v627_v59 = vsub.s32 0, %v3691_v58  ;;  %v635_v60 = vsub.s32 2, %v3691_v58 }
  0xe9   : > { %773 = vmatpush1.bf16.msra.mxu0 %v2840_v12  ;;  %2625 = vmatprep.subr.bf16.mxu1 %v3301_v0  ;;  %v631_v62 = vsub.s32 1, %v3691_v58  ;;  %s3304_s29 = smov 96   ;;  %s3305_s21 = smov 64   ;;  %vm1105_vm3 = vcmask 523520   ;;  %vm1237_vm4 = vcmask 785920   ;;  %vm1369_vm5 = vcmask 1048320  }
  0xea   : > { %774 = vmatprep.subr.bf16.mxu0 %v2842_v14  ;;  %v628_v63 = vrot.slane %v623_v61, %v627_v59  ;;  %s3306_s22 = smov 32   ;;  %s3989_s17 = sld [smem:[#allocation23_spill]] }
  0xeb   : > { %v632_v4 = vrot.slane %v623_v61, %v631_v62  ;;  %s3992_s16 = sld [smem:[#allocation26_spill]]  ;;  %s541_s23 = scalar_lea.vmem [#allocation15], %s2416_s12 }
  0xec   : > { %2626 = vmatpush3.bf16.msra.mxu1 %v2845_v16  ;;  %s2273_s19 = sshll.u32 %s541_s23, 4  ;;  %s2540_s20 = sshll.u32 %s3401_s14, 8  ;;  %s3896_s19 = int_to_ptr.vmem [resolvable:$true] %s2273_s19 }
  0xed   : > { %775 = vmatpush1.bf16.msra.mxu0 %v2844_v15  ;;  %2627 = vmatprep.subr.bf16.mxu1 %v3301_v0  ;;  %s3993_s13 = sld [smem:[#allocation27_spill]]  ;;  %s2260_s12 = scalar_lea.sflag [#allocation5], %s3636_s1 }
  0xee   : > { %776 = vmatprep.subr.bf16.mxu0 %v2846_v17  ;;  %s3206_s15 = scalar_lea.vmem %s3896_s19, 256  ;;  %p3994_p9 = scmp.ne.s32.totalorder %s3979_s3, 0 }
  0xef   : > { %p3207_p6 = scmp.ne.s32.totalorder %s3896_s19, %s3206_s15  ;;  %s3307_s14 = smov [#allocation15]  }
  0xf0   : > { %2628 = vmatpush3.bf16.msra.mxu1 %v2849_v19  ;;  %s3210_s24 = sshll.u32 %s3307_s14, 4  ;;  %s3211_s24 = int_to_ptr.vmem [resolvable:$false] %s3210_s24 }
  0xf1   : > { %777 = vmatpush1.bf16.msra.mxu0 %v2848_v18  ;;  %2629 = vmatprep.subr.bf16.mxu1 %v3301_v0  ;;  %p3208_p4 = pnand %p3207_p6, %p3994_p9  ;;  %p3213_p1 = scmp.lt.s32.totalorder %s3896_s19, %s3211_s24 }
  0xf2   : > { %778 = vmatprep.subr.bf16.mxu0 %v2850_v20 }
  0xf3   : > { %p3209_p13 = pneg %p3208_p4 }
  0xf4   : > { %2630 = vmatpush3.bf16.msra.mxu1 %v2853_v22 }
  0xf5   : > { %779 = vmatpush1.bf16.msra.mxu0 %v2852_v21  ;;  %2631 = vmatprep.subr.bf16.mxu1 %v3301_v0 }
  0xf6   : > { %780 = vmatprep.subr.bf16.mxu0 %v2854_v23 }
  0xf8   : > { %2632 = vmatpush3.bf16.msra.mxu1 %v2857_v25 }
  0xf9   : > { %781 = vmatpush1.bf16.msra.mxu0 %v2856_v24  ;;  %2633 = vmatprep.subr.bf16.mxu1 %v3301_v0 }
  0xfa   : > { %782 = vmatprep.subr.bf16.mxu0 %v2858_v27 }
  0xfc   : > { %2634 = vmatpush3.bf16.msra.mxu1 %v2861_v29 }
  0xfd   : > { %783 = vmatpush1.bf16.msra.mxu0 %v2860_v28  ;;  %2639 = vmatprep.subr.bf16.mxu1 %v3301_v0 }
  0xfe   : > { %2663 = vmatprep.subr.bf16.mxu0 %v3301_v0 }
 0x16c   : > { %v548_v30 = vpop.xlane.xlu0 %547 }
 0x16d   : > { %v552_v31 = vmul.f32 0.0078125, %v548_v30 }
 0x16e   : > { %v557_v32 = vpop.xlane.xlu1 %556 }
 0x16f   : > { %v562_v33 = vmul.f32 %v552_v31, %v552_v31  ;;  %v560_v34 = vmul.f32 0.0078125, %v557_v32  ;;  %v566_v44 = vsub.f32 %v3662_v1, %v552_v31  ;;  %v636_v1 = vrot.slane %v623_v61, %v635_v60 }
 0x170   : > { %v550_v35 = vpop.xlane.xlu0 %549 }
 0x171   : > { %v564_v36 = vsub.f32 %v560_v34, %v562_v33  ;;  %v553_v37 = vmul.f32 0.0078125, %v550_v35 }
 0x172   : > { %v559_v38 = vpop.xlane.xlu1 %558 }
 0x173   : > { %v568_v39 = vadd.f32 1e-05, %v564_v36  ;;  %v563_v40 = vmul.f32 %v553_v37, %v553_v37  ;;  %v561_v41 = vmul.f32 0.0078125, %v559_v38  ;;  %v567_v48 = vsub.f32 %v3665_v2, %v553_v37 }
 0x175   : > { %2950 = vrsqrt.f32 %v568_v39  ;;  %v565_v42 = vsub.f32 %v561_v41, %v563_v40 }
 0x177   : > { %v569_v43 = vadd.f32 1e-05, %v565_v42 }
 0x179   : > { %2952 = vrsqrt.f32 %v569_v43 }
 0x17f   : > { %v2951_v45 = vpop.eup %2950 }
 0x180   : > { %v572_v46 = vmul.f32 %v2951_v45, %v566_v44 }
 0x182   : > { %v580_v51 = vmul.f32 %v2424_v47, %v572_v46 }
 0x183   : > { %v2953_v49 = vpop.eup %2952 }
 0x184   : > { %v573_v50 = vmul.f32 %v2953_v49, %v567_v48  ;;  %v588_v54 = vadd.f32 %v2425_v52, %v580_v51 }
 0x186   : > { %v581_v53 = vmul.f32 %v2424_v47, %v573_v50 }
 0x188   : > { %v589_v55 = vadd.f32 %v2425_v52, %v581_v53 }
 0x18a   : > { %v590_v56 = vpack.c.bf16 %v589_v55, %v588_v54 }
 0x18c   : > { %801 = vmatmul.mubr.bf16.vlgmr.msra.gmra.mrb[0].mxu0 %v590_v56  ;;  %2636 = vmatmul.mubr.bf16.vlgmr.msra.gmra.mrb[0].mxu1 %v590_v56 }
 0x18d   : > { %2641 = vmatprep.mubr.msk.bf16.mxu1 %vm3303_vm0, %v3301_v0  ;;  %2665 = vmatprep.mubr.msk.bf16.mxu0 %vm3303_vm0, %v3301_v0 }
 0x25f   : > { %v802_v2 = vpop.f32.mrb[0].mxu0  ;;  %v845_v3 = vpop.f32.mrb[0].mxu1 }
 0x260   : > { %v804_v5 = vpop.f32.mrb[1].mxu0  ;;  %v2637_v6 = vpop.f32.mrb[1].mxu1  ;;  %v803_v9 = vadd.f32 %v802_v2, %v628_v63  ;;  %v846_v10 = vadd.f32 %v845_v3, %v636_v1 }
 0x261   : > { %v806_v7 = vpop.f32.mrb[2].mxu0  ;;  %v848_v8 = vpop.f32.mrb[2].mxu1  ;;  %v805_v15 = vadd.f32 %v804_v5, %v632_v4 }
 0x262   : > { %v807_v11 = vadd.f32 %v806_v7, %v628_v63  ;;  %v849_v12 = vadd.f32 %v848_v8, %v636_v1  ;;  %v808_v13 = vpop.f32.mrb[3].mxu0  ;;  %v2638_v14 = vpop.f32.mrb[3].mxu1 }
 0x263   : > { %v809_v16 = vadd.f32 %v808_v13, %v632_v4 }
 0x264   : > { %v852_v17 = vpack.c.bf16 %v807_v11, %v803_v9  ;;  %v3705_v18 = vpack.c.bf16 %v849_v12, %v846_v10 }
 0x265   : > { %v853_v19 = vpack.c.bf16 %v809_v16, %v805_v15 }
 0x267   : > { %v860_v20 = vsel %vm855_vm1, %v853_v19, 0 }
 0x268   : > { %2640 = vmatpush3.bf16.xpose.msra.mxu1 %v860_v20 }
 0x269   : > { %2645 = vmatprep.subr.bf16.mxu1 %v3301_v0 }
 0x26f   : > { %2642 = vmatmul.mubr.msk.bf16.vlgmr.msra.gmra.mrb[4].mxu1 %vm855_vm1, %v852_v17 }
 0x270   : > { %2646 = vmatpush3.bf16.msra.mxu1 %v3705_v18  ;;  %2647 = vmatprep.mubr.msk.bf16.mxu1 %vm3303_vm0, %v3301_v0 }
 0x271   : > { %2651 = vmatprep.subr.bf16.mxu1 %v3301_v0 }
 0x342   : > { %v896_v21 = vpop.f32.mrb[4].mxu1 }
 0x343   : > { %v2643_v22 = vpop.f32.mrb[5].mxu1  ;;  %v904_v23 = vsel %vm903_vm2, %v896_v21, -inf }
 0x344   : > { %905 = vmax.xlane.f32.xlu0 %v904_v23  ;;  %v899_v24 = vpop.f32.mrb[6].mxu1 }
 0x345   : > { %v2644_v25 = vpop.f32.mrb[7].mxu1  ;;  %v907_v27 = vsel %vm903_vm2, %v899_v24, -inf }
 0x346   : > { %908 = vmax.xlane.f32.xlu1 %v907_v27 }
 0x357   : > { %974 = vrot.lane.b32.xlu1 %v852_v17, %s3304_s29 }
 0x35a   : > { %977 = vrot.lane.b32.xlu0 %v853_v19, %s3304_s29 }
 0x35b   : > { %1110 = vrot.lane.b32.xlu1 %v853_v19, %s3305_s21 }
 0x35e   : > { %1242 = vrot.lane.b32.xlu0 %v853_v19, %s3306_s22 }
 0x35f   : > { %1108 = vrot.lane.b32.xlu1 %v852_v17, %s3305_s21 }
 0x363   : > { %1240 = vrot.lane.b32.xlu1 %v852_v17, %s3306_s22 }
 0x3d1   : > { %v906_v28 = vpop.xlane.xlu0 %905 }
 0x3d2   : > { %v910_v29 = vsub.f32 %v896_v21, %v906_v28 }
 0x3d3   : > { %v909_v30 = vpop.xlane.xlu1 %908 }
 0x3d4   : > { %v912_v31 = vmul.f32 1.442695, %v910_v29  ;;  %v911_v32 = vsub.f32 %v899_v24, %v909_v30 }
 0x3d5   : > { %v978_v35 = vpop.permute.xlu0 %977 }
 0x3d6   : > { %v914_v33 = vmul.f32 1.442695, %v911_v32  ;;  %2954 = vpow2.f32 %v912_v31  ;;  %v983_v44 = vsel %vm855_vm1, %v978_v35, 0 }
 0x3d7   : > { %v975_v34 = vpop.permute.xlu1 %974 }
 0x3d8   : > { %2956 = vpow2.f32 %v914_v33 }
 0x3d9   : > { %v1243_v39 = vpop.permute.xlu0 %1242 }
 0x3da   : > { %v1248_v43 = vsel %vm855_vm1, %v1243_v39, 0 }
 0x3db   : > { %v1111_v36 = vpop.permute.xlu1 %1110 }
 0x3dc   : > { %v1116_v37 = vsel %vm855_vm1, %v1111_v36, 0 }
 0x3dd   : > { %2664 = vmatpush3.bf16.xpose.msra.mxu0 %v1116_v37 }
 0x3de   : > { %2675 = vmatprep.subr.bf16.mxu0 %v3301_v0 }
 0x3df   : > { %v1109_v41 = vpop.permute.xlu1 %1108 }
 0x3e0   : > { %v3724_v38 = vpop.eup %2954 }
 0x3e2   : > { %v3726_v40 = vpop.eup %2956 }
 0x3e3   : > { %v922_v42 = vpack.c.bf16 %v3726_v40, %v3724_v38  ;;  %v1241_v45 = vpop.permute.xlu1 %1240 }
 0x3e4   : > { %2666 = vmatmul.mubr.msk.bf16.vlgmr.msra.gmra.mrb[4].mxu0 %vm855_vm1, %v1109_v41 }
 0x3e5   : > { %2648 = vmatmul.mubr.msk.bf16.vlgmr.msra.gmra.mrb[8].mxu1 %vm903_vm2, %v922_v42  ;;  %2676 = vmatpush3.bf16.xpose.msra.mxu0 %v1248_v43 }
 0x3e6   : > { %2652 = vmatpush3.bf16.xpose.msra.mxu1 %v983_v44  ;;  %2677 = vmatprep.mubr.msk.bf16.mxu0 %vm3303_vm0, %v3301_v0 }
 0x3e7   : > { %2653 = vmatprep.mubr.msk.bf16.mxu1 %vm3303_vm0, %v3301_v0  ;;  %2657 = vmatprep.subr.bf16.mxu1 %v3301_v0 }
 0x3e8   : > { %2687 = vmatprep.subr.bf16.mxu0 %v3301_v0 }
 0x3ec   : > { %2678 = vmatmul.mubr.msk.bf16.vlgmr.msra.gmra.mrb[8].mxu0 %vm855_vm1, %v1241_v45 }
 0x3ed   : > { %2654 = vmatmul.mubr.msk.bf16.vlgmr.msra.gmra.mrb[12].mxu1 %vm855_vm1, %v975_v34  ;;  %2703 = vmatprep.mubr.msk.bf16.mxu0 %vm3303_vm0, %v3301_v0 }
 0x3ee   : > { %2659 = vmatprep.mubr.msk.bf16.mxu1 %vm3303_vm0, %v3301_v0 }
 0x4b7   : > { %v1152_v46 = vpop.f32.mrb[4].mxu0 }
 0x4b8   : > { %v3746_v47 = vpop.f32.mrb[8].mxu1  ;;  %v2667_v48 = vpop.f32.mrb[5].mxu0  ;;  %v1159_v49 = vsel %vm903_vm2, %v1152_v46, -inf }
 0x4b9   : > { %1160 = vmax.xlane.f32.xlu0 %v1159_v49  ;;  %v2649_v50 = vpop.f32.mrb[9].mxu1  ;;  %v1155_v51 = vpop.f32.mrb[6].mxu0  ;;  %v916_v48 = vsel %vm903_vm2, %v3724_v38, 0.0  ;;  %v919_v49 = vsel %vm903_vm2, %v3726_v40, 0.0 }
 0x4ba   : > { %v3749_v52 = vpop.f32.mrb[10].mxu1  ;;  %v2668_v53 = vpop.f32.mrb[7].mxu0  ;;  %v1162_v55 = vsel %vm903_vm2, %v1155_v51, -inf }
 0x4bb   : > { %v2650_v54 = vpop.f32.mrb[11].mxu1 }
 0x4bd   : > { %1163 = vmax.xlane.f32.xlu0 %v1162_v55 }
 0x4bf   : > { %v1284_v56 = vpop.f32.mrb[8].mxu0 }
 0x4c0   : > { %v1019_v57 = vpop.f32.mrb[12].mxu1  ;;  %v2679_v61 = vpop.f32.mrb[9].mxu0  ;;  %v1291_v63 = vsel %vm903_vm2, %v1284_v56, -inf }
 0x4c1   : > { %1292 = vmax.xlane.f32.xlu0 %v1291_v63  ;;  %v2655_v1 = vpop.f32.mrb[13].mxu1  ;;  %v1287_v2 = vpop.f32.mrb[10].mxu0  ;;  %v1026_v7 = vsel %vm903_vm2, %v1019_v57, -inf }
 0x4c2   : > { %v1022_v3 = vpop.f32.mrb[14].mxu1  ;;  %v2680_v4 = vpop.f32.mrb[11].mxu0  ;;  %v1294_v5 = vsel %vm903_vm2, %v1287_v2, -inf }
 0x4c3   : > { %1295 = vmax.xlane.f32.xlu1 %v1294_v5  ;;  %v2656_v6 = vpop.f32.mrb[15].mxu1  ;;  %v1029_v8 = vsel %vm903_vm2, %v1022_v3, -inf  ;;  %v2863_v4 = vld [vmem:[#allocation11 + $0x8] sm:$0xff]   ;;  %v2864_v5 = vld [vmem:[#allocation11 + $0x10] sm:$0xff]  }
 0x4c4   : > { %v2865_v6 = vld [vmem:[#allocation11 + $0x18] sm:$0xff]  }
 0x4c5   : > { %1027 = vmax.xlane.f32.xlu0 %v1026_v7 }
 0x4c7   : > { %1030 = vmax.xlane.f32.xlu1 %v1029_v8 }
 0x4d8   : > { %1178 = vrot.lane.b32.xlu1 %v3705_v18, %s3305_s21 }
 0x4db   : > { %1046 = vrot.lane.b32.xlu0 %v3705_v18, %s3304_s29 }
 0x4dc   : > { %1310 = vrot.lane.b32.xlu1 %v3705_v18, %s3306_s22 }
 0x546   : > { %v1161_v9 = vpop.xlane.xlu0 %1160 }
 0x547   : > { %v1165_v10 = vsub.f32 %v1152_v46, %v1161_v9 }
 0x549   : > { %v1167_v11 = vmul.f32 1.442695, %v1165_v10 }
 0x54a   : > { %v1164_v12 = vpop.xlane.xlu0 %1163 }
 0x54b   : > { %2958 = vpow2.f32 %v1167_v11  ;;  %v1166_v13 = vsub.f32 %v1155_v51, %v1164_v12  ;;  %v2862_v51 = vld [vmem:[#allocation11] sm:$0xff]  }
 0x54c   : > { %2688 = vmatpush3.bf16.msra.mxu0 %v2862_v51  ;;  %v2866_v11 = vld [vmem:[#allocation11 + $0x20] sm:$0xff]  }
 0x54d   : > { %v1169_v14 = vmul.f32 1.442695, %v1166_v13  ;;  %2689 = vmatprep.subr.bf16.mxu0 %v3301_v0 }
 0x54e   : > { %v1293_v15 = vpop.xlane.xlu0 %1292 }
 0x54f   : > { %2960 = vpow2.f32 %v1169_v14  ;;  %v1297_v16 = vsub.f32 %v1284_v56, %v1293_v15  ;;  %v2867_v14 = vld [vmem:[#allocation11 + $0x28] sm:$0xff]  }
 0x550   : > { %v1296_v17 = vpop.xlane.xlu1 %1295  ;;  %2690 = vmatpush3.bf16.msra.mxu0 %v2863_v4  ;;  %v2879_v4 = vld [vmem:[#allocation12 + $0x28] ss:$16 sps:$4 sm:$0xff]  }
 0x551   : > { %v1299_v19 = vmul.f32 1.442695, %v1297_v16  ;;  %v1298_v20 = vsub.f32 %v1287_v2, %v1296_v17  ;;  %2691 = vmatprep.subr.bf16.mxu0 %v3301_v0  ;;  %v2868_v17 = vld [vmem:[#allocation11 + $0x30] sm:$0xff]  }
 0x552   : > { %v1028_v21 = vpop.xlane.xlu0 %1027 }
 0x553   : > { %v1301_v22 = vmul.f32 1.442695, %v1298_v20  ;;  %v1032_v23 = vsub.f32 %v1019_v57, %v1028_v21  ;;  %2962 = vpow2.f32 %v1299_v19 }
 0x554   : > { %v1031_v24 = vpop.xlane.xlu1 %1030  ;;  %2692 = vmatpush3.bf16.msra.mxu0 %v2864_v5  ;;  %v2884_v5 = vld [vmem:[#allocation12 + $0x44] ss:$16 sps:$4 sm:$0xff]  }
 0x555   : > { %v2959_v25 = vpop.eup %2958  ;;  %2964 = vpow2.f32 %v1301_v22  ;;  %v1034_v18 = vmul.f32 1.442695, %v1032_v23  ;;  %v1033_v27 = vsub.f32 %v1022_v3, %v1031_v24  ;;  %2693 = vmatprep.subr.bf16.mxu0 %v3301_v0 }
 0x556   : > { %v1047_v28 = vpop.permute.xlu0 %1046  ;;  %v1171_v29 = vsel %vm903_vm2, %v2959_v25, 0.0 }
 0x557   : > { %2966 = vpow2.f32 %v1034_v18  ;;  %v1036_v30 = vmul.f32 1.442695, %v1033_v27  ;;  %1172 = vadd.xlane.f32.xlu0 %v1171_v29  ;;  %2658 = vmatpush3.bf16.msra.mxu1 %v1047_v28 }
 0x558   : > { %2669 = vmatprep.subr.bf16.mxu1 %v3301_v0  ;;  %v1179_v44 = vpop.permute.xlu1 %1178  ;;  %2694 = vmatpush3.bf16.msra.mxu0 %v2865_v6  ;;  %v2887_v6 = vld [vmem:[#allocation12 + $0x4c] ss:$16 sps:$4 sm:$0xff]  }
 0x559   : > { %v2961_v31 = vpop.eup %2960  ;;  %2968 = vpow2.f32 %v1036_v30  ;;  %2695 = vmatprep.subr.bf16.mxu0 %v3301_v0 }
 0x55a   : > { %v1174_v32 = vsel %vm903_vm2, %v2961_v31, 0.0  ;;  %v1177_v33 = vpack.c.bf16 %v2961_v31, %v2959_v25  ;;  %v2869_v25 = vld [vmem:[#allocation11 + $0x38] sm:$0xff]  }
 0x55b   : > { %1175 = vadd.xlane.f32.xlu0 %v1174_v32 }
 0x55c   : > { %v1311_v50 = vpop.permute.xlu1 %1310  ;;  %2696 = vmatpush3.bf16.msra.mxu0 %v2866_v11  ;;  %v2896_v11 = vld [vmem:[#allocation12 + $0x84] ss:$16 sps:$4 sm:$0xff]  }
 0x55d   : > { %v2963_v34 = vpop.eup %2962  ;;  %2697 = vmatprep.subr.bf16.mxu0 %v3301_v0 }
 0x55e   : > { %v1303_v45 = vsel %vm903_vm2, %v2963_v34, 0.0 }
 0x55f   : > { %v2965_v35 = vpop.eup %2964 }
 0x560   : > { %v1309_v36 = vpack.c.bf16 %v2965_v35, %v2963_v34  ;;  %v1306_v46 = vsel %vm903_vm2, %v2965_v35, 0.0  ;;  %2698 = vmatpush3.bf16.msra.mxu0 %v2867_v14  ;;  %v2899_v14 = vld [vmem:[#allocation12 + $0x8c] ss:$16 sps:$4 sm:$0xff]  }
 0x561   : > { %v2967_v37 = vpop.eup %2966  ;;  %2699 = vmatprep.subr.bf16.mxu0 %v3301_v0 }
 0x562   : > { %v1038_v39 = vsel %vm903_vm2, %v2967_v37, 0.0 }
 0x563   : > { %v2969_v41 = vpop.eup %2968  ;;  %1039 = vadd.xlane.f32.xlu1 %v1038_v39 }
 0x564   : > { %v1041_v42 = vsel %vm903_vm2, %v2969_v41, 0.0  ;;  %v1044_v43 = vpack.c.bf16 %v2969_v41, %v2967_v37  ;;  %2700 = vmatpush3.bf16.msra.mxu0 %v2868_v17  ;;  %v2900_v17 = vld [vmem:[#allocation12 + $0xa0] ss:$16 sps:$4 sm:$0xff]  }
 0x565   : > { %1042 = vadd.xlane.f32.xlu0 %v1041_v42  ;;  %2701 = vmatprep.subr.bf16.mxu0 %v3301_v0 }
 0x566   : > { %2660 = vmatmul.mubr.msk.bf16.vlgmr.msra.gmra.mrb[16].mxu1 %vm903_vm2, %v1044_v43 }
 0x567   : > { %2670 = vmatpush3.bf16.msra.mxu1 %v1179_v44  ;;  %1304 = vadd.xlane.f32.xlu1 %v1303_v45  ;;  %v2458_v44 = vld [vmem:[%s3952_s6] ss:$0 sm:$0xff] }
 0x568   : > { %2671 = vmatprep.mubr.msk.bf16.mxu1 %vm3303_vm0, %v3301_v0  ;;  %2681 = vmatprep.subr.bf16.mxu1 %v3301_v0 }
 0x569   : > { %1307 = vadd.xlane.f32.xlu0 %v1306_v46  ;;  %2702 = vmatpush3.bf16.msra.mxu0 %v2869_v25  ;;  %v2917_v25 = vld [vmem:[#allocation12 + $0xec] ss:$16 sps:$4 sm:$0xff]  }
 0x56b   : > { %917 = vadd.xlane.f32.xlu1 %v916_v48 }
 0x56d   : > { %920 = vadd.xlane.f32.xlu0 %v919_v49 }
 0x56e   : > { %2672 = vmatmul.mubr.msk.bf16.vlgmr.msra.gmra.mrb[20].mxu1 %vm903_vm2, %v1177_v33 }
 0x56f   : > { %2682 = vmatpush3.bf16.msra.mxu1 %v1311_v50  ;;  %2683 = vmatprep.mubr.msk.bf16.mxu1 %vm3303_vm0, %v3301_v0  ;;  %v3006_v50 = vld [vmem:[%s3642_s30] sm:$0xff] }
 0x576   : > { %2684 = vmatmul.mubr.msk.bf16.vlgmr.msra.gmra.mrb[24].mxu1 %vm903_vm2, %v1309_v36 }
 0x577   : > { %1780 = vmatprep.mubr.bf16.mxu1 %v3302_v26 }
 0x5e4   : > { %v1173_v38 = vpop.xlane.xlu0 %1172 }
 0x5e8   : > { %v1176_v53 = vpop.xlane.xlu0 %1175 }
 0x5f0   : > { %v1040_v54 = vpop.xlane.xlu1 %1039 }
 0x5f2   : > { %v1043_v40 = vpop.xlane.xlu0 %1042 }
 0x5f4   : > { %v1305_v55 = vpop.xlane.xlu1 %1304 }
 0x5f6   : > { %v1308_v56 = vpop.xlane.xlu0 %1307 }
 0x5f8   : > { %v918_v57 = vpop.xlane.xlu1 %917 }
 0x5f9   : > { %2970 = vrcp.f32 %v918_v57  ;;  %v2875_v57 = vld [vmem:[#allocation12 + $0xc] ss:$16 sps:$4 sm:$0xff]  }
 0x5fa   : > { %v921_v61 = vpop.xlane.xlu0 %920  ;;  %1791 = vmatprep.subr.bf16.mxu0 %v2875_v57  ;;  %v2918_v57 = vld [vmem:[#allocation14 + $0x40] sm:$0xff]  }
 0x5fb   : > { %2972 = vrcp.f32 %v921_v61  ;;  %v2870_v61 = vld [vmem:[#allocation12] ss:$16 sps:$4 sm:$0xff]  }
 0x5fc   : > { %2974 = vrcp.f32 %v1040_v54  ;;  %v3007_v54 = vld [vmem:[%s3642_s30 + $0x8] sm:$0xff]  ;;  %s3990_s30 = sld [smem:[#allocation24_spill]] }
 0x5fd   : > { %2976 = vrcp.f32 %v1043_v40 }
 0x5fe   : > { %2978 = vrcp.f32 %v1173_v38 }
 0x5ff   : > { %2980 = vrcp.f32 %v1176_v53 }
 0x600   : > { %2982 = vrcp.f32 %v1305_v55 }
 0x601   : > { %2984 = vrcp.f32 %v1308_v56  ;;  %v2872_v56 = vld [vmem:[#allocation12 + $0x4] ss:$16 sps:$4 sm:$0xff]  }
 0x602   : > { %1748 = vmatprep.subr.bf16.mxu1 %v2872_v56 }
 0x603   : > { %v2971_v63 = vpop.eup %2970  ;;  %1749 = vmatpush1.bf16.msra.mxu1 %v2870_v61  ;;  %v2919_v61 = vld [vmem:[#allocation14 + $0xc0] sm:$0xff]  }
 0x604   : > { %v969_v1 = vmul.f32 %v2971_v63, %v3746_v47  ;;  %v2873_v63 = vld [vmem:[#allocation12 + $0x8] ss:$16 sps:$4 sm:$0xff]  }
 0x605   : > { %v2973_v2 = vpop.eup %2972 }
 0x606   : > { %971 = vst.msk [vmem:[#allocation2] sm:$0xff] %vm855_vm1, %v969_v1  ;;  %v970_v3 = vmul.f32 %v2973_v2, %v3749_v52  ;;  %v2975_v47 = vpop.eup %2974  ;;  %v2878_v1 = vld [vmem:[#allocation12 + $0x24] ss:$16 sps:$4 sm:$0xff]   ;;  %v2881_v2 = vld [vmem:[#allocation12 + $0x2c] ss:$16 sps:$4 sm:$0xff]  }
 0x607   : > { %v2977_v9 = vpop.eup %2976  ;;  %1750 = vmatprep.subr.bf16.mxu1 %v2878_v1  ;;  %v2921_v1 = vld [vmem:[#allocation14 + $0x80] sm:$0xff]  }
 0x608   : > { %972 = vst.msk [vmem:[#allocation2 + $0x8] sm:$0xff] %vm855_vm1, %v970_v3  ;;  %v2979_v15 = vpop.eup %2978  ;;  %v2876_v3 = vld [vmem:[#allocation12 + $0x20] ss:$16 sps:$4 sm:$0xff]  }
 0x609   : > { %v2981_v21 = vpop.eup %2980  ;;  %1751 = vmatpush1.bf16.msra.mxu1 %v2876_v3  ;;  %v2923_v3 = vld [vmem:[#allocation14 + $0xc8] sm:$0xff]  }
 0x60a   : > { %v2983_v18 = vpop.eup %2982  ;;  %1752 = vmatprep.subr.bf16.mxu1 %v2884_v5  ;;  %v2925_v5 = vld [vmem:[#allocation14 + $0x88] sm:$0xff]  }
 0x60b   : > { %v2985_v30 = vpop.eup %2984 }
 0x639   : > { %v1086_v7 = vpop.f32.mrb[16].mxu1 }
 0x63a   : > { %v1095_v8 = vmul.f32 %v2975_v47, %v1086_v7  ;;  %v2661_v52 = vpop.f32.mrb[17].mxu1  ;;  %v2882_v47 = vld [vmem:[#allocation12 + $0x40] ss:$16 sps:$4 sm:$0xff]   ;;  %v2885_v7 = vld [vmem:[#allocation12 + $0x48] ss:$16 sps:$4 sm:$0xff]  }
 0x63b   : > { %v1089_v10 = vpop.f32.mrb[18].mxu1  ;;  %1753 = vmatpush1.bf16.msra.mxu1 %v2882_v47  ;;  %v2893_v52 = vld [vmem:[#allocation12 + $0x6c] ss:$16 sps:$4 sm:$0xff]   ;;  %v2927_v47 = vld [vmem:[#allocation14 + $0xd0] sm:$0xff]  }
 0x63c   : > { %v1096_v12 = vmul.f32 %v2977_v9, %v1089_v10  ;;  %1099 = vrot.lane.b32.xlu1 %v1095_v8, %s3306_s22  ;;  %v2662_v13 = vpop.f32.mrb[19].mxu1  ;;  %v2890_v8 = vld [vmem:[#allocation12 + $0x64] ss:$16 sps:$4 sm:$0xff]   ;;  %v2888_v9 = vld [vmem:[#allocation12 + $0x60] ss:$16 sps:$4 sm:$0xff]  }
 0x63d   : > { %v2891_v10 = vld [vmem:[#allocation12 + $0x68] ss:$16 sps:$4 sm:$0xff]   ;;  %1754 = vmatprep.subr.bf16.mxu1 %v2890_v8  ;;  %v2929_v8 = vld [vmem:[#allocation14 + $0x90] sm:$0xff]  }
 0x63e   : > { %1101 = vrot.lane.b32.xlu0 %v1096_v12, %s3306_s22  ;;  %v2894_v12 = vld [vmem:[#allocation12 + $0x80] ss:$16 sps:$4 sm:$0xff]   ;;  %v2897_v13 = vld [vmem:[#allocation12 + $0x88] ss:$16 sps:$4 sm:$0xff]  }
 0x63f   : > { %1755 = vmatpush1.bf16.msra.mxu1 %v2888_v9  ;;  %v2931_v9 = vld [vmem:[#allocation14 + $0xd8] sm:$0xff]  }
 0x640   : > { %1756 = vmatprep.subr.bf16.mxu1 %v2896_v11  ;;  %v2933_v11 = vld [vmem:[#allocation14 + $0x98] sm:$0xff]  }
 0x641   : > { %v1218_v16 = vpop.f32.mrb[20].mxu1 }
 0x642   : > { %v1227_v19 = vmul.f32 %v2979_v15, %v1218_v16  ;;  %v2673_v20 = vpop.f32.mrb[21].mxu1  ;;  %v2902_v15 = vld [vmem:[#allocation12 + $0xa4] ss:$16 sps:$4 sm:$0xff]   ;;  %v2905_v16 = vld [vmem:[#allocation12 + $0xac] ss:$16 sps:$4 sm:$0xff]  }
 0x643   : > { %v1221_v22 = vpop.f32.mrb[22].mxu1  ;;  %1757 = vmatpush1.bf16.msra.mxu1 %v2894_v12  ;;  %v2908_v20 = vld [vmem:[#allocation12 + $0xc4] ss:$16 sps:$4 sm:$0xff]  }
 0x644   : > { %v1228_v23 = vmul.f32 %v2981_v21, %v1221_v22  ;;  %1231 = vrot.lane.b32.xlu1 %v1227_v19, %s3305_s21  ;;  %v2674_v24 = vpop.f32.mrb[23].mxu1  ;;  %v2903_v19 = vld [vmem:[#allocation12 + $0xa8] ss:$16 sps:$4 sm:$0xff]   ;;  %1758 = vmatprep.subr.bf16.mxu1 %v2902_v15  ;;  %v2911_v21 = vld [vmem:[#allocation12 + $0xcc] ss:$16 sps:$4 sm:$0xff]   ;;  %v2934_v12 = vld [vmem:[#allocation14 + $0x60] sm:$0xff]  }
 0x645   : > { %v2906_v22 = vld [vmem:[#allocation12 + $0xc0] ss:$16 sps:$4 sm:$0xff]   ;;  %v2914_v24 = vld [vmem:[#allocation12 + $0xe4] ss:$16 sps:$4 sm:$0xff]  }
 0x646   : > { %v2937_v15 = vld [vmem:[#allocation14 + $0xa0] sm:$0xff]  }
 0x647   : > { %1759 = vmatpush1.bf16.msra.mxu1 %v2900_v17  ;;  %v2939_v17 = vld [vmem:[#allocation14 + $0xe8] sm:$0xff]  }
 0x648   : > { %1233 = vrot.lane.b32.xlu1 %v1228_v23, %s3305_s21  ;;  %v2909_v23 = vld [vmem:[#allocation12 + $0xc8] ss:$16 sps:$4 sm:$0xff]   ;;  %1760 = vmatprep.subr.bf16.mxu1 %v2908_v20 }
 0x649   : > { %v1350_v27 = vpop.f32.mrb[24].mxu1  ;;  %v2941_v20 = vld [vmem:[#allocation14 + $0xa8] sm:$0xff]  }
 0x64a   : > { %v1359_v28 = vmul.f32 %v2983_v18, %v1350_v27  ;;  %v2685_v29 = vpop.f32.mrb[25].mxu1  ;;  %v2912_v18 = vld [vmem:[#allocation12 + $0xe0] ss:$16 sps:$4 sm:$0xff]   ;;  %v2915_v27 = vld [vmem:[#allocation12 + $0xe8] ss:$16 sps:$4 sm:$0xff]  }
 0x64b   : > { %v1353_v31 = vpop.f32.mrb[26].mxu1  ;;  %1761 = vmatpush1.bf16.msra.mxu1 %v2906_v22  ;;  %v2943_v22 = vld [vmem:[#allocation14 + $0xf0] sm:$0xff]  }
 0x64c   : > { %v1360_v32 = vmul.f32 %v2985_v30, %v1353_v31  ;;  %1363 = vrot.lane.b32.xlu1 %v1359_v28, %s3304_s29  ;;  %v2686_v33 = vpop.f32.mrb[27].mxu1  ;;  %1762 = vmatprep.subr.bf16.mxu1 %v2914_v24  ;;  %v2945_v24 = vld [vmem:[#allocation14 + $0xb0] sm:$0xff]  }
 0x64e   : > { %1365 = vrot.lane.b32.xlu0 %v1360_v32, %s3304_s29  ;;  %s3991_s29 = sld [smem:[#allocation25_spill]] }
 0x64f   : > { %1763 = vmatpush1.bf16.msra.mxu1 %v2912_v18  ;;  %v2947_v18 = vld [vmem:[#allocation14 + $0xf8] sm:$0xff]  }
 0x650   : > { %2575 = vmatprep.subr.bf16.mxu1 %v2918_v57 }
 0x6ae   : > { %v1100_v34 = vpop.permute.xlu1 %1099 }
 0x6af   : > { %1106 = vst.msk [vmem:[#allocation2] sm:$0xff] %vm1105_vm3, %v1100_v34 }
 0x6b0   : > { %v1102_v35 = vpop.permute.xlu0 %1101 }
 0x6b1   : > { %1107 = vst.msk [vmem:[#allocation2 + $0x8] sm:$0xff] %vm1105_vm3, %v1102_v35 }
 0x6b6   : > { %v1232_v0 = vpop.permute.xlu1 %1231 }
 0x6b7   : > { %1238 = vst.msk [vmem:[#allocation2] sm:$0xff] %vm1237_vm4, %v1232_v0 }
 0x6ba   : > { %v1234_v36 = vpop.permute.xlu1 %1233 }
 0x6bb   : > { %1239 = vst.msk [vmem:[#allocation2 + $0x8] sm:$0xff] %vm1237_vm4, %v1234_v36 }
 0x6be   : > { %v1364_v37 = vpop.permute.xlu1 %1363 }
 0x6bf   : > { %1370 = vst.msk [vmem:[#allocation2] sm:$0xff] %vm1369_vm5, %v1364_v37 }
 0x6c0   : > { %v1366_v39 = vpop.permute.xlu0 %1365 }
 0x6c1   : > { %1371 = vst.msk [vmem:[#allocation2 + $0x8] sm:$0xff] %vm1369_vm5, %v1366_v39 }
 0x6c6   : > { %v1372_v41 = vld [vmem:[#allocation2] sm:$0xff] }
 0x6c8   : > { %v1373_v42 = vld [vmem:[#allocation2 + $0x8] sm:$0xff] }
 0x6c9   : > { %v1374_v43 = vpack.c.bf16 %v1373_v42, %v1372_v41 }
 0x6cb   : > { %2704 = vmatmul.mubr.bf16.vlgmr.msra.gmra.mrb[12].mxu0 %v1374_v43 }
 0x6cc   : > { %1823 = vmatprep.mubr.bf16.mxu0 %v3302_v26  ;;  %1792 = vmatpush1.bf16.msra.mxu0 %v2873_v63  ;;  %v2920_v63 = vld [vmem:[#allocation14] sm:$0xff]  }
 0x6cd   : > { %1793 = vmatprep.subr.bf16.mxu0 %v2881_v2  ;;  %v2922_v2 = vld [vmem:[#allocation14 + $0x48] sm:$0xff]  }
 0x6d0   : > { %1794 = vmatpush1.bf16.msra.mxu0 %v2879_v4  ;;  %v2924_v4 = vld [vmem:[#allocation14 + $0x8] sm:$0xff]  }
 0x6d1   : > { %1795 = vmatprep.subr.bf16.mxu0 %v2887_v6  ;;  %v2926_v6 = vld [vmem:[#allocation14 + $0x50] sm:$0xff]  }
 0x6d4   : > { %1796 = vmatpush1.bf16.msra.mxu0 %v2885_v7  ;;  %v2928_v7 = vld [vmem:[#allocation14 + $0x10] sm:$0xff]  }
 0x6d5   : > { %1797 = vmatprep.subr.bf16.mxu0 %v2893_v52  ;;  %v2930_v52 = vld [vmem:[#allocation14 + $0x58] sm:$0xff]  }
 0x6d8   : > { %1798 = vmatpush1.bf16.msra.mxu0 %v2891_v10  ;;  %v2932_v10 = vld [vmem:[#allocation14 + $0x18] sm:$0xff]  }
 0x6d9   : > { %1799 = vmatprep.subr.bf16.mxu0 %v2899_v14  ;;  %v2936_v14 = vld [vmem:[#allocation14 + $0x20] sm:$0xff]  }
 0x6dc   : > { %1800 = vmatpush1.bf16.msra.mxu0 %v2897_v13  ;;  %v2935_v13 = vld [vmem:[#allocation14 + $0xe0] sm:$0xff]  }
 0x6dd   : > { %1801 = vmatprep.subr.bf16.mxu0 %v2905_v16  ;;  %v2938_v16 = vld [vmem:[#allocation14 + $0x68] sm:$0xff]  }
 0x6e0   : > { %1802 = vmatpush1.bf16.msra.mxu0 %v2903_v19  ;;  %v2940_v19 = vld [vmem:[#allocation14 + $0x28] sm:$0xff]  }
 0x6e1   : > { %1803 = vmatprep.subr.bf16.mxu0 %v2911_v21  ;;  %v2942_v21 = vld [vmem:[#allocation14 + $0x70] sm:$0xff]  }
 0x6e4   : > { %1804 = vmatpush1.bf16.msra.mxu0 %v2909_v23  ;;  %v2944_v23 = vld [vmem:[#allocation14 + $0x30] sm:$0xff]  }
 0x6e5   : > { %1805 = vmatprep.subr.bf16.mxu0 %v2917_v25  ;;  %v2946_v25 = vld [vmem:[#allocation14 + $0x78] sm:$0xff]  }
 0x6e8   : > { %1806 = vmatpush1.bf16.msra.mxu0 %v2915_v27  ;;  %v2948_v27 = vld [vmem:[#allocation14 + $0x38] sm:$0xff]  }
 0x6e9   : > { %2597 = vmatprep.subr.bf16.mxu0 %v2919_v61 }
 0x79e   : > { %v1480_v45 = vpop.f32.mrb[12].mxu0 }
 0x79f   : > { %v1481_v46 = vadd.f32 %v2458_v44, %v1480_v45  ;;  %v2705_v48 = vpop.f32.mrb[13].mxu0 }
 0x7a0   : > { %v1483_v49 = vpop.f32.mrb[14].mxu0 }
 0x7a1   : > { %v3804_v51 = vadd.f32 %v3006_v50, %v1481_v46  ;;  %v1484_v38 = vadd.f32 %v2458_v44, %v1483_v49  ;;  %v2706_v53 = vpop.f32.mrb[15].mxu0  ;;  %v2467_v46 = vld [vmem:[%s3989_s17] ss:$0 sm:$0xff] }
 0x7a2   : > { %v2468_v53 = vld [vmem:[%s3990_s30] ss:$0 sm:$0xff]  ;;  %s3901_s30 = scalar_lea.hbm %s3993_s13, %s2540_s20 }
 0x7a3   : > { %v3807_v40 = vadd.f32 %v3007_v54, %v1484_v38  ;;  %1491 = vadd.xlane.f32.xlu1 %v3804_v51  ;;  %v1497_v26 = vmul.f32 %v3804_v51, %v3804_v51 }
 0x7a5   : > { %1493 = vadd.xlane.f32.xlu0 %v3807_v40  ;;  %v1498_v55 = vmul.f32 %v3807_v40, %v3807_v40 }
 0x7a9   : > { %1499 = vadd.xlane.f32.xlu0 %v1497_v26 }
 0x7ad   : > { %1501 = vadd.xlane.f32.xlu0 %v1498_v55 }
 0x830   : > { %v1492_v28 = vpop.xlane.xlu1 %1491 }
 0x831   : > { %v1495_v30 = vmul.f32 0.0078125, %v1492_v28  ;;  %v2949_v28 = vld [vmem:[#allocation14 + $0xb8] sm:$0xff]  }
 0x832   : > { %v1494_v29 = vpop.xlane.xlu0 %1493 }
 0x833   : > { %v1505_v32 = vmul.f32 %v1495_v30, %v1495_v30  ;;  %v1496_v33 = vmul.f32 0.0078125, %v1494_v29  ;;  %v1509_v43 = vsub.f32 %v3804_v51, %v1495_v30  ;;  %v1566_v29 = vld [vmem:[%s3991_s29] sm:$0xf]  ;;  %v1582_v30 = vsub.s32 3, %v3691_v58  ;;  %s3212_s29 = scalar_lea.vmem %s3211_s24, 512 }
 0x834   : > { %p3214_p3 = scmp.lt.s32.totalorder %s3212_s29, %s3206_s15 }
 0x835   : > { %v1506_v36 = vmul.f32 %v1496_v33, %v1496_v33  ;;  %v1510_v48 = vsub.f32 %v3807_v40, %v1496_v33  ;;  %v1575_v33 = vrot.slane %v1566_v29, %v631_v62 }
 0x836   : > { %v1500_v31 = vpop.xlane.xlu0 %1499  ;;  %p3215_p2 = por %p3214_p3, %p3213_p1 }
 0x837   : > { %v1503_v34 = vmul.f32 0.0078125, %v1500_v31  ;;  %v1571_v31 = vrot.slane %v1566_v29, %v627_v59 }
 0x838   : > { %p3216_p8 = pnand %p3215_p2, %p3209_p13 }
 0x839   : > { %v1507_v35 = vsub.f32 %v1503_v34, %v1505_v32  ;;  %v1579_v32 = vrot.slane %v1566_v29, %v635_v60  ;;  %v1583_v34 = vrot.slane %v1566_v29, %v1582_v30 }
 0x83a   : > { %v1502_v0 = vpop.xlane.xlu0 %1501 }
 0x83b   : > { %v1511_v37 = vadd.f32 1e-05, %v1507_v35  ;;  %v1504_v39 = vmul.f32 0.0078125, %v1502_v0 }
 0x83d   : > { %2986 = vrsqrt.f32 %v1511_v37  ;;  %v1508_v41 = vsub.f32 %v1504_v39, %v1506_v36 }
 0x83f   : > { %v1512_v42 = vadd.f32 1e-05, %v1508_v41 }
 0x841   : > { %2988 = vrsqrt.f32 %v1512_v42 }
 0x847   : > { %v2987_v44 = vpop.eup %2986 }
 0x848   : > { %v1515_v45 = vmul.f32 %v2987_v44, %v1509_v43 }
 0x84a   : > { %v1523_v38 = vmul.f32 %v2467_v46, %v1515_v45 }
 0x84b   : > { %v2989_v49 = vpop.eup %2988 }
 0x84c   : > { %v1516_v50 = vmul.f32 %v2989_v49, %v1510_v48  ;;  %v1531_v26 = vadd.f32 %v2468_v53, %v1523_v38 }
 0x84e   : > { %v1524_v54 = vmul.f32 %v2467_v46, %v1516_v50 }
 0x850   : > { %v1532_v55 = vadd.f32 %v2468_v53, %v1524_v54 }
 0x852   : > { %v1533_v56 = vpack.c.bf16 %v1532_v55, %v1531_v26 }
 0x854   : > { %1781 = vmatmul.mubr.bf16.vlgmr.msra.gmra.mrb[28].mxu1 %v1533_v56  ;;  %1824 = vmatmul.mubr.bf16.vlgmr.msra.gmra.mrb[16].mxu0 %v1533_v56 }
 0x855   : > { %2576 = vmatpush3.bf16.msra.mxu1 %v2920_v63  ;;  %2598 = vmatpush3.bf16.msra.mxu0 %v2921_v1 }
 0x856   : > { %2577 = vmatprep.subr.bf16.mxu1 %v2922_v2  ;;  %2599 = vmatprep.subr.bf16.mxu0 %v2923_v3 }
 0x859   : > { %2578 = vmatpush3.bf16.msra.mxu1 %v2924_v4  ;;  %2600 = vmatpush3.bf16.msra.mxu0 %v2925_v5 }
 0x85a   : > { %2579 = vmatprep.subr.bf16.mxu1 %v2926_v6  ;;  %2601 = vmatprep.subr.bf16.mxu0 %v2927_v47 }
 0x85d   : > { %2580 = vmatpush3.bf16.msra.mxu1 %v2928_v7  ;;  %2602 = vmatpush3.bf16.msra.mxu0 %v2929_v8 }
 0x85e   : > { %2581 = vmatprep.subr.bf16.mxu1 %v2930_v52  ;;  %2603 = vmatprep.subr.bf16.mxu0 %v2931_v9 }
 0x861   : > { %2582 = vmatpush3.bf16.msra.mxu1 %v2932_v10  ;;  %2604 = vmatpush3.bf16.msra.mxu0 %v2933_v11 }
 0x862   : > { %2583 = vmatprep.subr.bf16.mxu1 %v2934_v12  ;;  %2605 = vmatprep.subr.bf16.mxu0 %v2935_v13 }
 0x865   : > { %2584 = vmatpush3.bf16.msra.mxu1 %v2936_v14  ;;  %2606 = vmatpush3.bf16.msra.mxu0 %v2937_v15 }
 0x866   : > { %2585 = vmatprep.subr.bf16.mxu1 %v2938_v16  ;;  %2607 = vmatprep.subr.bf16.mxu0 %v2939_v17 }
 0x869   : > { %2586 = vmatpush3.bf16.msra.mxu1 %v2940_v19  ;;  %2608 = vmatpush3.bf16.msra.mxu0 %v2941_v20 }
 0x86a   : > { %2587 = vmatprep.subr.bf16.mxu1 %v2942_v21  ;;  %2609 = vmatprep.subr.bf16.mxu0 %v2943_v22 }
 0x86d   : > { %2588 = vmatpush3.bf16.msra.mxu1 %v2944_v23  ;;  %2610 = vmatpush3.bf16.msra.mxu0 %v2945_v24 }
 0x86e   : > { %2589 = vmatprep.subr.bf16.mxu1 %v2946_v25  ;;  %2611 = vmatprep.subr.bf16.mxu0 %v2947_v18 }
 0x871   : > { %2590 = vmatpush3.bf16.msra.mxu1 %v2948_v27  ;;  %2612 = vmatpush3.bf16.msra.mxu0 %v2949_v28 }
 0x927   : > { %v1782_v35 = vpop.f32.mrb[28].mxu1  ;;  %v1825_v0 = vpop.f32.mrb[16].mxu0 }
 0x928   : > { %v3833_v36 = vadd.f32 %v1782_v35, %v1571_v31  ;;  %v3835_v37 = vadd.f32 %v1825_v0, %v1579_v32  ;;  %v1784_v39 = vpop.f32.mrb[29].mxu1  ;;  %v1827_v41 = vpop.f32.mrb[17].mxu0 }
 0x929   : > { %v3837_v42 = vadd.f32 %v1784_v39, %v1575_v33  ;;  %v3839_v43 = vadd.f32 %v1827_v41, %v1583_v34  ;;  %v1786_v59 = vpop.f32.mrb[30].mxu1  ;;  %v1829_v44 = vpop.f32.mrb[18].mxu0 }
 0x92a   : > { %v1834_v60 = vmul.f32 %v3833_v36, %v3833_v36  ;;  %v1836_v58 = vmul.f32 %v3835_v37, %v3835_v37  ;;  %v3845_v62 = vadd.f32 %v1786_v59, %v1571_v31  ;;  %v3847_v45 = vadd.f32 %v1829_v44, %v1579_v32  ;;  %v1788_v46 = vpop.f32.mrb[31].mxu1  ;;  %v1831_v48 = vpop.f32.mrb[19].mxu0 }
 0x92b   : > { %v1835_v49 = vmul.f32 %v3837_v42, %v3837_v42  ;;  %v1837_v50 = vmul.f32 %v3839_v43, %v3839_v43  ;;  %v3853_v38 = vadd.f32 %v1788_v46, %v1575_v33  ;;  %v3855_v53 = vadd.f32 %v1831_v48, %v1583_v34 }
 0x92c   : > { %v1842_v54 = vmul.f32 %v1834_v60, %v3833_v36  ;;  %v1844_v26 = vmul.f32 %v1836_v58, %v3835_v37  ;;  %v1838_v55 = vmul.f32 %v3845_v62, %v3845_v62  ;;  %v1840_v56 = vmul.f32 %v3847_v45, %v3847_v45 }
 0x92d   : > { %v1843_v57 = vmul.f32 %v1835_v49, %v3837_v42  ;;  %v1845_v61 = vmul.f32 %v1837_v50, %v3839_v43  ;;  %v1839_v63 = vmul.f32 %v3853_v38, %v3853_v38  ;;  %v1841_v1 = vmul.f32 %v3855_v53, %v3855_v53 }
 0x92e   : > { %v1850_v2 = vmul.f32 0.044715, %v1842_v54  ;;  %v1852_v3 = vmul.f32 0.044715, %v1844_v26  ;;  %v1846_v4 = vmul.f32 %v1838_v55, %v3845_v62  ;;  %v1848_v5 = vmul.f32 %v1840_v56, %v3847_v45 }
 0x92f   : > { %v1851_v6 = vmul.f32 0.044715, %v1843_v57  ;;  %v1853_v47 = vmul.f32 0.044715, %v1845_v61  ;;  %v1847_v7 = vmul.f32 %v1839_v63, %v3853_v38  ;;  %v1849_v8 = vmul.f32 %v1841_v1, %v3855_v53 }
 0x930   : > { %v1858_v52 = vadd.f32 %v1850_v2, %v3833_v36  ;;  %v1860_v9 = vadd.f32 %v1852_v3, %v3835_v37  ;;  %v1854_v10 = vmul.f32 0.044715, %v1846_v4  ;;  %v1856_v11 = vmul.f32 0.044715, %v1848_v5 }
 0x931   : > { %v1859_v12 = vadd.f32 %v1851_v6, %v3837_v42  ;;  %v1861_v13 = vadd.f32 %v1853_v47, %v3839_v43  ;;  %v1855_v14 = vmul.f32 0.044715, %v1847_v7  ;;  %v1857_v15 = vmul.f32 0.044715, %v1849_v8 }
 0x932   : > { %v1866_v16 = vmul.f32 0.7978846, %v1858_v52  ;;  %v1868_v17 = vmul.f32 0.7978846, %v1860_v9  ;;  %v1862_v19 = vadd.f32 %v1854_v10, %v3845_v62  ;;  %v1864_v20 = vadd.f32 %v1856_v11, %v3847_v45 }
 0x933   : > { %v1867_v21 = vmul.f32 0.7978846, %v1859_v12  ;;  %v1869_v22 = vmul.f32 0.7978846, %v1861_v13  ;;  %v1863_v23 = vadd.f32 %v1855_v14, %v3853_v38  ;;  %v1865_v24 = vadd.f32 %v1857_v15, %v3855_v53 }
 0x934   : > { %2990 = vtanh.f32 %v1866_v16  ;;  %v1870_v25 = vmul.f32 0.7978846, %v1862_v19  ;;  %v1872_v18 = vmul.f32 0.7978846, %v1864_v20 }
 0x935   : > { %2992 = vtanh.f32 %v1868_v17  ;;  %v1871_v27 = vmul.f32 0.7978846, %v1863_v23  ;;  %v1873_v28 = vmul.f32 0.7978846, %v1865_v24 }
 0x936   : > { %2994 = vtanh.f32 %v1867_v21 }
 0x937   : > { %2996 = vtanh.f32 %v1869_v22 }
 0x938   : > { %2998 = vtanh.f32 %v1870_v25 }
 0x939   : > { %3000 = vtanh.f32 %v1872_v18 }
 0x93a   : > { %3002 = vtanh.f32 %v1871_v27 }
 0x93b   : > { %3004 = vtanh.f32 %v1873_v28 }
 0x93e   : > { %v2991_v29 = vpop.eup %2990 }
 0x93f   : > { %v2993_v30 = vpop.eup %2992  ;;  %v1882_v31 = vadd.f32 1.0, %v2991_v29 }
 0x940   : > { %v2995_v32 = vpop.eup %2994  ;;  %v1884_v33 = vadd.f32 1.0, %v2993_v30 }
 0x941   : > { %v2997_v34 = vpop.eup %2996  ;;  %v1883_v35 = vadd.f32 1.0, %v2995_v32  ;;  %v1890_v59 = vmul.f32 0.5, %v1882_v31 }
 0x942   : > { %v2999_v0 = vpop.eup %2998  ;;  %v1885_v39 = vadd.f32 1.0, %v2997_v34  ;;  %v1892_v58 = vmul.f32 0.5, %v1884_v33 }
 0x943   : > { %v3001_v41 = vpop.eup %3000  ;;  %v1886_v44 = vadd.f32 1.0, %v2999_v0  ;;  %v1891_v54 = vmul.f32 0.5, %v1883_v35  ;;  %v1898_v57 = vmul.f32 %v1890_v59, %v3833_v36 }
 0x944   : > { %v3003_v60 = vpop.eup %3002  ;;  %v1888_v46 = vadd.f32 1.0, %v3001_v41  ;;  %v1893_v56 = vmul.f32 0.5, %v1885_v39  ;;  %v1900_v1 = vmul.f32 %v1892_v58, %v3835_v37 }
 0x945   : > { %v3005_v48 = vpop.eup %3004  ;;  %v1894_v49 = vmul.f32 0.5, %v1886_v44  ;;  %v1887_v50 = vadd.f32 1.0, %v3003_v60  ;;  %v1899_v4 = vmul.f32 %v1891_v54, %v3837_v42  ;;  %v2501_v42 = vld [vmem:[%s3992_s16] ss:$0 sm:$0xff] }
 0x946   : > { %v1896_v26 = vmul.f32 0.5, %v1888_v46  ;;  %v1889_v55 = vadd.f32 1.0, %v3005_v48  ;;  %v1901_v47 = vmul.f32 %v1893_v56, %v3839_v43 }
 0x947   : > { %v1902_v61 = vmul.f32 %v1894_v49, %v3845_v62  ;;  %v1895_v63 = vmul.f32 0.5, %v1887_v50 }
 0x948   : > { %v1904_v2 = vmul.f32 %v1896_v26, %v3847_v45  ;;  %v1897_v3 = vmul.f32 0.5, %v1889_v55 }
 0x949   : > { %v1903_v5 = vmul.f32 %v1895_v63, %v3853_v38  ;;  %v1906_v6 = vpack.c.bf16 %v1902_v61, %v1898_v57 }
 0x94a   : > { %v1905_v7 = vmul.f32 %v1897_v3, %v3855_v53  ;;  %v1908_v8 = vpack.c.bf16 %v1904_v2, %v1900_v1 }
 0x94b   : > { %v1907_v52 = vpack.c.bf16 %v1903_v5, %v1899_v4 }
 0x94c   : > { %v1909_v36 = vpack.c.bf16 %v1905_v7, %v1901_v47 }
 0x94d   : > { %2205 = vmatprep.mubr.bf16.mxu1 %v1907_v52 }
 0x94e   : > { %2246 = vmatprep.mubr.bf16.mxu0 %v1909_v36  ;;  %2206 = vmatmul.mubr.bf16.vlgmr.msra.gmra.mrb[32].mxu1 %v1906_v6 }
 0x94f   : > { %2247 = vmatmul.mubr.bf16.vlgmr.msra.gmra.mrb[20].mxu0 %v1908_v8 }
 0xa21   : > { %v2591_v37 = vpop.f32.mrb[32].mxu1 }
 0xa22   : > { %v2613_v62 = vpop.f32.mrb[20].mxu0  ;;  %v2592_v45 = vpop.f32.mrb[33].mxu1 }
 0xa23   : > { %v2593_v38 = vadd.f32 %v2592_v45, %v2591_v37  ;;  %v2614_v43 = vpop.f32.mrb[21].mxu0  ;;  %v2594_v9 = vpop.f32.mrb[34].mxu1 }
 0xa24   : > { %v2615_v53 = vadd.f32 %v2614_v43, %v2613_v62  ;;  %v2616_v10 = vpop.f32.mrb[22].mxu0  ;;  %v2595_v11 = vpop.f32.mrb[35].mxu1 }
 0xa25   : > { %v2208_v12 = vadd.f32 %v2593_v38, %v2501_v42  ;;  %v2596_v13 = vadd.f32 %v2595_v11, %v2594_v9  ;;  %v2617_v14 = vpop.f32.mrb[23].mxu0 }
 0xa26   : > { %v2618_v15 = vadd.f32 %v2617_v14, %v2616_v10 }
 0xa27   : > { %v2249_v16 = vadd.f32 %v2615_v53, %v2208_v12  ;;  %v2211_v17 = vadd.f32 %v2596_v13, %v2501_v42 }
 0xa29   : > { %v2255_v19 = vadd.f32 %v2249_v16, %v3804_v51  ;;  %v2252_v20 = vadd.f32 %v2618_v15, %v2211_v17 }
 0xa2b   : > { %2257 = vst [vmem:[%s541_s23] sm:$0xff] %v2255_v19  ;;  %v2256_v21 = vadd.f32 %v2252_v20, %v3807_v40 }
 0xa2d   : > { %2258 = vst [vmem:[%s541_s23 + $0x8] sm:$0xff] %v2256_v21 }
 0xa2e   : > { %3219 = shalt.err (!%p3216_p8)
}
 0xa2f   : > { %s3220_s21 = scalar_lea.hbm %s3901_s30, 256  ;;  %s3224_s23 = scalar_lea.hbm %s3993_s13, 512 }
 0xa30   : > { %p3221_p10 = scmp.ne.s32.totalorder %s3901_s30, %s3220_s21  ;;  %p3225_p0 = scmp.lt.u32.totalorder %s3901_s30, %s3993_s13 }
 0xa31   : > { %p3226_p5 = scmp.lt.u32.totalorder %s3224_s23, %s3220_s21  ;;  %p3228_p6 = scmp.lt.u32.totalorder %s3220_s21, %s3901_s30 }
 0xa32   : > { %p3222_p11 = pnand %p3221_p10, %p3994_p9 }
 0xa33   : > { %p3227_p7 = por %p3226_p5, %p3225_p0 }
 0xa34   : > { %p3223_p12 = pneg %p3222_p11 }
 0xa35   : > { %p3229_p4 = por %p3228_p6, %p3227_p7 }
 0xa37   : > { %p3230_p13 = pnand %p3229_p4, %p3223_p12 }
 0xa39   : > { %3233 = shalt.err (!%p3230_p13)
}
 0xa3a   : > { %s3308_s8 = smov 128   ;;  %s3309_s15 = smov 8  }
 0xa3b   : > { %2733 = dma.vmem_to_hbm [thread:$0]  (%p3994_p9), %s3896_s19, 256, %s3901_s30, %s2260_s12, %s3308_s8, %s3308_s8, %s3309_s15  }
 0xa3c PF: > { %s2288_s14 = sand.u32 1, %s3272_s25   ;;  %p3995_p1 = scmp.ne.s32.totalorder %s3980_s7, 0 }
 0xa3d   : > { %p3996_p3 = scmp.ge.s32.totalorder %s3284_s28, 2  ;;  %s2289_s24 = scalar_lea.sflag [#allocation5], %s2288_s14 }
 0xa3f   : > { %p2759_p2 = pnand %p3996_p3, %p3995_p1 }
 0xa41   : > { %3267 = dma.done.wait (!%p2759_p2), %s2289_s24, 256  }
 0xa42   : > { %3269 = vsyncadd (!%p2759_p2), %s2289_s24, 4294967040  ;;  %p29_p8 = scmp.ge.s32.totalorder %s3557_s18, 4   ;;  %s3997_s25 = smov %s3276_s26 }
 0xa43   : > { %s3998_s26 = smov %s3280_s27  ;;  %s3999_s27 = smov %s3568_s10 }
 0xa44   : > { %s4000_s28 = smov %s3557_s18  ;;  %31 = sbr.rel (!%p29_p8) target bundleno = 16 (0x10), region = 141 }
 0xa4b   :  { %2294 = vsyncpa [#allocation4], 1 }
 0xa4c   :  { %2296 = vsyncpa [#allocation4 + $0x1], 1 }
 0xa4d   :  { %2297 = vsyncpa [#allocation7], 1 }
 0xa4e   :  { %2298 = vsyncpa [#allocation10], 1 }
 0xa4f   :  { %2299 = vsyncpa [#allocation13], 1 }
 0xa50   :  { %2300 = vsyncpa [#allocation5], 1 }
 0xa51   :  { %2302 = vsyncpa [#allocation5 + $0x1], 1 }

// kernel: tpu_custom_call.1
= control target key start
LH: loop header
LB: loop body
LE: loop exit
PB: predicated region body
PF: predicated region fallthrough
CT: control target
= control target key end

     0   :  { %s3946_s0 = inlined_call_operand.hbm [shape: f32[2,16,128], index: 0, kind: input, shape index: {}]   ;;  %s3947_s1 = inlined_call_operand.hbm [shape: f32[1,128], index: 1, kind: input, shape index: {}]   ;;  %s3948_s2 = inlined_call_operand.hbm [shape: f32[1,128], index: 2, kind: input, shape index: {}]   ;;  %s3949_s3 = inlined_call_operand.hbm [shape: bf16[128,384], index: 3, kind: input, shape index: {}]   ;;  %s3950_s4 = inlined_call_operand.vmem [shape: f32[1,384], index: 4, kind: input, shape index: {}]   ;;  %s3951_s5 = inlined_call_operand.hbm [shape: bf16[128,128], index: 5, kind: input, shape index: {}]   ;;  %s3952_s6 = inlined_call_operand.vmem [shape: f32[1,128], index: 6, kind: input, shape index: {}]   ;;  %s3953_s7 = inlined_call_operand.vmem [shape: f32[1,128], index: 7, kind: input, shape index: {}]   ;;  %s3954_s8 = inlined_call_operand.vmem [shape: f32[1,128], index: 8, kind: input, shape index: {}]   ;;  %s3955_s9 = inlined_call_operand.hbm [shape: bf16[128,512], index: 9, kind: input, shape index: {}]   ;;  %s3956_s10 = inlined_call_operand.vmem [shape: f32[1,512], index: 10, kind: input, shape index: {}]   ;;  %s3957_s11 = inlined_call_operand.hbm [shape: bf16[512,128], index: 11, kind: input, shape index: {}]   ;;  %s3958_s12 = inlined_call_operand.vmem [shape: f32[1,128], index: 12, kind: input, shape index: {}]   ;;  %s3959_s13 = inlined_call_operand.hbm [shape: f32[2,16,128], index: 13, kind: output, shape index: {}]  }
   0x1   :  { %3964 = sst [smem:[#allocation21_spill]] %s3947_s1 }
   0x2   :  { %3965 = sst [smem:[#allocation22_spill]] %s3949_s3 }
   0x3   :  { %3966 = sst [smem:[#allocation23_spill]] %s3953_s7 }
   0x4   :  { %3967 = sst [smem:[#allocation24_spill]] %s3954_s8 }
   0x5   :  { %3968 = sst [smem:[#allocation25_spill]] %s3956_s10 }
   0x6   :  { %3969 = sst [smem:[#allocation26_spill]] %s3958_s12 }
   0x7   :  { %3970 = sst [smem:[#allocation27_spill]] %s3959_s13 }
   0x8   :  { %18 = vsyncpa [#allocation4], 0 }
   0x9   :  { %20 = vsyncpa [#allocation4 + $0x1], 0 }
   0xa   :  { %21 = vsyncpa [#allocation7], 0 }
   0xb   :  { %22 = vsyncpa [#allocation10], 0 }
   0xc   :  { %23 = vsyncpa [#allocation13], 0 }
   0xd   :  { %24 = vsyncpa [#allocation5], 0 }
   0xe   :  { %26 = vsyncpa [#allocation5 + $0x1], 0  ;;  %s3380_s25 = smov 0   ;;  %s3382_s26 = smov 0  }
   0xf   :  { %s3384_s27 = smov 0   ;;  %s3386_s28 = smov 0  }
  0x10 LB: > { %s3286_s29 = smov [#allocation6]   ;;  %s3401_s14 = sadd.s32 4294967295, %s3284_s28   ;;  %s3284_s28 = sphi %s3386_s28, %s4000_s28   ;;  %s3280_s27 = sphi %s3384_s27, %s3999_s27   ;;  %s3276_s26 = sphi %s3382_s26, %s3998_s26   ;;  %s3272_s25 = sphi %s3380_s25, %s3997_s25  }
  0x11   : > { %s354_s30 = sshll.u32 %s3286_s29, 4  ;;  %p2404_p0 = scmp.ge.s32.totalorder %s3284_s28, 1  ;;  %s3406_s30 = int_to_ptr.vmem [resolvable:$true] %s354_s30 }
  0x12   : > { %p3961_p1 = scmp.eq.s32.totalorder %s3401_s14, 0  ;;  %p341_p2 = scmp.lt.s32.totalorder %s3284_s28, 3 }
  0x13   : > { %s3287_s16 = smov [#allocation9]   ;;  %s3288_s19 = smov [#allocation12]  }
  0x14   : > { %p3408_p3 = pnand %p2404_p0, %p341_p2  ;;  %s375_s17 = sshll.u32 %s3287_s16, 4  ;;  %s3415_s17 = int_to_ptr.vmem [resolvable:$true] %s375_s17 }
  0x15   : > { %s413_s20 = sshll.u32 %s3288_s19, 4  ;;  %s3973_s1 = sld [smem:[#allocation21_spill]]  ;;  %s3423_s20 = int_to_ptr.vmem [resolvable:$true] %s413_s20 }
  0x16   : > { %s3971_s15 = scalar_select %p3408_p3, 1, 0 }
  0x17   : > { %p2735_p5 = pneg %p3408_p3 }
  0x19   : > { %p3419_p6 = pnand %p2735_p5, %p3961_p1 }
  0x1b   : > { %s3008_s23 = scalar_lea.hbm %s3973_s1, 16  ;;  %p3433_p8 = pneg %p3419_p6 }
  0x1c   : > { %p3009_p7 = scmp.ne.s32.totalorder %s3973_s1, %s3008_s23  ;;  %p3015_p11 = scmp.lt.u32.totalorder %s3008_s23, %s3973_s1 }
  0x1e   : > { %p3011_p9 = pnand %p3433_p8, %p3009_p7 }
  0x20   : > { %p3012_p10 = pneg %p3011_p9 }
  0x22   : > { %p3017_p12 = pnand %p3015_p11, %p3012_p10 }
  0x24   : > { %3020 = shalt.err (!%p3017_p12)
}
  0x25   : > { %s3021_s21 = scalar_lea.vmem %s3406_s30, 16  ;;  %s3028_s22 = scalar_lea.vmem %s3406_s30, 32 }
  0x26   : > { %p3022_p13 = scmp.ne.s32.totalorder %s3406_s30, %s3021_s21  ;;  %p3029_p5 = scmp.lt.s32.totalorder %s3406_s30, %s3406_s30 }
  0x27   : > { %p3030_p7 = scmp.lt.s32.totalorder %s3028_s22, %s3021_s21 }
  0x28   : > { %p3024_p0 = pnand %p3022_p13, %p3433_p8 }
  0x29   : > { %p3031_p9 = por %p3030_p7, %p3029_p5 }
  0x2a   : > { %p3025_p2 = pneg %p3024_p0 }
  0x2c   : > { %p3032_p4 = pnand %p3031_p9, %p3025_p2 }
  0x2e   : > { %3035 = shalt.err (!%p3032_p4)
}
  0x2f   : > { %2738 = dma.hbm_to_vmem [thread:$0]  (!%p3419_p6), %s3973_s1, 16, %s3406_s30, [#allocation7]  }
  0x30   : > { %s3975_s3 = sld [smem:[#allocation22_spill]] }
  0x36   : > { %s3036_s19 = scalar_lea.hbm %s3975_s3, 3072 }
  0x37   : > { %p3037_p10 = scmp.ne.s32.totalorder %s3975_s3, %s3036_s19  ;;  %p3043_p4 = scmp.lt.u32.totalorder %s3036_s19, %s3975_s3 }
  0x39   : > { %p3039_p11 = pnand %p3037_p10, %p3433_p8 }
  0x3b   : > { %p3040_p12 = pneg %p3039_p11 }
  0x3d   : > { %p3045_p13 = pnand %p3043_p4, %p3040_p12 }
  0x3f   : > { %3048 = shalt.err (!%p3045_p13)
}
  0x40   : > { %s3049_s30 = scalar_lea.vmem %s3415_s17, 3072  ;;  %p3057_p7 = scmp.lt.s32.totalorder %s3415_s17, %s3415_s17 }
  0x41   : > { %p3050_p0 = scmp.ne.s32.totalorder %s3415_s17, %s3049_s30  ;;  %p3058_p9 = scmp.lt.s32.totalorder %s3049_s30, %s3049_s30 }
  0x43   : > { %p3052_p2 = pnand %p3050_p0, %p3433_p8  ;;  %p3059_p10 = por %p3058_p9, %p3057_p7 }
  0x45   : > { %p3053_p5 = pneg %p3052_p2 }
  0x47   : > { %p3060_p11 = pnand %p3059_p10, %p3053_p5 }
  0x49   : > { %3063 = shalt.err (!%p3060_p11)
}
  0x4a   : > { %s3289_s10 = smov 192   ;;  %s3290_s12 = smov 12  }
  0x4b   : > { %2744 = dma.hbm_to_vmem [thread:$0]  (!%p3419_p6), %s3975_s3, 3072, %s3415_s17, [#allocation10], %s3289_s10, %s3289_s10, %s3290_s12  }
  0x4c   : > { %s3064_s19 = scalar_lea.hbm %s3955_s9, 4096 }
  0x4d   : > { %p3065_p12 = scmp.ne.s32.totalorder %s3955_s9, %s3064_s19  ;;  %p3071_p0 = scmp.lt.u32.totalorder %s3064_s19, %s3955_s9 }
  0x4f   : > { %p3067_p4 = pnand %p3065_p12, %p3433_p8 }
  0x51   : > { %p3068_p13 = pneg %p3067_p4 }
  0x53   : > { %p3073_p2 = pnand %p3071_p0, %p3068_p13 }
  0x55   : > { %3076 = shalt.err (!%p3073_p2)
}
  0x56   : > { %s3077_s17 = scalar_lea.vmem %s3423_s20, 4096  ;;  %p3085_p10 = scmp.lt.s32.totalorder %s3423_s20, %s3423_s20 }
  0x57   : > { %p3078_p5 = scmp.ne.s32.totalorder %s3423_s20, %s3077_s17  ;;  %p3086_p11 = scmp.lt.s32.totalorder %s3077_s17, %s3077_s17 }
  0x59   : > { %p3080_p7 = pnand %p3078_p5, %p3433_p8  ;;  %p3087_p12 = por %p3086_p11, %p3085_p10 }
  0x5b   : > { %p3081_p9 = pneg %p3080_p7 }
  0x5d   : > { %p3088_p4 = pnand %p3087_p12, %p3081_p9 }
  0x5f   : > { %3091 = shalt.err (!%p3088_p4)
}
  0x60   : > { %s3291_s10 = smov 256   ;;  %s3292_s1 = smov 16  }
  0x61   : > { %2750 = dma.hbm_to_vmem [thread:$0]  (!%p3419_p6), %s3955_s9, 4096, %s3423_s20, [#allocation13], %s3291_s10, %s3291_s10, %s3292_s1  }
  0x62   : > { %s3293_s23 = smov [#allocation8]   ;;  %s3294_s29 = smov [#allocation11]  }
  0x63   : > { %s365_s24 = sshll.u32 %s3293_s23, 4  ;;  %s391_s19 = sshll.u32 %s3294_s29, 4  ;;  %s366_s24 = int_to_ptr.vmem [resolvable:$true] %s365_s24  ;;  %s392_s19 = int_to_ptr.vmem [resolvable:$true] %s391_s19 }
  0x64   : > { %s3092_s30 = scalar_lea.hbm %s3948_s2, 16 }
  0x65   : > { %p3093_p13 = scmp.ne.s32.totalorder %s3948_s2, %s3092_s30  ;;  %p3099_p5 = scmp.lt.u32.totalorder %s3092_s30, %s3948_s2 }
  0x67   : > { %p3095_p0 = pnand %p3093_p13, %p3433_p8 }
  0x69   : > { %p3096_p2 = pneg %p3095_p0 }
  0x6b   : > { %p3101_p7 = pnand %p3099_p5, %p3096_p2 }
  0x6d   : > { %3104 = shalt.err (!%p3101_p7)
}
  0x6e   : > { %s3105_s20 = scalar_lea.vmem %s366_s24, 16  ;;  %s3112_s10 = scalar_lea.vmem %s366_s24, 32 }
  0x6f   : > { %p3106_p9 = scmp.ne.s32.totalorder %s366_s24, %s3105_s20  ;;  %p3113_p12 = scmp.lt.s32.totalorder %s366_s24, %s366_s24 }
  0x70   : > { %p3114_p4 = scmp.lt.s32.totalorder %s3112_s10, %s3105_s20 }
  0x71   : > { %p3108_p10 = pnand %p3106_p9, %p3433_p8 }
  0x72   : > { %p3115_p1 = por %p3114_p4, %p3113_p12 }
  0x73   : > { %p3109_p11 = pneg %p3108_p10 }
  0x75   : > { %p3116_p3 = pnand %p3115_p1, %p3109_p11 }
  0x77   : > { %3119 = shalt.err (!%p3116_p3)
}
  0x78   : > { %2741 = dma.hbm_to_vmem [thread:$0]  (!%p3419_p6), %s3948_s2, 16, %s366_s24, [#allocation7]  }
  0x79   : > { %s3120_s12 = scalar_lea.hbm %s3951_s5, 1024 }
  0x7a   : > { %p3121_p13 = scmp.ne.s32.totalorder %s3951_s5, %s3120_s12  ;;  %p3127_p3 = scmp.lt.u32.totalorder %s3120_s12, %s3951_s5 }
  0x7c   : > { %p3123_p0 = pnand %p3121_p13, %p3433_p8 }
  0x7e   : > { %p3124_p1 = pneg %p3123_p0 }
  0x80   : > { %p3129_p2 = pnand %p3127_p3, %p3124_p1 }
  0x82   : > { %3132 = shalt.err (!%p3129_p2)
}
  0x83   : > { %s3133_s22 = scalar_lea.vmem %s392_s19, 1024  ;;  %p3141_p10 = scmp.lt.s32.totalorder %s392_s19, %s392_s19 }
  0x84   : > { %p3134_p5 = scmp.ne.s32.totalorder %s392_s19, %s3133_s22  ;;  %p3142_p11 = scmp.lt.s32.totalorder %s3133_s22, %s3133_s22 }
  0x86   : > { %p3136_p7 = pnand %p3134_p5, %p3433_p8  ;;  %p3143_p12 = por %p3142_p11, %p3141_p10 }
  0x88   : > { %p3137_p9 = pneg %p3136_p7 }
  0x8a   : > { %p3144_p4 = pnand %p3143_p12, %p3137_p9 }
  0x8c   : > { %3147 = shalt.err (!%p3144_p4)
}
  0x8d   : > { %s3295_s24 = smov 64   ;;  %s3296_s30 = smov 4  }
  0x8e   : > { %2747 = dma.hbm_to_vmem [thread:$0]  (!%p3419_p6), %s3951_s5, 1024, %s392_s19, [#allocation10], %s3295_s24, %s3295_s24, %s3296_s30  }
  0x8f   : > { %s3297_s10 = smov [#allocation14]   ;;  %s3148_s8 = scalar_lea.hbm %s3957_s11, 4096 }
  0x90   : > { %s429_s3 = sshll.u32 %s3297_s10, 4  ;;  %p3149_p13 = scmp.ne.s32.totalorder %s3957_s11, %s3148_s8  ;;  %s430_s3 = int_to_ptr.vmem [resolvable:$true] %s429_s3 }
  0x91   : > { %p3155_p3 = scmp.lt.u32.totalorder %s3148_s8, %s3957_s11 }
  0x92   : > { %p3151_p0 = pnand %p3149_p13, %p3433_p8 }
  0x94   : > { %p3152_p1 = pneg %p3151_p0 }
  0x96   : > { %p3157_p2 = pnand %p3155_p3, %p3152_p1 }
  0x98   : > { %3160 = shalt.err (!%p3157_p2)
}
  0x99   : > { %s3161_s19 = scalar_lea.vmem %s430_s3, 4096  ;;  %p3169_p10 = scmp.lt.s32.totalorder %s430_s3, %s430_s3 }
  0x9a   : > { %p3162_p5 = scmp.ne.s32.totalorder %s430_s3, %s3161_s19  ;;  %p3170_p11 = scmp.lt.s32.totalorder %s3161_s19, %s3161_s19 }
  0x9c   : > { %p3164_p7 = pnand %p3162_p5, %p3433_p8  ;;  %p3171_p12 = por %p3170_p11, %p3169_p10 }
  0x9e   : > { %p3165_p9 = pneg %p3164_p7 }
  0xa0   : > { %p3172_p4 = pnand %p3171_p12, %p3165_p9 }
  0xa2   : > { %3175 = shalt.err (!%p3172_p4)
}
  0xa3   : > { %2753 = dma.hbm_to_vmem [thread:$0]  (!%p3419_p6), %s3957_s11, 4096, %s430_s3, [#allocation13], %s3295_s24, %s3295_s24, %s3296_s30  }
  0xa4   : > { %s2403_s16 = sadd.s32 4294967294, %s3284_s28   ;;  %s3557_s18 = sadd.s32 1, %s3284_s28  }
  0xa5   : > { %s36_s17 = ssub.s32 %s3284_s28, %s3557_s18  ;;  %s39_s20 = sadd.s32 1, %s3280_s27 }
  0xa6   : > { %p37_p8 = scmp.eq.s32.totalorder %s36_s17, 0  ;;  %p46_p13 = scmp.ne.s32.totalorder %s3280_s27, %s3276_s26 }
  0xa7   : > { %p47_p0 = scmp.eq.s32.totalorder %s3284_s28, 0  ;;  %p52_p1 = scmp.ne.s32.totalorder %s3276_s26, %s3272_s25 }
  0xa8   : > { %s3568_s10 = scalar_select %p37_p8, %s3280_s27, %s39_s20  }
  0xa9   : > { %p3570_p3 = por %p47_p0, %p46_p13  ;;  %p3977_p2 = scmp.eq.s32.totalorder %s3401_s14, 0 }
  0xaa   : > { %p328_p5 = scmp.eq.s32.totalorder %s3401_s14, 1  ;;  %p334_p7 = scmp.eq.s32.totalorder %s2403_s16, 1 }
  0xab   : > { %p3576_p6 = por %p3977_p2, %p52_p1  ;;  %p2768_p9 = scmp.lt.s32.totalorder %s3284_s28, 2 }
  0xac   : > { %s446_s30 = sand.u32 1, %s3280_s27   ;;  %p3583_p10 = por %p328_p5, %p46_p13 }
  0xad   : > { %p3587_p11 = por %p334_p7, %p52_p1  ;;  %s2412_s8 = sshll.u32 %s446_s30, 4 }
  0xae   : > { %s3979_s3 = scalar_select %p3583_p10, 1, 0 }
  0xaf   : > { %s3980_s7 = scalar_select %p3587_p11, 1, 0 }
  0xb0   : > { %s2539_s12 = sshll.u32 %s3284_s28, 8  ;;  %s450_s19 = scalar_lea.vmem [#allocation3], %s2412_s8 }
  0xb1   : > { %s3595_s29 = scalar_lea.hbm %s3946_s0, %s2539_s12  ;;  %s457_s21 = sshll.u32 %s450_s19, 4  ;;  %s3597_s21 = int_to_ptr.vmem [resolvable:$true] %s457_s21 }
  0xb2   : > { %p3601_p12 = pnand %p2768_p9, %p3570_p3  ;;  %s3605_s16 = scalar_lea.sflag [#allocation4], %s446_s30 }
  0xb3   : > { %s3176_s17 = scalar_lea.hbm %s3595_s29, 256  ;;  %s3181_s1 = scalar_lea.hbm %s3946_s0, 512 }
  0xb4   : > { %p3177_p4 = scmp.ne.s32.totalorder %s3595_s29, %s3176_s17  ;;  %p3178_p8 = pneg %p3601_p12 }
  0xb5   : > { %p3182_p1 = scmp.lt.u32.totalorder %s3595_s29, %s3946_s0  ;;  %p3183_p3 = scmp.lt.u32.totalorder %s3181_s1, %s3176_s17 }
  0xb6   : > { %p3179_p13 = pnand %p3178_p8, %p3177_p4  ;;  %p3185_p5 = scmp.lt.u32.totalorder %s3176_s17, %s3595_s29 }
  0xb7   : > { %p3184_p2 = por %p3183_p3, %p3182_p1 }
  0xb8   : > { %p3180_p0 = pneg %p3179_p13 }
  0xb9   : > { %p3186_p7 = por %p3185_p5, %p3184_p2 }
  0xbb   : > { %p3187_p9 = pnand %p3186_p7, %p3180_p0 }
  0xbd   : > { %3190 = shalt.err (!%p3187_p9)
}
  0xbe   : > { %s3191_s30 = scalar_lea.vmem %s3597_s21, 256  ;;  %s3298_s23 = smov [#allocation3]  }
  0xbf   : > { %p3192_p4 = scmp.ne.s32.totalorder %s3597_s21, %s3191_s30  ;;  %s3196_s19 = sshll.u32 %s3298_s23, 4  ;;  %s3197_s19 = int_to_ptr.vmem [resolvable:$false] %s3196_s19 }
  0xc0   : > { %s3198_s20 = scalar_lea.vmem %s3197_s19, 512  ;;  %p3199_p10 = scmp.lt.s32.totalorder %s3597_s21, %s3197_s19 }
  0xc1   : > { %p3194_p13 = pnand %p3192_p4, %p3178_p8  ;;  %p3200_p1 = scmp.lt.s32.totalorder %s3198_s20, %s3191_s30 }
  0xc3   : > { %p3195_p11 = pneg %p3194_p13  ;;  %p3201_p3 = por %p3200_p1, %p3199_p10 }
  0xc5   : > { %p3202_p2 = pnand %p3201_p3, %p3195_p11 }
  0xc7   : > { %3205 = shalt.err (!%p3202_p2)
}
  0xc8   : > { %s3299_s17 = smov 128   ;;  %s3300_s8 = smov 8  }
  0xc9   : > { %2757 = dma.hbm_to_vmem [thread:$0]  (!%p3601_p12), %s3595_s29, 256, %s3597_s21, %s3605_s16, %s3299_s17, %s3299_s17, %s3300_s8  }
  0xca   : > { %p3982_p8 = scmp.ne.s32.totalorder %s3971_s15, 0 }
  0xcb   : > { %s3636_s1 = sand.u32 (!%p3982_p8), 1, %s3276_s26  }
  0xcc   : > { %469 = sbr.rel (%p3982_p8) target bundleno = 2620 (0xa3c), region = 72  ;;  %s2416_s12 = sshll.u32 (!%p3982_p8), %s3636_s1, 4 }
  0xcd   : > { %s472_s13 = scalar_lea.sflag (!%p3982_p8), [#allocation4], %s3636_s1  ;;  %s3642_s30 = scalar_lea.vmem (!%p3982_p8), [#allocation3], %s2416_s12 }
  0xd3   : > { %3251 = dma.done.wait (%p3576_p6), %s472_s13, 256  }
  0xd4   : > { %3253 = vsyncadd (%p3576_p6), %s472_s13, 4294967040  ;;  %p3983_p10 = scmp.eq.s32.totalorder %s3401_s14, 0 }
  0xd6   : > { %3255 = dma.done.wait (%p3983_p10), [#allocation7], 32   ;;  %p3984_p11 = pmov %p3983_p10 }
  0xd7   : > { %p3985_p12 = pmov %p3983_p10 }
  0xd8   : > { %3257 = vsyncadd (%p3984_p11), [#allocation7], 4294967264 }
  0xd9   : > { %3259 = dma.done.wait (%p3985_p12), [#allocation10], 4096   ;;  %p3986_p0 = pmov %p3983_p10 }
  0xdb   : > { %3261 = vsyncadd (%p3986_p0), [#allocation10], 4294963200  ;;  %p3987_p5 = pmov %p3986_p0 }
  0xdc   : > { %p3988_p7 = pmov %p3986_p0 }
  0xdd   : > { %3263 = dma.done.wait (%p3987_p5), [#allocation13], 8192  }
  0xde   : > { %3265 = vsyncadd (%p3988_p7), [#allocation13], 4294959104  ;;  %v3301_v0 = vmov 0.0   ;;  %v3662_v1 = vld [vmem:[%s3642_s30] sm:$0xff]  ;;  %v3665_v2 = vld [vmem:[%s3642_s30 + $0x8] sm:$0xff]  ;;  %v3302_v26 = vmov 0   ;;  %v625_v57 = vlaneseq }
  0xdf   : > { %2619 = vmatprep.subr.bf16.mxu1 %v3301_v0  ;;  %547 = vadd.xlane.f32.xlu0 %v3662_v1  ;;  %v554_v3 = vmul.f32 %v3662_v1, %v3662_v1  ;;  %v2830_v4 = vld [vmem:[#allocation9 + $0x4] ss:$12 sps:$4 sm:$0xff]   ;;  %v555_v5 = vmul.f32 %v3665_v2, %v3665_v2  ;;  %v2832_v6 = vld [vmem:[#allocation9] ss:$12 sps:$4 sm:$0xff]   ;;  %v2833_v7 = vld [vmem:[#allocation9 + $0x8] ss:$12 sps:$4 sm:$0xff]  }
  0xe0   : > { %768 = vmatprep.subr.bf16.mxu0 %v2830_v4  ;;  %2620 = vmatpush3.bf16.msra.mxu1 %v2833_v7  ;;  %v2834_v8 = vld [vmem:[#allocation9 + $0x1c] ss:$12 sps:$4 sm:$0xff]   ;;  %v2836_v9 = vld [vmem:[#allocation9 + $0x18] ss:$12 sps:$4 sm:$0xff]   ;;  %v2837_v10 = vld [vmem:[#allocation9 + $0x20] ss:$12 sps:$4 sm:$0xff]  }
  0xe1   : > { %556 = vadd.xlane.f32.xlu1 %v554_v3  ;;  %769 = vmatpush1.bf16.msra.mxu0 %v2832_v6  ;;  %v2838_v11 = vld [vmem:[#allocation9 + $0x34] ss:$12 sps:$4 sm:$0xff]   ;;  %v2840_v12 = vld [vmem:[#allocation9 + $0x30] ss:$12 sps:$4 sm:$0xff]   ;;  %v2841_v13 = vld [vmem:[#allocation9 + $0x38] ss:$12 sps:$4 sm:$0xff]  }
  0xe2   : > { %2621 = vmatprep.subr.bf16.mxu1 %v3301_v0  ;;  %770 = vmatprep.subr.bf16.mxu0 %v2834_v8  ;;  %v2842_v14 = vld [vmem:[#allocation9 + $0x4c] ss:$12 sps:$4 sm:$0xff]   ;;  %v2844_v15 = vld [vmem:[#allocation9 + $0x48] ss:$12 sps:$4 sm:$0xff]   ;;  %v2845_v16 = vld [vmem:[#allocation9 + $0x50] ss:$12 sps:$4 sm:$0xff]  }
  0xe3   : > { %549 = vadd.xlane.f32.xlu0 %v3665_v2  ;;  %v2846_v17 = vld [vmem:[#allocation9 + $0x64] ss:$12 sps:$4 sm:$0xff]   ;;  %v2848_v18 = vld [vmem:[#allocation9 + $0x60] ss:$12 sps:$4 sm:$0xff]   ;;  %v2849_v19 = vld [vmem:[#allocation9 + $0x68] ss:$12 sps:$4 sm:$0xff]   ;;  %800 = vmatprep.mubr.bf16.mxu0 %v3302_v26 }
  0xe4   : > { %2622 = vmatpush3.bf16.msra.mxu1 %v2837_v10  ;;  %v2850_v20 = vld [vmem:[#allocation9 + $0x7c] ss:$12 sps:$4 sm:$0xff]   ;;  %v2852_v21 = vld [vmem:[#allocation9 + $0x78] ss:$12 sps:$4 sm:$0xff]   ;;  %v2853_v22 = vld [vmem:[#allocation9 + $0x80] ss:$12 sps:$4 sm:$0xff]  }
  0xe5   : > { %558 = vadd.xlane.f32.xlu1 %v555_v5  ;;  %771 = vmatpush1.bf16.msra.mxu0 %v2836_v9  ;;  %v2854_v23 = vld [vmem:[#allocation9 + $0x94] ss:$12 sps:$4 sm:$0xff]   ;;  %v2856_v24 = vld [vmem:[#allocation9 + $0x90] ss:$12 sps:$4 sm:$0xff]   ;;  %v2857_v25 = vld [vmem:[#allocation9 + $0x98] ss:$12 sps:$4 sm:$0xff]  }
  0xe6   : > { %2623 = vmatprep.subr.bf16.mxu1 %v3301_v0  ;;  %772 = vmatprep.subr.bf16.mxu0 %v2838_v11  ;;  %vm3303_vm0 = vmmov 0   ;;  %v2858_v27 = vld [vmem:[#allocation9 + $0xac] ss:$12 sps:$4 sm:$0xff]   ;;  %v2860_v28 = vld [vmem:[#allocation9 + $0xa8] ss:$12 sps:$4 sm:$0xff]   ;;  %v3691_v58 = vshrl.u32 %v625_v57, 7 }
  0xe7   : > { %2635 = vmatprep.mubr.msk.bf16.mxu1 %vm3303_vm0, %v3301_v0  ;;  %v2861_v29 = vld [vmem:[#allocation9 + $0xb0] ss:$12 sps:$4 sm:$0xff]   ;;  %v623_v61 = vld [vmem:[%s3950_s4] sm:$0x7]  ;;  %vm855_vm1 = vcmask 261120   ;;  %vm903_vm2 = vcmask 130048  }
  0xe8   : > { %2624 = vmatpush3.bf16.msra.mxu1 %v2841_v13  ;;  %v2424_v47 = vld [vmem:[#allocation6] ss:$0 sm:$0xff]  ;;  %v2425_v52 = vld [vmem:[#allocation8] ss:$0 sm:$0xff]  ;;  %v627_v59 = vsub.s32 0, %v3691_v58  ;;  %v635_v60 = vsub.s32 2, %v3691_v58 }
  0xe9   : > { %773 = vmatpush1.bf16.msra.mxu0 %v2840_v12  ;;  %2625 = vmatprep.subr.bf16.mxu1 %v3301_v0  ;;  %v631_v62 = vsub.s32 1, %v3691_v58  ;;  %s3304_s29 = smov 96   ;;  %s3305_s21 = smov 64   ;;  %vm1105_vm3 = vcmask 523520   ;;  %vm1237_vm4 = vcmask 785920   ;;  %vm1369_vm5 = vcmask 1048320  }
  0xea   : > { %774 = vmatprep.subr.bf16.mxu0 %v2842_v14  ;;  %v628_v63 = vrot.slane %v623_v61, %v627_v59  ;;  %s3306_s22 = smov 32   ;;  %s3989_s17 = sld [smem:[#allocation23_spill]] }
  0xeb   : > { %v632_v4 = vrot.slane %v623_v61, %v631_v62  ;;  %s3992_s16 = sld [smem:[#allocation26_spill]]  ;;  %s541_s23 = scalar_lea.vmem [#allocation15], %s2416_s12 }
  0xec   : > { %2626 = vmatpush3.bf16.msra.mxu1 %v2845_v16  ;;  %s2273_s19 = sshll.u32 %s541_s23, 4  ;;  %s2540_s20 = sshll.u32 %s3401_s14, 8  ;;  %s3896_s19 = int_to_ptr.vmem [resolvable:$true] %s2273_s19 }
  0xed   : > { %775 = vmatpush1.bf16.msra.mxu0 %v2844_v15  ;;  %2627 = vmatprep.subr.bf16.mxu1 %v3301_v0  ;;  %s3993_s13 = sld [smem:[#allocation27_spill]]  ;;  %s2260_s12 = scalar_lea.sflag [#allocation5], %s3636_s1 }
  0xee   : > { %776 = vmatprep.subr.bf16.mxu0 %v2846_v17  ;;  %s3206_s15 = scalar_lea.vmem %s3896_s19, 256  ;;  %p3994_p9 = scmp.ne.s32.totalorder %s3979_s3, 0 }
  0xef   : > { %p3207_p6 = scmp.ne.s32.totalorder %s3896_s19, %s3206_s15  ;;  %s3307_s14 = smov [#allocation15]  }
  0xf0   : > { %2628 = vmatpush3.bf16.msra.mxu1 %v2849_v19  ;;  %s3210_s24 = sshll.u32 %s3307_s14, 4  ;;  %s3211_s24 = int_to_ptr.vmem [resolvable:$false] %s3210_s24 }
  0xf1   : > { %777 = vmatpush1.bf16.msra.mxu0 %v2848_v18  ;;  %2629 = vmatprep.subr.bf16.mxu1 %v3301_v0  ;;  %p3208_p4 = pnand %p3207_p6, %p3994_p9  ;;  %p3213_p1 = scmp.lt.s32.totalorder %s3896_s19, %s3211_s24 }
  0xf2   : > { %778 = vmatprep.subr.bf16.mxu0 %v2850_v20 }
  0xf3   : > { %p3209_p13 = pneg %p3208_p4 }
  0xf4   : > { %2630 = vmatpush3.bf16.msra.mxu1 %v2853_v22 }
  0xf5   : > { %779 = vmatpush1.bf16.msra.mxu0 %v2852_v21  ;;  %2631 = vmatprep.subr.bf16.mxu1 %v3301_v0 }
  0xf6   : > { %780 = vmatprep.subr.bf16.mxu0 %v2854_v23 }
  0xf8   : > { %2632 = vmatpush3.bf16.msra.mxu1 %v2857_v25 }
  0xf9   : > { %781 = vmatpush1.bf16.msra.mxu0 %v2856_v24  ;;  %2633 = vmatprep.subr.bf16.mxu1 %v3301_v0 }
  0xfa   : > { %782 = vmatprep.subr.bf16.mxu0 %v2858_v27 }
  0xfc   : > { %2634 = vmatpush3.bf16.msra.mxu1 %v2861_v29 }
  0xfd   : > { %783 = vmatpush1.bf16.msra.mxu0 %v2860_v28  ;;  %2639 = vmatprep.subr.bf16.mxu1 %v3301_v0 }
  0xfe   : > { %2663 = vmatprep.subr.bf16.mxu0 %v3301_v0 }
 0x16c   : > { %v548_v30 = vpop.xlane.xlu0 %547 }
 0x16d   : > { %v552_v31 = vmul.f32 0.0078125, %v548_v30 }
 0x16e   : > { %v557_v32 = vpop.xlane.xlu1 %556 }
 0x16f   : > { %v562_v33 = vmul.f32 %v552_v31, %v552_v31  ;;  %v560_v34 = vmul.f32 0.0078125, %v557_v32  ;;  %v566_v44 = vsub.f32 %v3662_v1, %v552_v31  ;;  %v636_v1 = vrot.slane %v623_v61, %v635_v60 }
 0x170   : > { %v550_v35 = vpop.xlane.xlu0 %549 }
 0x171   : > { %v564_v36 = vsub.f32 %v560_v34, %v562_v33  ;;  %v553_v37 = vmul.f32 0.0078125, %v550_v35 }
 0x172   : > { %v559_v38 = vpop.xlane.xlu1 %558 }
 0x173   : > { %v568_v39 = vadd.f32 1e-05, %v564_v36  ;;  %v563_v40 = vmul.f32 %v553_v37, %v553_v37  ;;  %v561_v41 = vmul.f32 0.0078125, %v559_v38  ;;  %v567_v48 = vsub.f32 %v3665_v2, %v553_v37 }
 0x175   : > { %2950 = vrsqrt.f32 %v568_v39  ;;  %v565_v42 = vsub.f32 %v561_v41, %v563_v40 }
 0x177   : > { %v569_v43 = vadd.f32 1e-05, %v565_v42 }
 0x179   : > { %2952 = vrsqrt.f32 %v569_v43 }
 0x17f   : > { %v2951_v45 = vpop.eup %2950 }
 0x180   : > { %v572_v46 = vmul.f32 %v2951_v45, %v566_v44 }
 0x182   : > { %v580_v51 = vmul.f32 %v2424_v47, %v572_v46 }
 0x183   : > { %v2953_v49 = vpop.eup %2952 }
 0x184   : > { %v573_v50 = vmul.f32 %v2953_v49, %v567_v48  ;;  %v588_v54 = vadd.f32 %v2425_v52, %v580_v51 }
 0x186   : > { %v581_v53 = vmul.f32 %v2424_v47, %v573_v50 }
 0x188   : > { %v589_v55 = vadd.f32 %v2425_v52, %v581_v53 }
 0x18a   : > { %v590_v56 = vpack.c.bf16 %v589_v55, %v588_v54 }
 0x18c   : > { %801 = vmatmul.mubr.bf16.vlgmr.msra.gmra.mrb[0].mxu0 %v590_v56  ;;  %2636 = vmatmul.mubr.bf16.vlgmr.msra.gmra.mrb[0].mxu1 %v590_v56 }
 0x18d   : > { %2641 = vmatprep.mubr.msk.bf16.mxu1 %vm3303_vm0, %v3301_v0  ;;  %2665 = vmatprep.mubr.msk.bf16.mxu0 %vm3303_vm0, %v3301_v0 }
 0x25f   : > { %v802_v2 = vpop.f32.mrb[0].mxu0  ;;  %v845_v3 = vpop.f32.mrb[0].mxu1 }
 0x260   : > { %v804_v5 = vpop.f32.mrb[1].mxu0  ;;  %v2637_v6 = vpop.f32.mrb[1].mxu1  ;;  %v803_v9 = vadd.f32 %v802_v2, %v628_v63  ;;  %v846_v10 = vadd.f32 %v845_v3, %v636_v1 }
 0x261   : > { %v806_v7 = vpop.f32.mrb[2].mxu0  ;;  %v848_v8 = vpop.f32.mrb[2].mxu1  ;;  %v805_v15 = vadd.f32 %v804_v5, %v632_v4 }
 0x262   : > { %v807_v11 = vadd.f32 %v806_v7, %v628_v63  ;;  %v849_v12 = vadd.f32 %v848_v8, %v636_v1  ;;  %v808_v13 = vpop.f32.mrb[3].mxu0  ;;  %v2638_v14 = vpop.f32.mrb[3].mxu1 }
 0x263   : > { %v809_v16 = vadd.f32 %v808_v13, %v632_v4 }
 0x264   : > { %v852_v17 = vpack.c.bf16 %v807_v11, %v803_v9  ;;  %v3705_v18 = vpack.c.bf16 %v849_v12, %v846_v10 }
 0x265   : > { %v853_v19 = vpack.c.bf16 %v809_v16, %v805_v15 }
 0x267   : > { %v860_v20 = vsel %vm855_vm1, %v853_v19, 0 }
 0x268   : > { %2640 = vmatpush3.bf16.xpose.msra.mxu1 %v860_v20 }
 0x269   : > { %2645 = vmatprep.subr.bf16.mxu1 %v3301_v0 }
 0x26f   : > { %2642 = vmatmul.mubr.msk.bf16.vlgmr.msra.gmra.mrb[4].mxu1 %vm855_vm1, %v852_v17 }
 0x270   : > { %2646 = vmatpush3.bf16.msra.mxu1 %v3705_v18  ;;  %2647 = vmatprep.mubr.msk.bf16.mxu1 %vm3303_vm0, %v3301_v0 }
 0x271   : > { %2651 = vmatprep.subr.bf16.mxu1 %v3301_v0 }
 0x342   : > { %v896_v21 = vpop.f32.mrb[4].mxu1 }
 0x343   : > { %v2643_v22 = vpop.f32.mrb[5].mxu1  ;;  %v904_v23 = vsel %vm903_vm2, %v896_v21, -inf }
 0x344   : > { %905 = vmax.xlane.f32.xlu0 %v904_v23  ;;  %v899_v24 = vpop.f32.mrb[6].mxu1 }
 0x345   : > { %v2644_v25 = vpop.f32.mrb[7].mxu1  ;;  %v907_v27 = vsel %vm903_vm2, %v899_v24, -inf }
 0x346   : > { %908 = vmax.xlane.f32.xlu1 %v907_v27 }
 0x357   : > { %974 = vrot.lane.b32.xlu1 %v852_v17, %s3304_s29 }
 0x35a   : > { %977 = vrot.lane.b32.xlu0 %v853_v19, %s3304_s29 }
 0x35b   : > { %1110 = vrot.lane.b32.xlu1 %v853_v19, %s3305_s21 }
 0x35e   : > { %1242 = vrot.lane.b32.xlu0 %v853_v19, %s3306_s22 }
 0x35f   : > { %1108 = vrot.lane.b32.xlu1 %v852_v17, %s3305_s21 }
 0x363   : > { %1240 = vrot.lane.b32.xlu1 %v852_v17, %s3306_s22 }
 0x3d1   : > { %v906_v28 = vpop.xlane.xlu0 %905 }
 0x3d2   : > { %v910_v29 = vsub.f32 %v896_v21, %v906_v28 }
 0x3d3   : > { %v909_v30 = vpop.xlane.xlu1 %908 }
 0x3d4   : > { %v912_v31 = vmul.f32 1.442695, %v910_v29  ;;  %v911_v32 = vsub.f32 %v899_v24, %v909_v30 }
 0x3d5   : > { %v978_v35 = vpop.permute.xlu0 %977 }
 0x3d6   : > { %v914_v33 = vmul.f32 1.442695, %v911_v32  ;;  %2954 = vpow2.f32 %v912_v31  ;;  %v983_v44 = vsel %vm855_vm1, %v978_v35, 0 }
 0x3d7   : > { %v975_v34 = vpop.permute.xlu1 %974 }
 0x3d8   : > { %2956 = vpow2.f32 %v914_v33 }
 0x3d9   : > { %v1243_v39 = vpop.permute.xlu0 %1242 }
 0x3da   : > { %v1248_v43 = vsel %vm855_vm1, %v1243_v39, 0 }
 0x3db   : > { %v1111_v36 = vpop.permute.xlu1 %1110 }
 0x3dc   : > { %v1116_v37 = vsel %vm855_vm1, %v1111_v36, 0 }
 0x3dd   : > { %2664 = vmatpush3.bf16.xpose.msra.mxu0 %v1116_v37 }
 0x3de   : > { %2675 = vmatprep.subr.bf16.mxu0 %v3301_v0 }
 0x3df   : > { %v1109_v41 = vpop.permute.xlu1 %1108 }
 0x3e0   : > { %v3724_v38 = vpop.eup %2954 }
 0x3e2   : > { %v3726_v40 = vpop.eup %2956 }
 0x3e3   : > { %v922_v42 = vpack.c.bf16 %v3726_v40, %v3724_v38  ;;  %v1241_v45 = vpop.permute.xlu1 %1240 }
 0x3e4   : > { %2666 = vmatmul.mubr.msk.bf16.vlgmr.msra.gmra.mrb[4].mxu0 %vm855_vm1, %v1109_v41 }
 0x3e5   : > { %2648 = vmatmul.mubr.msk.bf16.vlgmr.msra.gmra.mrb[8].mxu1 %vm903_vm2, %v922_v42  ;;  %2676 = vmatpush3.bf16.xpose.msra.mxu0 %v1248_v43 }
 0x3e6   : > { %2652 = vmatpush3.bf16.xpose.msra.mxu1 %v983_v44  ;;  %2677 = vmatprep.mubr.msk.bf16.mxu0 %vm3303_vm0, %v3301_v0 }
 0x3e7   : > { %2653 = vmatprep.mubr.msk.bf16.mxu1 %vm3303_vm0, %v3301_v0  ;;  %2657 = vmatprep.subr.bf16.mxu1 %v3301_v0 }
 0x3e8   : > { %2687 = vmatprep.subr.bf16.mxu0 %v3301_v0 }
 0x3ec   : > { %2678 = vmatmul.mubr.msk.bf16.vlgmr.msra.gmra.mrb[8].mxu0 %vm855_vm1, %v1241_v45 }
 0x3ed   : > { %2654 = vmatmul.mubr.msk.bf16.vlgmr.msra.gmra.mrb[12].mxu1 %vm855_vm1, %v975_v34  ;;  %2703 = vmatprep.mubr.msk.bf16.mxu0 %vm3303_vm0, %v3301_v0 }
 0x3ee   : > { %2659 = vmatprep.mubr.msk.bf16.mxu1 %vm3303_vm0, %v3301_v0 }
 0x4b7   : > { %v1152_v46 = vpop.f32.mrb[4].mxu0 }
 0x4b8   : > { %v3746_v47 = vpop.f32.mrb[8].mxu1  ;;  %v2667_v48 = vpop.f32.mrb[5].mxu0  ;;  %v1159_v49 = vsel %vm903_vm2, %v1152_v46, -inf }
 0x4b9   : > { %1160 = vmax.xlane.f32.xlu0 %v1159_v49  ;;  %v2649_v50 = vpop.f32.mrb[9].mxu1  ;;  %v1155_v51 = vpop.f32.mrb[6].mxu0  ;;  %v916_v48 = vsel %vm903_vm2, %v3724_v38, 0.0  ;;  %v919_v49 = vsel %vm903_vm2, %v3726_v40, 0.0 }
 0x4ba   : > { %v3749_v52 = vpop.f32.mrb[10].mxu1  ;;  %v2668_v53 = vpop.f32.mrb[7].mxu0  ;;  %v1162_v55 = vsel %vm903_vm2, %v1155_v51, -inf }
 0x4bb   : > { %v2650_v54 = vpop.f32.mrb[11].mxu1 }
 0x4bd   : > { %1163 = vmax.xlane.f32.xlu0 %v1162_v55 }
 0x4bf   : > { %v1284_v56 = vpop.f32.mrb[8].mxu0 }
 0x4c0   : > { %v1019_v57 = vpop.f32.mrb[12].mxu1  ;;  %v2679_v61 = vpop.f32.mrb[9].mxu0  ;;  %v1291_v63 = vsel %vm903_vm2, %v1284_v56, -inf }
 0x4c1   : > { %1292 = vmax.xlane.f32.xlu0 %v1291_v63  ;;  %v2655_v1 = vpop.f32.mrb[13].mxu1  ;;  %v1287_v2 = vpop.f32.mrb[10].mxu0  ;;  %v1026_v7 = vsel %vm903_vm2, %v1019_v57, -inf }
 0x4c2   : > { %v1022_v3 = vpop.f32.mrb[14].mxu1  ;;  %v2680_v4 = vpop.f32.mrb[11].mxu0  ;;  %v1294_v5 = vsel %vm903_vm2, %v1287_v2, -inf }
 0x4c3   : > { %1295 = vmax.xlane.f32.xlu1 %v1294_v5  ;;  %v2656_v6 = vpop.f32.mrb[15].mxu1  ;;  %v1029_v8 = vsel %vm903_vm2, %v1022_v3, -inf  ;;  %v2863_v4 = vld [vmem:[#allocation11 + $0x8] sm:$0xff]   ;;  %v2864_v5 = vld [vmem:[#allocation11 + $0x10] sm:$0xff]  }
 0x4c4   : > { %v2865_v6 = vld [vmem:[#allocation11 + $0x18] sm:$0xff]  }
 0x4c5   : > { %1027 = vmax.xlane.f32.xlu0 %v1026_v7 }
 0x4c7   : > { %1030 = vmax.xlane.f32.xlu1 %v1029_v8 }
 0x4d8   : > { %1178 = vrot.lane.b32.xlu1 %v3705_v18, %s3305_s21 }
 0x4db   : > { %1046 = vrot.lane.b32.xlu0 %v3705_v18, %s3304_s29 }
 0x4dc   : > { %1310 = vrot.lane.b32.xlu1 %v3705_v18, %s3306_s22 }
 0x546   : > { %v1161_v9 = vpop.xlane.xlu0 %1160 }
 0x547   : > { %v1165_v10 = vsub.f32 %v1152_v46, %v1161_v9 }
 0x549   : > { %v1167_v11 = vmul.f32 1.442695, %v1165_v10 }
 0x54a   : > { %v1164_v12 = vpop.xlane.xlu0 %1163 }
 0x54b   : > { %2958 = vpow2.f32 %v1167_v11  ;;  %v1166_v13 = vsub.f32 %v1155_v51, %v1164_v12  ;;  %v2862_v51 = vld [vmem:[#allocation11] sm:$0xff]  }
 0x54c   : > { %2688 = vmatpush3.bf16.msra.mxu0 %v2862_v51  ;;  %v2866_v11 = vld [vmem:[#allocation11 + $0x20] sm:$0xff]  }
 0x54d   : > { %v1169_v14 = vmul.f32 1.442695, %v1166_v13  ;;  %2689 = vmatprep.subr.bf16.mxu0 %v3301_v0 }
 0x54e   : > { %v1293_v15 = vpop.xlane.xlu0 %1292 }
 0x54f   : > { %2960 = vpow2.f32 %v1169_v14  ;;  %v1297_v16 = vsub.f32 %v1284_v56, %v1293_v15  ;;  %v2867_v14 = vld [vmem:[#allocation11 + $0x28] sm:$0xff]  }
 0x550   : > { %v1296_v17 = vpop.xlane.xlu1 %1295  ;;  %2690 = vmatpush3.bf16.msra.mxu0 %v2863_v4  ;;  %v2879_v4 = vld [vmem:[#allocation12 + $0x28] ss:$16 sps:$4 sm:$0xff]  }
 0x551   : > { %v1299_v19 = vmul.f32 1.442695, %v1297_v16  ;;  %v1298_v20 = vsub.f32 %v1287_v2, %v1296_v17  ;;  %2691 = vmatprep.subr.bf16.mxu0 %v3301_v0  ;;  %v2868_v17 = vld [vmem:[#allocation11 + $0x30] sm:$0xff]  }
 0x552   : > { %v1028_v21 = vpop.xlane.xlu0 %1027 }
 0x553   : > { %v1301_v22 = vmul.f32 1.442695, %v1298_v20  ;;  %v1032_v23 = vsub.f32 %v1019_v57, %v1028_v21  ;;  %2962 = vpow2.f32 %v1299_v19 }
 0x554   : > { %v1031_v24 = vpop.xlane.xlu1 %1030  ;;  %2692 = vmatpush3.bf16.msra.mxu0 %v2864_v5  ;;  %v2884_v5 = vld [vmem:[#allocation12 + $0x44] ss:$16 sps:$4 sm:$0xff]  }
 0x555   : > { %v2959_v25 = vpop.eup %2958  ;;  %2964 = vpow2.f32 %v1301_v22  ;;  %v1034_v18 = vmul.f32 1.442695, %v1032_v23  ;;  %v1033_v27 = vsub.f32 %v1022_v3, %v1031_v24  ;;  %2693 = vmatprep.subr.bf16.mxu0 %v3301_v0 }
 0x556   : > { %v1047_v28 = vpop.permute.xlu0 %1046  ;;  %v1171_v29 = vsel %vm903_vm2, %v2959_v25, 0.0 }
 0x557   : > { %2966 = vpow2.f32 %v1034_v18  ;;  %v1036_v30 = vmul.f32 1.442695, %v1033_v27  ;;  %1172 = vadd.xlane.f32.xlu0 %v1171_v29  ;;  %2658 = vmatpush3.bf16.msra.mxu1 %v1047_v28 }
 0x558   : > { %2669 = vmatprep.subr.bf16.mxu1 %v3301_v0  ;;  %v1179_v44 = vpop.permute.xlu1 %1178  ;;  %2694 = vmatpush3.bf16.msra.mxu0 %v2865_v6  ;;  %v2887_v6 = vld [vmem:[#allocation12 + $0x4c] ss:$16 sps:$4 sm:$0xff]  }
 0x559   : > { %v2961_v31 = vpop.eup %2960  ;;  %2968 = vpow2.f32 %v1036_v30  ;;  %2695 = vmatprep.subr.bf16.mxu0 %v3301_v0 }
 0x55a   : > { %v1174_v32 = vsel %vm903_vm2, %v2961_v31, 0.0  ;;  %v1177_v33 = vpack.c.bf16 %v2961_v31, %v2959_v25  ;;  %v2869_v25 = vld [vmem:[#allocation11 + $0x38] sm:$0xff]  }
 0x55b   : > { %1175 = vadd.xlane.f32.xlu0 %v1174_v32 }
 0x55c   : > { %v1311_v50 = vpop.permute.xlu1 %1310  ;;  %2696 = vmatpush3.bf16.msra.mxu0 %v2866_v11  ;;  %v2896_v11 = vld [vmem:[#allocation12 + $0x84] ss:$16 sps:$4 sm:$0xff]  }
 0x55d   : > { %v2963_v34 = vpop.eup %2962  ;;  %2697 = vmatprep.subr.bf16.mxu0 %v3301_v0 }
 0x55e   : > { %v1303_v45 = vsel %vm903_vm2, %v2963_v34, 0.0 }
 0x55f   : > { %v2965_v35 = vpop.eup %2964 }
 0x560   : > { %v1309_v36 = vpack.c.bf16 %v2965_v35, %v2963_v34  ;;  %v1306_v46 = vsel %vm903_vm2, %v2965_v35, 0.0  ;;  %2698 = vmatpush3.bf16.msra.mxu0 %v2867_v14  ;;  %v2899_v14 = vld [vmem:[#allocation12 + $0x8c] ss:$16 sps:$4 sm:$0xff]  }
 0x561   : > { %v2967_v37 = vpop.eup %2966  ;;  %2699 = vmatprep.subr.bf16.mxu0 %v3301_v0 }
 0x562   : > { %v1038_v39 = vsel %vm903_vm2, %v2967_v37, 0.0 }
 0x563   : > { %v2969_v41 = vpop.eup %2968  ;;  %1039 = vadd.xlane.f32.xlu1 %v1038_v39 }
 0x564   : > { %v1041_v42 = vsel %vm903_vm2, %v2969_v41, 0.0  ;;  %v1044_v43 = vpack.c.bf16 %v2969_v41, %v2967_v37  ;;  %2700 = vmatpush3.bf16.msra.mxu0 %v2868_v17  ;;  %v2900_v17 = vld [vmem:[#allocation12 + $0xa0] ss:$16 sps:$4 sm:$0xff]  }
 0x565   : > { %1042 = vadd.xlane.f32.xlu0 %v1041_v42  ;;  %2701 = vmatprep.subr.bf16.mxu0 %v3301_v0 }
 0x566   : > { %2660 = vmatmul.mubr.msk.bf16.vlgmr.msra.gmra.mrb[16].mxu1 %vm903_vm2, %v1044_v43 }
 0x567   : > { %2670 = vmatpush3.bf16.msra.mxu1 %v1179_v44  ;;  %1304 = vadd.xlane.f32.xlu1 %v1303_v45  ;;  %v2458_v44 = vld [vmem:[%s3952_s6] ss:$0 sm:$0xff] }
 0x568   : > { %2671 = vmatprep.mubr.msk.bf16.mxu1 %vm3303_vm0, %v3301_v0  ;;  %2681 = vmatprep.subr.bf16.mxu1 %v3301_v0 }
 0x569   : > { %1307 = vadd.xlane.f32.xlu0 %v1306_v46  ;;  %2702 = vmatpush3.bf16.msra.mxu0 %v2869_v25  ;;  %v2917_v25 = vld [vmem:[#allocation12 + $0xec] ss:$16 sps:$4 sm:$0xff]  }
 0x56b   : > { %917 = vadd.xlane.f32.xlu1 %v916_v48 }
 0x56d   : > { %920 = vadd.xlane.f32.xlu0 %v919_v49 }
 0x56e   : > { %2672 = vmatmul.mubr.msk.bf16.vlgmr.msra.gmra.mrb[20].mxu1 %vm903_vm2, %v1177_v33 }
 0x56f   : > { %2682 = vmatpush3.bf16.msra.mxu1 %v1311_v50  ;;  %2683 = vmatprep.mubr.msk.bf16.mxu1 %vm3303_vm0, %v3301_v0  ;;  %v3006_v50 = vld [vmem:[%s3642_s30] sm:$0xff] }
 0x576   : > { %2684 = vmatmul.mubr.msk.bf16.vlgmr.msra.gmra.mrb[24].mxu1 %vm903_vm2, %v1309_v36 }
 0x577   : > { %1780 = vmatprep.mubr.bf16.mxu1 %v3302_v26 }
 0x5e4   : > { %v1173_v38 = vpop.xlane.xlu0 %1172 }
 0x5e8   : > { %v1176_v53 = vpop.xlane.xlu0 %1175 }
 0x5f0   : > { %v1040_v54 = vpop.xlane.xlu1 %1039 }
 0x5f2   : > { %v1043_v40 = vpop.xlane.xlu0 %1042 }
 0x5f4   : > { %v1305_v55 = vpop.xlane.xlu1 %1304 }
 0x5f6   : > { %v1308_v56 = vpop.xlane.xlu0 %1307 }
 0x5f8   : > { %v918_v57 = vpop.xlane.xlu1 %917 }
 0x5f9   : > { %2970 = vrcp.f32 %v918_v57  ;;  %v2875_v57 = vld [vmem:[#allocation12 + $0xc] ss:$16 sps:$4 sm:$0xff]  }
 0x5fa   : > { %v921_v61 = vpop.xlane.xlu0 %920  ;;  %1791 = vmatprep.subr.bf16.mxu0 %v2875_v57  ;;  %v2918_v57 = vld [vmem:[#allocation14 + $0x40] sm:$0xff]  }
 0x5fb   : > { %2972 = vrcp.f32 %v921_v61  ;;  %v2870_v61 = vld [vmem:[#allocation12] ss:$16 sps:$4 sm:$0xff]  }
 0x5fc   : > { %2974 = vrcp.f32 %v1040_v54  ;;  %v3007_v54 = vld [vmem:[%s3642_s30 + $0x8] sm:$0xff]  ;;  %s3990_s30 = sld [smem:[#allocation24_spill]] }
 0x5fd   : > { %2976 = vrcp.f32 %v1043_v40 }
 0x5fe   : > { %2978 = vrcp.f32 %v1173_v38 }
 0x5ff   : > { %2980 = vrcp.f32 %v1176_v53 }
 0x600   : > { %2982 = vrcp.f32 %v1305_v55 }
 0x601   : > { %2984 = vrcp.f32 %v1308_v56  ;;  %v2872_v56 = vld [vmem:[#allocation12 + $0x4] ss:$16 sps:$4 sm:$0xff]  }
 0x602   : > { %1748 = vmatprep.subr.bf16.mxu1 %v2872_v56 }
 0x603   : > { %v2971_v63 = vpop.eup %2970  ;;  %1749 = vmatpush1.bf16.msra.mxu1 %v2870_v61  ;;  %v2919_v61 = vld [vmem:[#allocation14 + $0xc0] sm:$0xff]  }
 0x604   : > { %v969_v1 = vmul.f32 %v2971_v63, %v3746_v47  ;;  %v2873_v63 = vld [vmem:[#allocation12 + $0x8] ss:$16 sps:$4 sm:$0xff]  }
 0x605   : > { %v2973_v2 = vpop.eup %2972 }
 0x606   : > { %971 = vst.msk [vmem:[#allocation2] sm:$0xff] %vm855_vm1, %v969_v1  ;;  %v970_v3 = vmul.f32 %v2973_v2, %v3749_v52  ;;  %v2975_v47 = vpop.eup %2974  ;;  %v2878_v1 = vld [vmem:[#allocation12 + $0x24] ss:$16 sps:$4 sm:$0xff]   ;;  %v2881_v2 = vld [vmem:[#allocation12 + $0x2c] ss:$16 sps:$4 sm:$0xff]  }
 0x607   : > { %v2977_v9 = vpop.eup %2976  ;;  %1750 = vmatprep.subr.bf16.mxu1 %v2878_v1  ;;  %v2921_v1 = vld [vmem:[#allocation14 + $0x80] sm:$0xff]  }
 0x608   : > { %972 = vst.msk [vmem:[#allocation2 + $0x8] sm:$0xff] %vm855_vm1, %v970_v3  ;;  %v2979_v15 = vpop.eup %2978  ;;  %v2876_v3 = vld [vmem:[#allocation12 + $0x20] ss:$16 sps:$4 sm:$0xff]  }
 0x609   : > { %v2981_v21 = vpop.eup %2980  ;;  %1751 = vmatpush1.bf16.msra.mxu1 %v2876_v3  ;;  %v2923_v3 = vld [vmem:[#allocation14 + $0xc8] sm:$0xff]  }
 0x60a   : > { %v2983_v18 = vpop.eup %2982  ;;  %1752 = vmatprep.subr.bf16.mxu1 %v2884_v5  ;;  %v2925_v5 = vld [vmem:[#allocation14 + $0x88] sm:$0xff]  }
 0x60b   : > { %v2985_v30 = vpop.eup %2984 }
 0x639   : > { %v1086_v7 = vpop.f32.mrb[16].mxu1 }
 0x63a   : > { %v1095_v8 = vmul.f32 %v2975_v47, %v1086_v7  ;;  %v2661_v52 = vpop.f32.mrb[17].mxu1  ;;  %v2882_v47 = vld [vmem:[#allocation12 + $0x40] ss:$16 sps:$4 sm:$0xff]   ;;  %v2885_v7 = vld [vmem:[#allocation12 + $0x48] ss:$16 sps:$4 sm:$0xff]  }
 0x63b   : > { %v1089_v10 = vpop.f32.mrb[18].mxu1  ;;  %1753 = vmatpush1.bf16.msra.mxu1 %v2882_v47  ;;  %v2893_v52 = vld [vmem:[#allocation12 + $0x6c] ss:$16 sps:$4 sm:$0xff]   ;;  %v2927_v47 = vld [vmem:[#allocation14 + $0xd0] sm:$0xff]  }
 0x63c   : > { %v1096_v12 = vmul.f32 %v2977_v9, %v1089_v10  ;;  %1099 = vrot.lane.b32.xlu1 %v1095_v8, %s3306_s22  ;;  %v2662_v13 = vpop.f32.mrb[19].mxu1  ;;  %v2890_v8 = vld [vmem:[#allocation12 + $0x64] ss:$16 sps:$4 sm:$0xff]   ;;  %v2888_v9 = vld [vmem:[#allocation12 + $0x60] ss:$16 sps:$4 sm:$0xff]  }
 0x63d   : > { %v2891_v10 = vld [vmem:[#allocation12 + $0x68] ss:$16 sps:$4 sm:$0xff]   ;;  %1754 = vmatprep.subr.bf16.mxu1 %v2890_v8  ;;  %v2929_v8 = vld [vmem:[#allocation14 + $0x90] sm:$0xff]  }
 0x63e   : > { %1101 = vrot.lane.b32.xlu0 %v1096_v12, %s3306_s22  ;;  %v2894_v12 = vld [vmem:[#allocation12 + $0x80] ss:$16 sps:$4 sm:$0xff]   ;;  %v2897_v13 = vld [vmem:[#allocation12 + $0x88] ss:$16 sps:$4 sm:$0xff]  }
 0x63f   : > { %1755 = vmatpush1.bf16.msra.mxu1 %v2888_v9  ;;  %v2931_v9 = vld [vmem:[#allocation14 + $0xd8] sm:$0xff]  }
 0x640   : > { %1756 = vmatprep.subr.bf16.mxu1 %v2896_v11  ;;  %v2933_v11 = vld [vmem:[#allocation14 + $0x98] sm:$0xff]  }
 0x641   : > { %v1218_v16 = vpop.f32.mrb[20].mxu1 }
 0x642   : > { %v1227_v19 = vmul.f32 %v2979_v15, %v1218_v16  ;;  %v2673_v20 = vpop.f32.mrb[21].mxu1  ;;  %v2902_v15 = vld [vmem:[#allocation12 + $0xa4] ss:$16 sps:$4 sm:$0xff]   ;;  %v2905_v16 = vld [vmem:[#allocation12 + $0xac] ss:$16 sps:$4 sm:$0xff]  }
 0x643   : > { %v1221_v22 = vpop.f32.mrb[22].mxu1  ;;  %1757 = vmatpush1.bf16.msra.mxu1 %v2894_v12  ;;  %v2908_v20 = vld [vmem:[#allocation12 + $0xc4] ss:$16 sps:$4 sm:$0xff]  }
 0x644   : > { %v1228_v23 = vmul.f32 %v2981_v21, %v1221_v22  ;;  %1231 = vrot.lane.b32.xlu1 %v1227_v19, %s3305_s21  ;;  %v2674_v24 = vpop.f32.mrb[23].mxu1  ;;  %v2903_v19 = vld [vmem:[#allocation12 + $0xa8] ss:$16 sps:$4 sm:$0xff]   ;;  %1758 = vmatprep.subr.bf16.mxu1 %v2902_v15  ;;  %v2911_v21 = vld [vmem:[#allocation12 + $0xcc] ss:$16 sps:$4 sm:$0xff]   ;;  %v2934_v12 = vld [vmem:[#allocation14 + $0x60] sm:$0xff]  }
 0x645   : > { %v2906_v22 = vld [vmem:[#allocation12 + $0xc0] ss:$16 sps:$4 sm:$0xff]   ;;  %v2914_v24 = vld [vmem:[#allocation12 + $0xe4] ss:$16 sps:$4 sm:$0xff]  }
 0x646   : > { %v2937_v15 = vld [vmem:[#allocation14 + $0xa0] sm:$0xff]  }
 0x647   : > { %1759 = vmatpush1.bf16.msra.mxu1 %v2900_v17  ;;  %v2939_v17 = vld [vmem:[#allocation14 + $0xe8] sm:$0xff]  }
 0x648   : > { %1233 = vrot.lane.b32.xlu1 %v1228_v23, %s3305_s21  ;;  %v2909_v23 = vld [vmem:[#allocation12 + $0xc8] ss:$16 sps:$4 sm:$0xff]   ;;  %1760 = vmatprep.subr.bf16.mxu1 %v2908_v20 }
 0x649   : > { %v1350_v27 = vpop.f32.mrb[24].mxu1  ;;  %v2941_v20 = vld [vmem:[#allocation14 + $0xa8] sm:$0xff]  }
 0x64a   : > { %v1359_v28 = vmul.f32 %v2983_v18, %v1350_v27  ;;  %v2685_v29 = vpop.f32.mrb[25].mxu1  ;;  %v2912_v18 = vld [vmem:[#allocation12 + $0xe0] ss:$16 sps:$4 sm:$0xff]   ;;  %v2915_v27 = vld [vmem:[#allocation12 + $0xe8] ss:$16 sps:$4 sm:$0xff]  }
 0x64b   : > { %v1353_v31 = vpop.f32.mrb[26].mxu1  ;;  %1761 = vmatpush1.bf16.msra.mxu1 %v2906_v22  ;;  %v2943_v22 = vld [vmem:[#allocation14 + $0xf0] sm:$0xff]  }
 0x64c   : > { %v1360_v32 = vmul.f32 %v2985_v30, %v1353_v31  ;;  %1363 = vrot.lane.b32.xlu1 %v1359_v28, %s3304_s29  ;;  %v2686_v33 = vpop.f32.mrb[27].mxu1  ;;  %1762 = vmatprep.subr.bf16.mxu1 %v2914_v24  ;;  %v2945_v24 = vld [vmem:[#allocation14 + $0xb0] sm:$0xff]  }
 0x64e   : > { %1365 = vrot.lane.b32.xlu0 %v1360_v32, %s3304_s29  ;;  %s3991_s29 = sld [smem:[#allocation25_spill]] }
 0x64f   : > { %1763 = vmatpush1.bf16.msra.mxu1 %v2912_v18  ;;  %v2947_v18 = vld [vmem:[#allocation14 + $0xf8] sm:$0xff]  }
 0x650   : > { %2575 = vmatprep.subr.bf16.mxu1 %v2918_v57 }
 0x6ae   : > { %v1100_v34 = vpop.permute.xlu1 %1099 }
 0x6af   : > { %1106 = vst.msk [vmem:[#allocation2] sm:$0xff] %vm1105_vm3, %v1100_v34 }
 0x6b0   : > { %v1102_v35 = vpop.permute.xlu0 %1101 }
 0x6b1   : > { %1107 = vst.msk [vmem:[#allocation2 + $0x8] sm:$0xff] %vm1105_vm3, %v1102_v35 }
 0x6b6   : > { %v1232_v0 = vpop.permute.xlu1 %1231 }
 0x6b7   : > { %1238 = vst.msk [vmem:[#allocation2] sm:$0xff] %vm1237_vm4, %v1232_v0 }
 0x6ba   : > { %v1234_v36 = vpop.permute.xlu1 %1233 }
 0x6bb   : > { %1239 = vst.msk [vmem:[#allocation2 + $0x8] sm:$0xff] %vm1237_vm4, %v1234_v36 }
 0x6be   : > { %v1364_v37 = vpop.permute.xlu1 %1363 }
 0x6bf   : > { %1370 = vst.msk [vmem:[#allocation2] sm:$0xff] %vm1369_vm5, %v1364_v37 }
 0x6c0   : > { %v1366_v39 = vpop.permute.xlu0 %1365 }
 0x6c1   : > { %1371 = vst.msk [vmem:[#allocation2 + $0x8] sm:$0xff] %vm1369_vm5, %v1366_v39 }
 0x6c6   : > { %v1372_v41 = vld [vmem:[#allocation2] sm:$0xff] }
 0x6c8   : > { %v1373_v42 = vld [vmem:[#allocation2 + $0x8] sm:$0xff] }
 0x6c9   : > { %v1374_v43 = vpack.c.bf16 %v1373_v42, %v1372_v41 }
 0x6cb   : > { %2704 = vmatmul.mubr.bf16.vlgmr.msra.gmra.mrb[12].mxu0 %v1374_v43 }
 0x6cc   : > { %1823 = vmatprep.mubr.bf16.mxu0 %v3302_v26  ;;  %1792 = vmatpush1.bf16.msra.mxu0 %v2873_v63  ;;  %v2920_v63 = vld [vmem:[#allocation14] sm:$0xff]  }
 0x6cd   : > { %1793 = vmatprep.subr.bf16.mxu0 %v2881_v2  ;;  %v2922_v2 = vld [vmem:[#allocation14 + $0x48] sm:$0xff]  }
 0x6d0   : > { %1794 = vmatpush1.bf16.msra.mxu0 %v2879_v4  ;;  %v2924_v4 = vld [vmem:[#allocation14 + $0x8] sm:$0xff]  }
 0x6d1   : > { %1795 = vmatprep.subr.bf16.mxu0 %v2887_v6  ;;  %v2926_v6 = vld [vmem:[#allocation14 + $0x50] sm:$0xff]  }
 0x6d4   : > { %1796 = vmatpush1.bf16.msra.mxu0 %v2885_v7  ;;  %v2928_v7 = vld [vmem:[#allocation14 + $0x10] sm:$0xff]  }
 0x6d5   : > { %1797 = vmatprep.subr.bf16.mxu0 %v2893_v52  ;;  %v2930_v52 = vld [vmem:[#allocation14 + $0x58] sm:$0xff]  }
 0x6d8   : > { %1798 = vmatpush1.bf16.msra.mxu0 %v2891_v10  ;;  %v2932_v10 = vld [vmem:[#allocation14 + $0x18] sm:$0xff]  }
 0x6d9   : > { %1799 = vmatprep.subr.bf16.mxu0 %v2899_v14  ;;  %v2936_v14 = vld [vmem:[#allocation14 + $0x20] sm:$0xff]  }
 0x6dc   : > { %1800 = vmatpush1.bf16.msra.mxu0 %v2897_v13  ;;  %v2935_v13 = vld [vmem:[#allocation14 + $0xe0] sm:$0xff]  }
 0x6dd   : > { %1801 = vmatprep.subr.bf16.mxu0 %v2905_v16  ;;  %v2938_v16 = vld [vmem:[#allocation14 + $0x68] sm:$0xff]  }
 0x6e0   : > { %1802 = vmatpush1.bf16.msra.mxu0 %v2903_v19  ;;  %v2940_v19 = vld [vmem:[#allocation14 + $0x28] sm:$0xff]  }
 0x6e1   : > { %1803 = vmatprep.subr.bf16.mxu0 %v2911_v21  ;;  %v2942_v21 = vld [vmem:[#allocation14 + $0x70] sm:$0xff]  }
 0x6e4   : > { %1804 = vmatpush1.bf16.msra.mxu0 %v2909_v23  ;;  %v2944_v23 = vld [vmem:[#allocation14 + $0x30] sm:$0xff]  }
 0x6e5   : > { %1805 = vmatprep.subr.bf16.mxu0 %v2917_v25  ;;  %v2946_v25 = vld [vmem:[#allocation14 + $0x78] sm:$0xff]  }
 0x6e8   : > { %1806 = vmatpush1.bf16.msra.mxu0 %v2915_v27  ;;  %v2948_v27 = vld [vmem:[#allocation14 + $0x38] sm:$0xff]  }
 0x6e9   : > { %2597 = vmatprep.subr.bf16.mxu0 %v2919_v61 }
 0x79e   : > { %v1480_v45 = vpop.f32.mrb[12].mxu0 }
 0x79f   : > { %v1481_v46 = vadd.f32 %v2458_v44, %v1480_v45  ;;  %v2705_v48 = vpop.f32.mrb[13].mxu0 }
 0x7a0   : > { %v1483_v49 = vpop.f32.mrb[14].mxu0 }
 0x7a1   : > { %v3804_v51 = vadd.f32 %v3006_v50, %v1481_v46  ;;  %v1484_v38 = vadd.f32 %v2458_v44, %v1483_v49  ;;  %v2706_v53 = vpop.f32.mrb[15].mxu0  ;;  %v2467_v46 = vld [vmem:[%s3989_s17] ss:$0 sm:$0xff] }
 0x7a2   : > { %v2468_v53 = vld [vmem:[%s3990_s30] ss:$0 sm:$0xff]  ;;  %s3901_s30 = scalar_lea.hbm %s3993_s13, %s2540_s20 }
 0x7a3   : > { %v3807_v40 = vadd.f32 %v3007_v54, %v1484_v38  ;;  %1491 = vadd.xlane.f32.xlu1 %v3804_v51  ;;  %v1497_v26 = vmul.f32 %v3804_v51, %v3804_v51 }
 0x7a5   : > { %1493 = vadd.xlane.f32.xlu0 %v3807_v40  ;;  %v1498_v55 = vmul.f32 %v3807_v40, %v3807_v40 }
 0x7a9   : > { %1499 = vadd.xlane.f32.xlu0 %v1497_v26 }
 0x7ad   : > { %1501 = vadd.xlane.f32.xlu0 %v1498_v55 }
 0x830   : > { %v1492_v28 = vpop.xlane.xlu1 %1491 }
 0x831   : > { %v1495_v30 = vmul.f32 0.0078125, %v1492_v28  ;;  %v2949_v28 = vld [vmem:[#allocation14 + $0xb8] sm:$0xff]  }
 0x832   : > { %v1494_v29 = vpop.xlane.xlu0 %1493 }
 0x833   : > { %v1505_v32 = vmul.f32 %v1495_v30, %v1495_v30  ;;  %v1496_v33 = vmul.f32 0.0078125, %v1494_v29  ;;  %v1509_v43 = vsub.f32 %v3804_v51, %v1495_v30  ;;  %v1566_v29 = vld [vmem:[%s3991_s29] sm:$0xf]  ;;  %v1582_v30 = vsub.s32 3, %v3691_v58  ;;  %s3212_s29 = scalar_lea.vmem %s3211_s24, 512 }
 0x834   : > { %p3214_p3 = scmp.lt.s32.totalorder %s3212_s29, %s3206_s15 }
 0x835   : > { %v1506_v36 = vmul.f32 %v1496_v33, %v1496_v33  ;;  %v1510_v48 = vsub.f32 %v3807_v40, %v1496_v33  ;;  %v1575_v33 = vrot.slane %v1566_v29, %v631_v62 }
 0x836   : > { %v1500_v31 = vpop.xlane.xlu0 %1499  ;;  %p3215_p2 = por %p3214_p3, %p3213_p1 }
 0x837   : > { %v1503_v34 = vmul.f32 0.0078125, %v1500_v31  ;;  %v1571_v31 = vrot.slane %v1566_v29, %v627_v59 }
 0x838   : > { %p3216_p8 = pnand %p3215_p2, %p3209_p13 }
 0x839   : > { %v1507_v35 = vsub.f32 %v1503_v34, %v1505_v32  ;;  %v1579_v32 = vrot.slane %v1566_v29, %v635_v60  ;;  %v1583_v34 = vrot.slane %v1566_v29, %v1582_v30 }
 0x83a   : > { %v1502_v0 = vpop.xlane.xlu0 %1501 }
 0x83b   : > { %v1511_v37 = vadd.f32 1e-05, %v1507_v35  ;;  %v1504_v39 = vmul.f32 0.0078125, %v1502_v0 }
 0x83d   : > { %2986 = vrsqrt.f32 %v1511_v37  ;;  %v1508_v41 = vsub.f32 %v1504_v39, %v1506_v36 }
 0x83f   : > { %v1512_v42 = vadd.f32 1e-05, %v1508_v41 }
 0x841   : > { %2988 = vrsqrt.f32 %v1512_v42 }
 0x847   : > { %v2987_v44 = vpop.eup %2986 }
 0x848   : > { %v1515_v45 = vmul.f32 %v2987_v44, %v1509_v43 }
 0x84a   : > { %v1523_v38 = vmul.f32 %v2467_v46, %v1515_v45 }
 0x84b   : > { %v2989_v49 = vpop.eup %2988 }
 0x84c   : > { %v1516_v50 = vmul.f32 %v2989_v49, %v1510_v48  ;;  %v1531_v26 = vadd.f32 %v2468_v53, %v1523_v38 }
 0x84e   : > { %v1524_v54 = vmul.f32 %v2467_v46, %v1516_v50 }
 0x850   : > { %v1532_v55 = vadd.f32 %v2468_v53, %v1524_v54 }
 0x852   : > { %v1533_v56 = vpack.c.bf16 %v1532_v55, %v1531_v26 }
 0x854   : > { %1781 = vmatmul.mubr.bf16.vlgmr.msra.gmra.mrb[28].mxu1 %v1533_v56  ;;  %1824 = vmatmul.mubr.bf16.vlgmr.msra.gmra.mrb[16].mxu0 %v1533_v56 }
 0x855   : > { %2576 = vmatpush3.bf16.msra.mxu1 %v2920_v63  ;;  %2598 = vmatpush3.bf16.msra.mxu0 %v2921_v1 }
 0x856   : > { %2577 = vmatprep.subr.bf16.mxu1 %v2922_v2  ;;  %2599 = vmatprep.subr.bf16.mxu0 %v2923_v3 }
 0x859   : > { %2578 = vmatpush3.bf16.msra.mxu1 %v2924_v4  ;;  %2600 = vmatpush3.bf16.msra.mxu0 %v2925_v5 }
 0x85a   : > { %2579 = vmatprep.subr.bf16.mxu1 %v2926_v6  ;;  %2601 = vmatprep.subr.bf16.mxu0 %v2927_v47 }
 0x85d   : > { %2580 = vmatpush3.bf16.msra.mxu1 %v2928_v7  ;;  %2602 = vmatpush3.bf16.msra.mxu0 %v2929_v8 }
 0x85e   : > { %2581 = vmatprep.subr.bf16.mxu1 %v2930_v52  ;;  %2603 = vmatprep.subr.bf16.mxu0 %v2931_v9 }
 0x861   : > { %2582 = vmatpush3.bf16.msra.mxu1 %v2932_v10  ;;  %2604 = vmatpush3.bf16.msra.mxu0 %v2933_v11 }
 0x862   : > { %2583 = vmatprep.subr.bf16.mxu1 %v2934_v12  ;;  %2605 = vmatprep.subr.bf16.mxu0 %v2935_v13 }
 0x865   : > { %2584 = vmatpush3.bf16.msra.mxu1 %v2936_v14  ;;  %2606 = vmatpush3.bf16.msra.mxu0 %v2937_v15 }
 0x866   : > { %2585 = vmatprep.subr.bf16.mxu1 %v2938_v16  ;;  %2607 = vmatprep.subr.bf16.mxu0 %v2939_v17 }
 0x869   : > { %2586 = vmatpush3.bf16.msra.mxu1 %v2940_v19  ;;  %2608 = vmatpush3.bf16.msra.mxu0 %v2941_v20 }
 0x86a   : > { %2587 = vmatprep.subr.bf16.mxu1 %v2942_v21  ;;  %2609 = vmatprep.subr.bf16.mxu0 %v2943_v22 }
 0x86d   : > { %2588 = vmatpush3.bf16.msra.mxu1 %v2944_v23  ;;  %2610 = vmatpush3.bf16.msra.mxu0 %v2945_v24 }
 0x86e   : > { %2589 = vmatprep.subr.bf16.mxu1 %v2946_v25  ;;  %2611 = vmatprep.subr.bf16.mxu0 %v2947_v18 }
 0x871   : > { %2590 = vmatpush3.bf16.msra.mxu1 %v2948_v27  ;;  %2612 = vmatpush3.bf16.msra.mxu0 %v2949_v28 }
 0x927   : > { %v1782_v35 = vpop.f32.mrb[28].mxu1  ;;  %v1825_v0 = vpop.f32.mrb[16].mxu0 }
 0x928   : > { %v3833_v36 = vadd.f32 %v1782_v35, %v1571_v31  ;;  %v3835_v37 = vadd.f32 %v1825_v0, %v1579_v32  ;;  %v1784_v39 = vpop.f32.mrb[29].mxu1  ;;  %v1827_v41 = vpop.f32.mrb[17].mxu0 }
 0x929   : > { %v3837_v42 = vadd.f32 %v1784_v39, %v1575_v33  ;;  %v3839_v43 = vadd.f32 %v1827_v41, %v1583_v34  ;;  %v1786_v59 = vpop.f32.mrb[30].mxu1  ;;  %v1829_v44 = vpop.f32.mrb[18].mxu0 }
 0x92a   : > { %v1834_v60 = vmul.f32 %v3833_v36, %v3833_v36  ;;  %v1836_v58 = vmul.f32 %v3835_v37, %v3835_v37  ;;  %v3845_v62 = vadd.f32 %v1786_v59, %v1571_v31  ;;  %v3847_v45 = vadd.f32 %v1829_v44, %v1579_v32  ;;  %v1788_v46 = vpop.f32.mrb[31].mxu1  ;;  %v1831_v48 = vpop.f32.mrb[19].mxu0 }
 0x92b   : > { %v1835_v49 = vmul.f32 %v3837_v42, %v3837_v42  ;;  %v1837_v50 = vmul.f32 %v3839_v43, %v3839_v43  ;;  %v3853_v38 = vadd.f32 %v1788_v46, %v1575_v33  ;;  %v3855_v53 = vadd.f32 %v1831_v48, %v1583_v34 }
 0x92c   : > { %v1842_v54 = vmul.f32 %v1834_v60, %v3833_v36  ;;  %v1844_v26 = vmul.f32 %v1836_v58, %v3835_v37  ;;  %v1838_v55 = vmul.f32 %v3845_v62, %v3845_v62  ;;  %v1840_v56 = vmul.f32 %v3847_v45, %v3847_v45 }
 0x92d   : > { %v1843_v57 = vmul.f32 %v1835_v49, %v3837_v42  ;;  %v1845_v61 = vmul.f32 %v1837_v50, %v3839_v43  ;;  %v1839_v63 = vmul.f32 %v3853_v38, %v3853_v38  ;;  %v1841_v1 = vmul.f32 %v3855_v53, %v3855_v53 }
 0x92e   : > { %v1850_v2 = vmul.f32 0.044715, %v1842_v54  ;;  %v1852_v3 = vmul.f32 0.044715, %v1844_v26  ;;  %v1846_v4 = vmul.f32 %v1838_v55, %v3845_v62  ;;  %v1848_v5 = vmul.f32 %v1840_v56, %v3847_v45 }
 0x92f   : > { %v1851_v6 = vmul.f32 0.044715, %v1843_v57  ;;  %v1853_v47 = vmul.f32 0.044715, %v1845_v61  ;;  %v1847_v7 = vmul.f32 %v1839_v63, %v3853_v38  ;;  %v1849_v8 = vmul.f32 %v1841_v1, %v3855_v53 }
 0x930   : > { %v1858_v52 = vadd.f32 %v1850_v2, %v3833_v36  ;;  %v1860_v9 = vadd.f32 %v1852_v3, %v3835_v37  ;;  %v1854_v10 = vmul.f32 0.044715, %v1846_v4  ;;  %v1856_v11 = vmul.f32 0.044715, %v1848_v5 }
 0x931   : > { %v1859_v12 = vadd.f32 %v1851_v6, %v3837_v42  ;;  %v1861_v13 = vadd.f32 %v1853_v47, %v3839_v43  ;;  %v1855_v14 = vmul.f32 0.044715, %v1847_v7  ;;  %v1857_v15 = vmul.f32 0.044715, %v1849_v8 }
 0x932   : > { %v1866_v16 = vmul.f32 0.7978846, %v1858_v52  ;;  %v1868_v17 = vmul.f32 0.7978846, %v1860_v9  ;;  %v1862_v19 = vadd.f32 %v1854_v10, %v3845_v62  ;;  %v1864_v20 = vadd.f32 %v1856_v11, %v3847_v45 }
 0x933   : > { %v1867_v21 = vmul.f32 0.7978846, %v1859_v12  ;;  %v1869_v22 = vmul.f32 0.7978846, %v1861_v13  ;;  %v1863_v23 = vadd.f32 %v1855_v14, %v3853_v38  ;;  %v1865_v24 = vadd.f32 %v1857_v15, %v3855_v53 }
 0x934   : > { %2990 = vtanh.f32 %v1866_v16  ;;  %v1870_v25 = vmul.f32 0.7978846, %v1862_v19  ;;  %v1872_v18 = vmul.f32 0.7978846, %v1864_v20 }
 0x935   : > { %2992 = vtanh.f32 %v1868_v17  ;;  %v1871_v27 = vmul.f32 0.7978846, %v1863_v23  ;;  %v1873_v28 = vmul.f32 0.7978846, %v1865_v24 }
 0x936   : > { %2994 = vtanh.f32 %v1867_v21 }
 0x937   : > { %2996 = vtanh.f32 %v1869_v22 }
 0x938   : > { %2998 = vtanh.f32 %v1870_v25 }
 0x939   : > { %3000 = vtanh.f32 %v1872_v18 }
 0x93a   : > { %3002 = vtanh.f32 %v1871_v27 }
 0x93b   : > { %3004 = vtanh.f32 %v1873_v28 }
 0x93e   : > { %v2991_v29 = vpop.eup %2990 }
 0x93f   : > { %v2993_v30 = vpop.eup %2992  ;;  %v1882_v31 = vadd.f32 1.0, %v2991_v29 }
 0x940   : > { %v2995_v32 = vpop.eup %2994  ;;  %v1884_v33 = vadd.f32 1.0, %v2993_v30 }
 0x941   : > { %v2997_v34 = vpop.eup %2996  ;;  %v1883_v35 = vadd.f32 1.0, %v2995_v32  ;;  %v1890_v59 = vmul.f32 0.5, %v1882_v31 }
 0x942   : > { %v2999_v0 = vpop.eup %2998  ;;  %v1885_v39 = vadd.f32 1.0, %v2997_v34  ;;  %v1892_v58 = vmul.f32 0.5, %v1884_v33 }
 0x943   : > { %v3001_v41 = vpop.eup %3000  ;;  %v1886_v44 = vadd.f32 1.0, %v2999_v0  ;;  %v1891_v54 = vmul.f32 0.5, %v1883_v35  ;;  %v1898_v57 = vmul.f32 %v1890_v59, %v3833_v36 }
 0x944   : > { %v3003_v60 = vpop.eup %3002  ;;  %v1888_v46 = vadd.f32 1.0, %v3001_v41  ;;  %v1893_v56 = vmul.f32 0.5, %v1885_v39  ;;  %v1900_v1 = vmul.f32 %v1892_v58, %v3835_v37 }
 0x945   : > { %v3005_v48 = vpop.eup %3004  ;;  %v1894_v49 = vmul.f32 0.5, %v1886_v44  ;;  %v1887_v50 = vadd.f32 1.0, %v3003_v60  ;;  %v1899_v4 = vmul.f32 %v1891_v54, %v3837_v42  ;;  %v2501_v42 = vld [vmem:[%s3992_s16] ss:$0 sm:$0xff] }
 0x946   : > { %v1896_v26 = vmul.f32 0.5, %v1888_v46  ;;  %v1889_v55 = vadd.f32 1.0, %v3005_v48  ;;  %v1901_v47 = vmul.f32 %v1893_v56, %v3839_v43 }
 0x947   : > { %v1902_v61 = vmul.f32 %v1894_v49, %v3845_v62  ;;  %v1895_v63 = vmul.f32 0.5, %v1887_v50 }
 0x948   : > { %v1904_v2 = vmul.f32 %v1896_v26, %v3847_v45  ;;  %v1897_v3 = vmul.f32 0.5, %v1889_v55 }
 0x949   : > { %v1903_v5 = vmul.f32 %v1895_v63, %v3853_v38  ;;  %v1906_v6 = vpack.c.bf16 %v1902_v61, %v1898_v57 }
 0x94a   : > { %v1905_v7 = vmul.f32 %v1897_v3, %v3855_v53  ;;  %v1908_v8 = vpack.c.bf16 %v1904_v2, %v1900_v1 }
 0x94b   : > { %v1907_v52 = vpack.c.bf16 %v1903_v5, %v1899_v4 }
 0x94c   : > { %v1909_v36 = vpack.c.bf16 %v1905_v7, %v1901_v47 }
 0x94d   : > { %2205 = vmatprep.mubr.bf16.mxu1 %v1907_v52 }
 0x94e   : > { %2246 = vmatprep.mubr.bf16.mxu0 %v1909_v36  ;;  %2206 = vmatmul.mubr.bf16.vlgmr.msra.gmra.mrb[32].mxu1 %v1906_v6 }
 0x94f   : > { %2247 = vmatmul.mubr.bf16.vlgmr.msra.gmra.mrb[20].mxu0 %v1908_v8 }
 0xa21   : > { %v2591_v37 = vpop.f32.mrb[32].mxu1 }
 0xa22   : > { %v2613_v62 = vpop.f32.mrb[20].mxu0  ;;  %v2592_v45 = vpop.f32.mrb[33].mxu1 }
 0xa23   : > { %v2593_v38 = vadd.f32 %v2592_v45, %v2591_v37  ;;  %v2614_v43 = vpop.f32.mrb[21].mxu0  ;;  %v2594_v9 = vpop.f32.mrb[34].mxu1 }
 0xa24   : > { %v2615_v53 = vadd.f32 %v2614_v43, %v2613_v62  ;;  %v2616_v10 = vpop.f32.mrb[22].mxu0  ;;  %v2595_v11 = vpop.f32.mrb[35].mxu1 }
 0xa25   : > { %v2208_v12 = vadd.f32 %v2593_v38, %v2501_v42  ;;  %v2596_v13 = vadd.f32 %v2595_v11, %v2594_v9  ;;  %v2617_v14 = vpop.f32.mrb[23].mxu0 }
 0xa26   : > { %v2618_v15 = vadd.f32 %v2617_v14, %v2616_v10 }
 0xa27   : > { %v2249_v16 = vadd.f32 %v2615_v53, %v2208_v12  ;;  %v2211_v17 = vadd.f32 %v2596_v13, %v2501_v42 }
 0xa29   : > { %v2255_v19 = vadd.f32 %v2249_v16, %v3804_v51  ;;  %v2252_v20 = vadd.f32 %v2618_v15, %v2211_v17 }
 0xa2b   : > { %2257 = vst [vmem:[%s541_s23] sm:$0xff] %v2255_v19  ;;  %v2256_v21 = vadd.f32 %v2252_v20, %v3807_v40 }
 0xa2d   : > { %2258 = vst [vmem:[%s541_s23 + $0x8] sm:$0xff] %v2256_v21 }
 0xa2e   : > { %3219 = shalt.err (!%p3216_p8)
}
 0xa2f   : > { %s3220_s21 = scalar_lea.hbm %s3901_s30, 256  ;;  %s3224_s23 = scalar_lea.hbm %s3993_s13, 512 }
 0xa30   : > { %p3221_p10 = scmp.ne.s32.totalorder %s3901_s30, %s3220_s21  ;;  %p3225_p0 = scmp.lt.u32.totalorder %s3901_s30, %s3993_s13 }
 0xa31   : > { %p3226_p5 = scmp.lt.u32.totalorder %s3224_s23, %s3220_s21  ;;  %p3228_p6 = scmp.lt.u32.totalorder %s3220_s21, %s3901_s30 }
 0xa32   : > { %p3222_p11 = pnand %p3221_p10, %p3994_p9 }
 0xa33   : > { %p3227_p7 = por %p3226_p5, %p3225_p0 }
 0xa34   : > { %p3223_p12 = pneg %p3222_p11 }
 0xa35   : > { %p3229_p4 = por %p3228_p6, %p3227_p7 }
 0xa37   : > { %p3230_p13 = pnand %p3229_p4, %p3223_p12 }
 0xa39   : > { %3233 = shalt.err (!%p3230_p13)
}
 0xa3a   : > { %s3308_s8 = smov 128   ;;  %s3309_s15 = smov 8  }
 0xa3b   : > { %2733 = dma.vmem_to_hbm [thread:$0]  (%p3994_p9), %s3896_s19, 256, %s3901_s30, %s2260_s12, %s3308_s8, %s3308_s8, %s3309_s15  }
 0xa3c PF: > { %s2288_s14 = sand.u32 1, %s3272_s25   ;;  %p3995_p1 = scmp.ne.s32.totalorder %s3980_s7, 0 }
 0xa3d   : > { %p3996_p3 = scmp.ge.s32.totalorder %s3284_s28, 2  ;;  %s2289_s24 = scalar_lea.sflag [#allocation5], %s2288_s14 }
 0xa3f   : > { %p2759_p2 = pnand %p3996_p3, %p3995_p1 }
 0xa41   : > { %3267 = dma.done.wait (!%p2759_p2), %s2289_s24, 256  }
 0xa42   : > { %3269 = vsyncadd (!%p2759_p2), %s2289_s24, 4294967040  ;;  %p29_p8 = scmp.ge.s32.totalorder %s3557_s18, 4   ;;  %s3997_s25 = smov %s3276_s26 }
 0xa43   : > { %s3998_s26 = smov %s3280_s27  ;;  %s3999_s27 = smov %s3568_s10 }
 0xa44   : > { %s4000_s28 = smov %s3557_s18  ;;  %31 = sbr.rel (!%p29_p8) target bundleno = 16 (0x10), region = 141 }
 0xa4b   :  { %2294 = vsyncpa [#allocation4], 1 }
 0xa4c   :  { %2296 = vsyncpa [#allocation4 + $0x1], 1 }
 0xa4d   :  { %2297 = vsyncpa [#allocation7], 1 }
 0xa4e   :  { %2298 = vsyncpa [#allocation10], 1 }
 0xa4f   :  { %2299 = vsyncpa [#allocation13], 1 }
 0xa50   :  { %2300 = vsyncpa [#allocation5], 1 }
 0xa51   :  { %2302 = vsyncpa [#allocation5 + $0x1], 1 }

</bundles_post_ra>
